<compile_context>
chip_gen: v7x
topology: tpu7x:2x2x1
jax: 0.10.0
libtpu: 0.0.40
codegen_flags: <defaults>
</compile_context>

<pallas_src>
import functools
import math

import jax
import jax.numpy as jnp
import numpy as np
from jax import lax
from jax.experimental import pallas as pl
from jax.experimental.pallas import tpu as pltpu

EPS = 1e-5  # PyTorch GroupNorm default eps


def _round_up(v, m):
    return (v + m - 1) // m * m


def _lane_shift(a, t, n):
    """result[:, p] = a[:, (p + t) % n]  (circular, static t).

    Single XLU lane rotation; callers mask the wrapped lanes (or give them zero
    interpolation weight). Falls back to a concatenate when the lane count is
    not 128-aligned.
    """
    t = int(t) % n
    if t == 0:
        return a
    if n % 128 == 0:
        return pltpu.roll(a, n - t, axis=1)
    return jnp.concatenate([a[:, t:], a[:, :t]], axis=1)


def _dsconv_kernel(x_ref, w_off_ref, b_off_ref, gam_off_ref, bet_off_ref,
                   gmat_off_ref, w_dsc_ref, b_dsc_ref, gam_ref, bet_ref,
                   gmat_ref, o_ref, *, W, H, K, center, morph, extend_scope):
    """Full DSConv_pro forward for one batch element (lane-dense [C, W*H])."""
    WH = W * H
    C_in = x_ref.shape[0]
    x32 = x_ref[...].astype(jnp.float32)                        # [C_in, WH]

    # flat-position indices (w = row, h = column); exact integers in f32
    idx = lax.broadcasted_iota(jnp.int32, (1, WH), 1).astype(jnp.float32)
    wpos = jnp.floor((idx + 0.5) * (1.0 / H))                    # [1, WH]
    hpos = idx - wpos * H                                        # [1, WH]

    # ---------------- offset conv: 3x3, padding=1 (stacked im2col + 1 matmul)
    taps = []
    for kh in range(3):
        dw = kh - 1
        for kw in range(3):
            dh = kw - 1
            tap = x32 if (dw == 0 and dh == 0) else _lane_shift(x32, dw * H + dh, WH)
            conds = []
            if dh > 0:
                conds.append(hpos <= float(H - 1 - dh))
            elif dh < 0:
                conds.append(hpos >= float(-dh))
            if dw > 0:
                conds.append(wpos <= float(W - 1 - dw))
            elif dw < 0:
                conds.append(wpos >= float(-dw))
            if conds:
                ok = functools.reduce(jnp.logical_and, conds)
                tap = jnp.where(ok, tap, jnp.zeros_like(tap))    # zero padding
            taps.append(tap)
    tap_stack = jnp.concatenate(taps, axis=0).astype(jnp.bfloat16)   # [9*C_in, WH]
    offs = jnp.dot(w_off_ref[...], tap_stack,
                   preferred_element_type=jnp.float32) + b_off_ref[...]  # [N_pad, WH]

    # ---------------- GroupNorm(K, 2K) (group size 2, two-pass) + tanh
    s1 = jnp.sum(offs, axis=1, keepdims=True)                    # [N_pad, 1]
    mean_o = jnp.dot(gmat_off_ref[...], s1, preferred_element_type=jnp.float32)
    cent_o = offs - mean_o
    s2 = jnp.sum(cent_o * cent_o, axis=1, keepdims=True)
    var_o = jnp.dot(gmat_off_ref[...], s2, preferred_element_type=jnp.float32)
    offs = jnp.tanh(cent_o * lax.rsqrt(var_o + EPS) * gam_off_ref[...]
                    + bet_off_ref[...])                          # [N_pad, WH]

    # ---------------- morph-specific geometry
    if morph == 0:      # dynamic axis = W (y offsets), static spread along H
        base = 0
        pos, dyn_size, dstride = wpos, W, H
        spos, ssize, sstride = hpos, H, 1
    else:               # dynamic axis = H (x offsets), static spread along W
        base = K
        pos, dyn_size, dstride = hpos, H, 1
        spos, ssize, sstride = wpos, W, H

    # cumulative snake offsets, outward from the (zeroed) center index
    off_cum = [None] * K
    off_cum[center] = jnp.zeros((1, WH), jnp.float32)
    for i in range(1, center + 1):
        r_up = base + center + i
        r_dn = base + center - i
        off_cum[center + i] = off_cum[center + i - 1] + offs[r_up:r_up + 1, :]
        off_cum[center - i] = off_cum[center - i + 1] + offs[r_dn:r_dn + 1, :]

    # static kernel spread along the non-dynamic axis (integer, edge replicated
    # == clamped bilinear of the reference), built iteratively: one lane rotate
    # + one select per step
    spread = [None] * K
    spread[center] = x32
    for i in range(1, center + 1):
        up = spread[center + i - 1]
        spread[center + i] = jnp.where(spos + float(i) <= float(ssize - 1),
                                       _lane_shift(up, sstride, WH), up)
        dn = spread[center - i + 1]
        spread[center - i] = jnp.where(spos - float(i) >= 0.0,
                                       _lane_shift(dn, -sstride, WH), dn)

    # bounded-displacement bilinear gather along the dynamic axis (f32 VPU;
    # |cumulative offset| < |k-center| bounds the tap count per kernel index)
    sampled = [None] * K
    for k in range(K):
        if k == center:                    # offset is exactly 0 at the center
            sampled[k] = spread[k]
            continue
        coord = jnp.clip(pos + extend_scope * off_cum[k], 0.0, float(dyn_size - 1))
        c0 = jnp.floor(coord)
        frac = coord - c0
        c1 = jnp.minimum(c0 + 1.0, float(dyn_size - 1))
        md = min(dyn_size - 1, int(math.ceil(extend_scope * abs(k - center))) + 1)
        acc_k = jnp.zeros_like(spread[k])
        for d in range(-md, md + 1):
            tgt = pos + float(d)
            wgt = (jnp.where(c0 == tgt, 1.0 - frac, 0.0)
                   + jnp.where(c1 == tgt, frac, 0.0))            # [1, WH]
            src = spread[k] if d == 0 else _lane_shift(spread[k], d * dstride, WH)
            acc_k = acc_k + wgt * src
        sampled[k] = acc_k
    samp_stack = jnp.concatenate(sampled, axis=0).astype(jnp.bfloat16)  # [K*C_in, WH]

    # ---------------- snake conv (one matmul) + GroupNorm(C_out//4) + ReLU
    y = jnp.dot(w_dsc_ref[...], samp_stack,
                preferred_element_type=jnp.float32) + b_dsc_ref[...]    # [C_pad, WH]
    t1 = jnp.sum(y, axis=1, keepdims=True)
    mean = jnp.dot(gmat_ref[...], t1, preferred_element_type=jnp.float32)
    cent = y - mean
    t2 = jnp.sum(cent * cent, axis=1, keepdims=True)
    var = jnp.dot(gmat_ref[...], t2, preferred_element_type=jnp.float32)
    o_ref[...] = jnp.maximum(cent * lax.rsqrt(var + EPS) * gam_ref[...]
                             + bet_ref[...], 0.0)


def _vmem_limit_bytes(C_in, C_pad, N_pad, K, WH):
    """Per-grid-step footprint (blocks + live intermediates) with margin."""
    f32 = 4
    live = (3 * 9 * C_in + 3 * K * C_in + 3 * N_pad + 2 * K + 4 * C_pad + 16) * WH * f32
    blocks = 2 * (C_in * WH * 2) + 2 * (C_pad * WH * f32)
    est = live + blocks + (2 << 20)
    # cap well below v7x's 64 MiB physical VMEM; plenty for v5e/v6e (128 MiB)
    return int(min(max(2 * est, 16 * 1024 * 1024), 40 * 1024 * 1024))


def dsconv_pro_forward(x, params, kernel_size, extend_scope=1.0, morph=0):
    """DSConv_pro.forward: x [B, C_in, W, H] -> [B, C_out, W, H] (float32)."""
    if morph not in (0, 1):
        raise ValueError("morph should be 0 or 1.")
    B, C_in, W, H = x.shape
    K = int(kernel_size)
    assert K % 2 == 1, "snake kernel size must be odd (as in the reference)"
    WH = W * H
    N = 2 * K
    N_pad = _round_up(N, 8)

    # offset conv weights -> [N_pad, 9*C_in] (columns ordered (kh, kw, c))
    w_off = jnp.transpose(params["offset_w"], (0, 2, 3, 1)).reshape(N, 9 * C_in)
    w_off = jnp.pad(w_off, ((0, N_pad - N), (0, 0))).astype(jnp.bfloat16)
    b_off = jnp.pad(params["offset_b"], (0, N_pad - N)).reshape(N_pad, 1).astype(jnp.float32)
    gam_off = jnp.pad(params["gn_off_gamma"], (0, N_pad - N)).reshape(N_pad, 1).astype(jnp.float32)
    bet_off = jnp.pad(params["gn_off_beta"], (0, N_pad - N)).reshape(N_pad, 1).astype(jnp.float32)
    gmat_off = np.zeros((N_pad, N_pad), np.float32)
    for g in range(K):                     # GroupNorm(K, 2K): groups of 2 channels
        gmat_off[2 * g:2 * g + 2, 2 * g:2 * g + 2] = 1.0 / (2 * WH)
    gmat_off = jnp.asarray(gmat_off)

    # snake conv weights -> [C_pad, K*C_in] (columns ordered (k, c))
    if morph == 0:
        w_dsc = params["dsc_x_w"][:, :, :, 0]        # [C_out, C_in, K]
        b_dsc = params["dsc_x_b"]
    else:
        w_dsc = params["dsc_y_w"][:, :, 0, :]
        b_dsc = params["dsc_y_b"]
    C_out = w_dsc.shape[0]
    assert C_out % 4 == 0, "GroupNorm(C_out//4, C_out) requires C_out % 4 == 0"
    group_size = 4
    C_pad = _round_up(C_out, 8)
    w_dsc = jnp.transpose(w_dsc, (0, 2, 1)).reshape(C_out, K * C_in)
    w_dsc = jnp.pad(w_dsc, ((0, C_pad - C_out), (0, 0))).astype(jnp.bfloat16)
    b_dsc = jnp.pad(b_dsc, (0, C_pad - C_out)).reshape(C_pad, 1).astype(jnp.float32)
    gam = jnp.pad(params["gn_gamma"], (0, C_pad - C_out)).reshape(C_pad, 1).astype(jnp.float32)
    bet = jnp.pad(params["gn_beta"], (0, C_pad - C_out)).reshape(C_pad, 1).astype(jnp.float32)
    gmat = np.zeros((C_pad, C_pad), np.float32)
    for g in range(C_out // group_size):
        lo, hi = g * group_size, (g + 1) * group_size
        gmat[lo:hi, lo:hi] = 1.0 / (group_size * WH)
    gmat = jnp.asarray(gmat)

    x_flat = x.reshape(B, C_in, WH).astype(jnp.bfloat16)

    kern = functools.partial(_dsconv_kernel, W=W, H=H, K=K, center=K // 2,
                             morph=morph, extend_scope=float(extend_scope))
    out = pl.pallas_call(
        kern,
        out_shape=jax.ShapeDtypeStruct((B, C_pad, WH), jnp.float32),
        grid=(B,),
        in_specs=[
            pl.BlockSpec((None, C_in, WH), lambda b: (b, 0, 0)),   # x (per-batch block)
            pl.BlockSpec((N_pad, 9 * C_in), lambda b: (0, 0)),     # offset conv weights
            pl.BlockSpec((N_pad, 1), lambda b: (0, 0)),            # offset conv bias
            pl.BlockSpec((N_pad, 1), lambda b: (0, 0)),            # gn_offset gamma
            pl.BlockSpec((N_pad, 1), lambda b: (0, 0)),            # gn_offset beta
            pl.BlockSpec((N_pad, N_pad), lambda b: (0, 0)),        # gn_offset group matrix
            pl.BlockSpec((C_pad, K * C_in), lambda b: (0, 0)),     # snake conv weights
            pl.BlockSpec((C_pad, 1), lambda b: (0, 0)),            # snake conv bias
            pl.BlockSpec((C_pad, 1), lambda b: (0, 0)),            # gn gamma
            pl.BlockSpec((C_pad, 1), lambda b: (0, 0)),            # gn beta
            pl.BlockSpec((C_pad, C_pad), lambda b: (0, 0)),        # gn group matrix
        ],
        out_specs=pl.BlockSpec((None, C_pad, WH), lambda b: (b, 0, 0)),
        compiler_params=pltpu.CompilerParams(
            dimension_semantics=("parallel",),
            vmem_limit_bytes=_vmem_limit_bytes(C_in, C_pad, N_pad, K, WH)),
    )(x_flat, w_off, b_off, gam_off, bet_off, gmat_off,
      w_dsc, b_dsc, gam, bet, gmat)

    return out[:, :C_out, :].reshape(B, C_out, W, H)


# ----------------------------------- main ----------------------------------- #

if __name__ == "__main__":
    B, C_in, C_out, W, H, K = 2, 4, 8, 16, 16, 9
    key = jax.random.PRNGKey(0)
    ks = jax.random.split(key, 11)
    params = dict(
        offset_w=0.1 * jax.random.normal(ks[0], (2 * K, C_in, 3, 3), jnp.float32),
        offset_b=0.05 * jax.random.normal(ks[1], (2 * K,), jnp.float32),
        gn_off_gamma=1.0 + 0.05 * jax.random.normal(ks[2], (2 * K,), jnp.float32),
        gn_off_beta=0.05 * jax.random.normal(ks[3], (2 * K,), jnp.float32),
        dsc_x_w=0.1 * jax.random.normal(ks[4], (C_out, C_in, K, 1), jnp.float32),
        dsc_x_b=0.05 * jax.random.normal(ks[5], (C_out,), jnp.float32),
        dsc_y_w=0.1 * jax.random.normal(ks[6], (C_out, C_in, 1, K), jnp.float32),
        dsc_y_b=0.05 * jax.random.normal(ks[7], (C_out,), jnp.float32),
        gn_gamma=1.0 + 0.05 * jax.random.normal(ks[8], (C_out,), jnp.float32),
        gn_beta=0.05 * jax.random.normal(ks[9], (C_out,), jnp.float32),
    )
    x = jax.random.normal(ks[10], (B, C_in, W, H), jnp.float32)

    fwd = jax.jit(dsconv_pro_forward, static_argnums=(2, 3, 4))
    out0 = jax.block_until_ready(fwd(x, params, K, 1.0, 0))
    out1 = jax.block_until_ready(fwd(x, params, K, 1.0, 1))

    assert out0.shape == (B, C_out, W, H) and out1.shape == (B, C_out, W, H)
    assert bool(jnp.all(jnp.isfinite(out0))) and bool(jnp.all(jnp.isfinite(out1)))
    assert bool(jnp.all(out0 >= 0.0)) and bool(jnp.all(out1 >= 0.0))  # ReLU output
    print("KERNEL_OK")
</pallas_src>

<mosaic_0001>
module attributes {stable_mosaic.version = 11 : i64} {
  func.func @_dsconv_kernel(%arg0: i32, %arg1: memref<1x4x256xbf16, #tpu.memory_space<vmem>>, %arg2: memref<24x36xbf16, #tpu.memory_space<vmem>>, %arg3: memref<24x1xf32, #tpu.memory_space<vmem>>, %arg4: memref<24x1xf32, #tpu.memory_space<vmem>>, %arg5: memref<24x1xf32, #tpu.memory_space<vmem>>, %arg6: memref<24x24xf32, #tpu.memory_space<vmem>>, %arg7: memref<8x36xbf16, #tpu.memory_space<vmem>>, %arg8: memref<8x1xf32, #tpu.memory_space<vmem>>, %arg9: memref<8x1xf32, #tpu.memory_space<vmem>>, %arg10: memref<8x1xf32, #tpu.memory_space<vmem>>, %arg11: memref<8x8xf32, #tpu.memory_space<vmem>>, %arg12: memref<1x8x256xf32, #tpu.memory_space<vmem>>) attributes {dimension_semantics = [#tpu.dimension_semantics<parallel>], iteration_bounds = array<i64: 2>, scalar_prefetch = 0 : i64, scratch_operands = 0 : i64, tpu.core_type = #tpu.core_type<tc>, window_params = [{transform_indices = @transform_0, window_bounds = array<i64: 1, 4, 256>}, {pipeline_mode = #tpu.pipeline_mode<synchronous>, transform_indices = @transform_1, window_bounds = array<i64: 24, 36>}, {pipeline_mode = #tpu.pipeline_mode<synchronous>, transform_indices = @transform_2, window_bounds = array<i64: 24, 1>}, {pipeline_mode = #tpu.pipeline_mode<synchronous>, transform_indices = @transform_3, window_bounds = array<i64: 24, 1>}, {pipeline_mode = #tpu.pipeline_mode<synchronous>, transform_indices = @transform_4, window_bounds = array<i64: 24, 1>}, {pipeline_mode = #tpu.pipeline_mode<synchronous>, transform_indices = @transform_5, window_bounds = array<i64: 24, 24>}, {pipeline_mode = #tpu.pipeline_mode<synchronous>, transform_indices = @transform_6, window_bounds = array<i64: 8, 36>}, {pipeline_mode = #tpu.pipeline_mode<synchronous>, transform_indices = @transform_7, window_bounds = array<i64: 8, 1>}, {pipeline_mode = #tpu.pipeline_mode<synchronous>, transform_indices = @transform_8, window_bounds = array<i64: 8, 1>}, {pipeline_mode = #tpu.pipeline_mode<synchronous>, transform_indices = @transform_9, window_bounds = array<i64: 8, 1>}, {pipeline_mode = #tpu.pipeline_mode<synchronous>, transform_indices = @transform_10, window_bounds = array<i64: 8, 8>}, {transform_indices = @transform_11, window_bounds = array<i64: 1, 8, 256>}]} {
    %c0 = arith.constant 0 : index
    %c0_0 = arith.constant 0 : index
    %c0_1 = arith.constant 0 : index
    %0 = vector.load %arg1[%c0, %c0_0, %c0_1] : memref<1x4x256xbf16, #tpu.memory_space<vmem>>, vector<1x4x256xbf16>
    %1 = vector.shape_cast %0 : vector<1x4x256xbf16> to vector<4x256xbf16>
    %2 = arith.extf %1 : vector<4x256xbf16> to vector<4x256xf32>
    %3 = tpu.iota {dimensions = array<i32: 1>} : vector<1x256xi32>
    %4 = arith.sitofp %3 : vector<1x256xi32> to vector<1x256xf32>
    %cst = arith.constant 5.000000e-01 : f32
    %5 = vector.broadcast %cst : f32 to vector<1x256xf32>
    %6 = arith.addf %4, %5 : vector<1x256xf32>
    %cst_2 = arith.constant 6.250000e-02 : f32
    %7 = vector.broadcast %cst_2 : f32 to vector<1x256xf32>
    %8 = arith.mulf %6, %7 : vector<1x256xf32>
    %9 = math.floor %8 : vector<1x256xf32>
    %cst_3 = arith.constant 1.600000e+01 : f32
    %10 = vector.broadcast %cst_3 : f32 to vector<1x256xf32>
    %11 = arith.mulf %9, %10 : vector<1x256xf32>
    %12 = arith.subf %4, %11 : vector<1x256xf32>
    %c17_i32 = arith.constant 17 : i32
    %13 = tpu.dynamic_rotate %2 by %c17_i32 dim 1 : vector<4x256xf32>, i32 -> vector<4x256xf32>
    %cst_4 = arith.constant 1.000000e+00 : f32
    %14 = vector.broadcast %cst_4 : f32 to vector<1x256xf32>
    %15 = arith.cmpf oge, %12, %14 : vector<1x256xf32>
    %cst_5 = arith.constant 1.000000e+00 : f32
    %16 = vector.broadcast %cst_5 : f32 to vector<1x256xf32>
    %17 = arith.cmpf oge, %9, %16 : vector<1x256xf32>
    %18 = arith.andi %15, %17 : vector<1x256xi1>
    %cst_6 = arith.constant 0.000000e+00 : f32
    %19 = vector.broadcast %cst_6 : f32 to vector<4x256xf32>
    %20 = vector.shape_cast %18 : vector<1x256xi1> to vector<1x256xi1>
    %21 = vector.broadcast %20 : vector<1x256xi1> to vector<4x256xi1>
    %22 = arith.select %21, %13, %19 : vector<4x256xi1>, vector<4x256xf32>
    %c16_i32 = arith.constant 16 : i32
    %23 = tpu.dynamic_rotate %2 by %c16_i32 dim 1 : vector<4x256xf32>, i32 -> vector<4x256xf32>
    %cst_7 = arith.constant 1.000000e+00 : f32
    %24 = vector.broadcast %cst_7 : f32 to vector<1x256xf32>
    %25 = arith.cmpf oge, %9, %24 : vector<1x256xf32>
    %cst_8 = arith.constant 0.000000e+00 : f32
    %26 = vector.broadcast %cst_8 : f32 to vector<4x256xf32>
    %27 = vector.shape_cast %25 : vector<1x256xi1> to vector<1x256xi1>
    %28 = vector.broadcast %27 : vector<1x256xi1> to vector<4x256xi1>
    %29 = arith.select %28, %23, %26 : vector<4x256xi1>, vector<4x256xf32>
    %c15_i32 = arith.constant 15 : i32
    %30 = tpu.dynamic_rotate %2 by %c15_i32 dim 1 : vector<4x256xf32>, i32 -> vector<4x256xf32>
    %cst_9 = arith.constant 1.400000e+01 : f32
    %31 = vector.broadcast %cst_9 : f32 to vector<1x256xf32>
    %32 = arith.cmpf ole, %12, %31 : vector<1x256xf32>
    %cst_10 = arith.constant 1.000000e+00 : f32
    %33 = vector.broadcast %cst_10 : f32 to vector<1x256xf32>
    %34 = arith.cmpf oge, %9, %33 : vector<1x256xf32>
    %35 = arith.andi %32, %34 : vector<1x256xi1>
    %cst_11 = arith.constant 0.000000e+00 : f32
    %36 = vector.broadcast %cst_11 : f32 to vector<4x256xf32>
    %37 = vector.shape_cast %35 : vector<1x256xi1> to vector<1x256xi1>
    %38 = vector.broadcast %37 : vector<1x256xi1> to vector<4x256xi1>
    %39 = arith.select %38, %30, %36 : vector<4x256xi1>, vector<4x256xf32>
    %c1_i32 = arith.constant 1 : i32
    %40 = tpu.dynamic_rotate %2 by %c1_i32 dim 1 : vector<4x256xf32>, i32 -> vector<4x256xf32>
    %cst_12 = arith.constant 1.000000e+00 : f32
    %41 = vector.broadcast %cst_12 : f32 to vector<1x256xf32>
    %42 = arith.cmpf oge, %12, %41 : vector<1x256xf32>
    %cst_13 = arith.constant 0.000000e+00 : f32
    %43 = vector.broadcast %cst_13 : f32 to vector<4x256xf32>
    %44 = vector.shape_cast %42 : vector<1x256xi1> to vector<1x256xi1>
    %45 = vector.broadcast %44 : vector<1x256xi1> to vector<4x256xi1>
    %46 = arith.select %45, %40, %43 : vector<4x256xi1>, vector<4x256xf32>
    %c255_i32 = arith.constant 255 : i32
    %47 = tpu.dynamic_rotate %2 by %c255_i32 dim 1 : vector<4x256xf32>, i32 -> vector<4x256xf32>
    %cst_14 = arith.constant 1.400000e+01 : f32
    %48 = vector.broadcast %cst_14 : f32 to vector<1x256xf32>
    %49 = arith.cmpf ole, %12, %48 : vector<1x256xf32>
    %cst_15 = arith.constant 0.000000e+00 : f32
    %50 = vector.broadcast %cst_15 : f32 to vector<4x256xf32>
    %51 = vector.shape_cast %49 : vector<1x256xi1> to vector<1x256xi1>
    %52 = vector.broadcast %51 : vector<1x256xi1> to vector<4x256xi1>
    %53 = arith.select %52, %47, %50 : vector<4x256xi1>, vector<4x256xf32>
    %c241_i32 = arith.constant 241 : i32
    %54 = tpu.dynamic_rotate %2 by %c241_i32 dim 1 : vector<4x256xf32>, i32 -> vector<4x256xf32>
    %cst_16 = arith.constant 1.000000e+00 : f32
    %55 = vector.broadcast %cst_16 : f32 to vector<1x256xf32>
    %56 = arith.cmpf oge, %12, %55 : vector<1x256xf32>
    %cst_17 = arith.constant 1.400000e+01 : f32
    %57 = vector.broadcast %cst_17 : f32 to vector<1x256xf32>
    %58 = arith.cmpf ole, %9, %57 : vector<1x256xf32>
    %59 = arith.andi %56, %58 : vector<1x256xi1>
    %cst_18 = arith.constant 0.000000e+00 : f32
    %60 = vector.broadcast %cst_18 : f32 to vector<4x256xf32>
    %61 = vector.shape_cast %59 : vector<1x256xi1> to vector<1x256xi1>
    %62 = vector.broadcast %61 : vector<1x256xi1> to vector<4x256xi1>
    %63 = arith.select %62, %54, %60 : vector<4x256xi1>, vector<4x256xf32>
    %c240_i32 = arith.constant 240 : i32
    %64 = tpu.dynamic_rotate %2 by %c240_i32 dim 1 : vector<4x256xf32>, i32 -> vector<4x256xf32>
    %cst_19 = arith.constant 1.400000e+01 : f32
    %65 = vector.broadcast %cst_19 : f32 to vector<1x256xf32>
    %66 = arith.cmpf ole, %9, %65 : vector<1x256xf32>
    %cst_20 = arith.constant 0.000000e+00 : f32
    %67 = vector.broadcast %cst_20 : f32 to vector<4x256xf32>
    %68 = vector.shape_cast %66 : vector<1x256xi1> to vector<1x256xi1>
    %69 = vector.broadcast %68 : vector<1x256xi1> to vector<4x256xi1>
    %70 = arith.select %69, %64, %67 : vector<4x256xi1>, vector<4x256xf32>
    %c239_i32 = arith.constant 239 : i32
    %71 = tpu.dynamic_rotate %2 by %c239_i32 dim 1 : vector<4x256xf32>, i32 -> vector<4x256xf32>
    %cst_21 = arith.constant 1.400000e+01 : f32
    %72 = vector.broadcast %cst_21 : f32 to vector<1x256xf32>
    %73 = arith.cmpf ole, %12, %72 : vector<1x256xf32>
    %cst_22 = arith.constant 1.400000e+01 : f32
    %74 = vector.broadcast %cst_22 : f32 to vector<1x256xf32>
    %75 = arith.cmpf ole, %9, %74 : vector<1x256xf32>
    %76 = arith.andi %73, %75 : vector<1x256xi1>
    %cst_23 = arith.constant 0.000000e+00 : f32
    %77 = vector.broadcast %cst_23 : f32 to vector<4x256xf32>
    %78 = vector.shape_cast %76 : vector<1x256xi1> to vector<1x256xi1>
    %79 = vector.broadcast %78 : vector<1x256xi1> to vector<4x256xi1>
    %80 = arith.select %79, %71, %77 : vector<4x256xi1>, vector<4x256xf32>
    %81 = tpu.concatenate %22, %29, %39, %46, %2, %53, %63, %70, %80 in 0 : vector<4x256xf32>, vector<4x256xf32>, vector<4x256xf32>, vector<4x256xf32>, vector<4x256xf32>, vector<4x256xf32>, vector<4x256xf32>, vector<4x256xf32>, vector<4x256xf32> -> vector<36x256xf32>
    %82 = arith.truncf %81 : vector<36x256xf32> to vector<36x256xbf16>
    %c0_24 = arith.constant 0 : index
    %c0_25 = arith.constant 0 : index
    %83 = vector.load %arg2[%c0_24, %c0_25] : memref<24x36xbf16, #tpu.memory_space<vmem>>, vector<24x36xbf16>
    %cst_26 = arith.constant dense<0.000000e+00> : vector<24x256xf32>
    %84 = tpu.matmul %83, %82, %cst_26 {dimension_numbers = #tpu.dot_dimension_numbers<[1], [0], [0], [1], [0, 0, 1, 1], [], []>} : vector<24x36xbf16>, vector<36x256xbf16>, vector<24x256xf32> -> vector<24x256xf32>
    %c0_27 = arith.constant 0 : index
    %c0_28 = arith.constant 0 : index
    %85 = vector.load %arg3[%c0_27, %c0_28] : memref<24x1xf32, #tpu.memory_space<vmem>>, vector<24x1xf32>
    %86 = vector.broadcast %85 : vector<24x1xf32> to vector<24x256xf32>
    %87 = arith.addf %84, %86 : vector<24x256xf32>
    %cst_29 = arith.constant dense<0.000000e+00> : vector<24xf32>
    %88 = vector.multi_reduction <add>, %87, %cst_29 [1] : vector<24x256xf32> to vector<24xf32>
    %89 = vector.shape_cast %88 : vector<24xf32> to vector<24x1xf32>
    %c0_30 = arith.constant 0 : index
    %c0_31 = arith.constant 0 : index
    %90 = vector.load %arg6[%c0_30, %c0_31] : memref<24x24xf32, #tpu.memory_space<vmem>>, vector<24x24xf32>
    %cst_32 = arith.constant dense<0.000000e+00> : vector<24x1xf32>
    %91 = tpu.matmul %90, %89, %cst_32 {dimension_numbers = #tpu.dot_dimension_numbers<[1], [0], [0], [1], [0, 0, 1, 1], [], []>} : vector<24x24xf32>, vector<24x1xf32>, vector<24x1xf32> -> vector<24x1xf32>
    %92 = vector.broadcast %91 : vector<24x1xf32> to vector<24x256xf32>
    %93 = arith.subf %87, %92 : vector<24x256xf32>
    %94 = arith.mulf %93, %93 : vector<24x256xf32>
    %cst_33 = arith.constant dense<0.000000e+00> : vector<24xf32>
    %95 = vector.multi_reduction <add>, %94, %cst_33 [1] : vector<24x256xf32> to vector<24xf32>
    %96 = vector.shape_cast %95 : vector<24xf32> to vector<24x1xf32>
    %c0_34 = arith.constant 0 : index
    %c0_35 = arith.constant 0 : index
    %97 = vector.load %arg6[%c0_34, %c0_35] : memref<24x24xf32, #tpu.memory_space<vmem>>, vector<24x24xf32>
    %cst_36 = arith.constant dense<0.000000e+00> : vector<24x1xf32>
    %98 = tpu.matmul %97, %96, %cst_36 {dimension_numbers = #tpu.dot_dimension_numbers<[1], [0], [0], [1], [0, 0, 1, 1], [], []>} : vector<24x24xf32>, vector<24x1xf32>, vector<24x1xf32> -> vector<24x1xf32>
    %cst_37 = arith.constant 9.99999974E-6 : f32
    %99 = vector.broadcast %cst_37 : f32 to vector<24x1xf32>
    %100 = arith.addf %98, %99 : vector<24x1xf32>
    %101 = math.rsqrt %100 : vector<24x1xf32>
    %102 = vector.broadcast %101 : vector<24x1xf32> to vector<24x256xf32>
    %103 = arith.mulf %93, %102 : vector<24x256xf32>
    %c0_38 = arith.constant 0 : index
    %c0_39 = arith.constant 0 : index
    %104 = vector.load %arg4[%c0_38, %c0_39] : memref<24x1xf32, #tpu.memory_space<vmem>>, vector<24x1xf32>
    %105 = vector.broadcast %104 : vector<24x1xf32> to vector<24x256xf32>
    %106 = arith.mulf %103, %105 : vector<24x256xf32>
    %c0_40 = arith.constant 0 : index
    %c0_41 = arith.constant 0 : index
    %107 = vector.load %arg5[%c0_40, %c0_41] : memref<24x1xf32, #tpu.memory_space<vmem>>, vector<24x1xf32>
    %108 = vector.broadcast %107 : vector<24x1xf32> to vector<24x256xf32>
    %109 = arith.addf %106, %108 : vector<24x256xf32>
    %110 = math.tanh %109 : vector<24x256xf32>
    %cst_42 = arith.constant 0.000000e+00 : f32
    %111 = vector.broadcast %cst_42 : f32 to vector<1x256xf32>
    %112 = vector.extract_strided_slice %110 {offsets = [5, 0], sizes = [1, 256], strides = [1, 1]} : vector<24x256xf32> to vector<1x256xf32>
    %113 = arith.addf %111, %112 : vector<1x256xf32>
    %114 = vector.extract_strided_slice %110 {offsets = [3, 0], sizes = [1, 256], strides = [1, 1]} : vector<24x256xf32> to vector<1x256xf32>
    %115 = arith.addf %111, %114 : vector<1x256xf32>
    %116 = vector.extract_strided_slice %110 {offsets = [6, 0], sizes = [1, 256], strides = [1, 1]} : vector<24x256xf32> to vector<1x256xf32>
    %117 = arith.addf %113, %116 : vector<1x256xf32>
    %118 = vector.extract_strided_slice %110 {offsets = [2, 0], sizes = [1, 256], strides = [1, 1]} : vector<24x256xf32> to vector<1x256xf32>
    %119 = arith.addf %115, %118 : vector<1x256xf32>
    %120 = vector.extract_strided_slice %110 {offsets = [7, 0], sizes = [1, 256], strides = [1, 1]} : vector<24x256xf32> to vector<1x256xf32>
    %121 = arith.addf %117, %120 : vector<1x256xf32>
    %122 = vector.extract_strided_slice %110 {offsets = [1, 0], sizes = [1, 256], strides = [1, 1]} : vector<24x256xf32> to vector<1x256xf32>
    %123 = arith.addf %119, %122 : vector<1x256xf32>
    %124 = vector.extract_strided_slice %110 {offsets = [8, 0], sizes = [1, 256], strides = [1, 1]} : vector<24x256xf32> to vector<1x256xf32>
    %125 = arith.addf %121, %124 : vector<1x256xf32>
    %126 = vector.extract_strided_slice %110 {offsets = [0, 0], sizes = [1, 256], strides = [1, 1]} : vector<24x256xf32> to vector<1x256xf32>
    %127 = arith.addf %123, %126 : vector<1x256xf32>
    %cst_43 = arith.constant 1.000000e+00 : f32
    %128 = vector.broadcast %cst_43 : f32 to vector<1x256xf32>
    %129 = arith.addf %12, %128 : vector<1x256xf32>
    %cst_44 = arith.constant 1.500000e+01 : f32
    %130 = vector.broadcast %cst_44 : f32 to vector<1x256xf32>
    %131 = arith.cmpf ole, %129, %130 : vector<1x256xf32>
    %c255_i32_45 = arith.constant 255 : i32
    %132 = tpu.dynamic_rotate %2 by %c255_i32_45 dim 1 : vector<4x256xf32>, i32 -> vector<4x256xf32>
    %133 = vector.shape_cast %131 : vector<1x256xi1> to vector<1x256xi1>
    %134 = vector.broadcast %133 : vector<1x256xi1> to vector<4x256xi1>
    %135 = arith.select %134, %132, %2 : vector<4x256xi1>, vector<4x256xf32>
    %cst_46 = arith.constant 1.000000e+00 : f32
    %136 = vector.broadcast %cst_46 : f32 to vector<1x256xf32>
    %137 = arith.subf %12, %136 : vector<1x256xf32>
    %cst_47 = arith.constant 0.000000e+00 : f32
    %138 = vector.broadcast %cst_47 : f32 to vector<1x256xf32>
    %139 = arith.cmpf oge, %137, %138 : vector<1x256xf32>
    %c1_i32_48 = arith.constant 1 : i32
    %140 = tpu.dynamic_rotate %2 by %c1_i32_48 dim 1 : vector<4x256xf32>, i32 -> vector<4x256xf32>
    %141 = vector.shape_cast %139 : vector<1x256xi1> to vector<1x256xi1>
    %142 = vector.broadcast %141 : vector<1x256xi1> to vector<4x256xi1>
    %143 = arith.select %142, %140, %2 : vector<4x256xi1>, vector<4x256xf32>
    %cst_49 = arith.constant 2.000000e+00 : f32
    %144 = vector.broadcast %cst_49 : f32 to vector<1x256xf32>
    %145 = arith.addf %12, %144 : vector<1x256xf32>
    %cst_50 = arith.constant 1.500000e+01 : f32
    %146 = vector.broadcast %cst_50 : f32 to vector<1x256xf32>
    %147 = arith.cmpf ole, %145, %146 : vector<1x256xf32>
    %c255_i32_51 = arith.constant 255 : i32
    %148 = tpu.dynamic_rotate %135 by %c255_i32_51 dim 1 : vector<4x256xf32>, i32 -> vector<4x256xf32>
    %149 = vector.shape_cast %147 : vector<1x256xi1> to vector<1x256xi1>
    %150 = vector.broadcast %149 : vector<1x256xi1> to vector<4x256xi1>
    %151 = arith.select %150, %148, %135 : vector<4x256xi1>, vector<4x256xf32>
    %cst_52 = arith.constant 2.000000e+00 : f32
    %152 = vector.broadcast %cst_52 : f32 to vector<1x256xf32>
    %153 = arith.subf %12, %152 : vector<1x256xf32>
    %cst_53 = arith.constant 0.000000e+00 : f32
    %154 = vector.broadcast %cst_53 : f32 to vector<1x256xf32>
    %155 = arith.cmpf oge, %153, %154 : vector<1x256xf32>
    %c1_i32_54 = arith.constant 1 : i32
    %156 = tpu.dynamic_rotate %143 by %c1_i32_54 dim 1 : vector<4x256xf32>, i32 -> vector<4x256xf32>
    %157 = vector.shape_cast %155 : vector<1x256xi1> to vector<1x256xi1>
    %158 = vector.broadcast %157 : vector<1x256xi1> to vector<4x256xi1>
    %159 = arith.select %158, %156, %143 : vector<4x256xi1>, vector<4x256xf32>
    %cst_55 = arith.constant 3.000000e+00 : f32
    %160 = vector.broadcast %cst_55 : f32 to vector<1x256xf32>
    %161 = arith.addf %12, %160 : vector<1x256xf32>
    %cst_56 = arith.constant 1.500000e+01 : f32
    %162 = vector.broadcast %cst_56 : f32 to vector<1x256xf32>
    %163 = arith.cmpf ole, %161, %162 : vector<1x256xf32>
    %c255_i32_57 = arith.constant 255 : i32
    %164 = tpu.dynamic_rotate %151 by %c255_i32_57 dim 1 : vector<4x256xf32>, i32 -> vector<4x256xf32>
    %165 = vector.shape_cast %163 : vector<1x256xi1> to vector<1x256xi1>
    %166 = vector.broadcast %165 : vector<1x256xi1> to vector<4x256xi1>
    %167 = arith.select %166, %164, %151 : vector<4x256xi1>, vector<4x256xf32>
    %cst_58 = arith.constant 3.000000e+00 : f32
    %168 = vector.broadcast %cst_58 : f32 to vector<1x256xf32>
    %169 = arith.subf %12, %168 : vector<1x256xf32>
    %cst_59 = arith.constant 0.000000e+00 : f32
    %170 = vector.broadcast %cst_59 : f32 to vector<1x256xf32>
    %171 = arith.cmpf oge, %169, %170 : vector<1x256xf32>
    %c1_i32_60 = arith.constant 1 : i32
    %172 = tpu.dynamic_rotate %159 by %c1_i32_60 dim 1 : vector<4x256xf32>, i32 -> vector<4x256xf32>
    %173 = vector.shape_cast %171 : vector<1x256xi1> to vector<1x256xi1>
    %174 = vector.broadcast %173 : vector<1x256xi1> to vector<4x256xi1>
    %175 = arith.select %174, %172, %159 : vector<4x256xi1>, vector<4x256xf32>
    %cst_61 = arith.constant 4.000000e+00 : f32
    %176 = vector.broadcast %cst_61 : f32 to vector<1x256xf32>
    %177 = arith.addf %12, %176 : vector<1x256xf32>
    %cst_62 = arith.constant 1.500000e+01 : f32
    %178 = vector.broadcast %cst_62 : f32 to vector<1x256xf32>
    %179 = arith.cmpf ole, %177, %178 : vector<1x256xf32>
    %c255_i32_63 = arith.constant 255 : i32
    %180 = tpu.dynamic_rotate %167 by %c255_i32_63 dim 1 : vector<4x256xf32>, i32 -> vector<4x256xf32>
    %181 = vector.shape_cast %179 : vector<1x256xi1> to vector<1x256xi1>
    %182 = vector.broadcast %181 : vector<1x256xi1> to vector<4x256xi1>
    %183 = arith.select %182, %180, %167 : vector<4x256xi1>, vector<4x256xf32>
    %cst_64 = arith.constant 4.000000e+00 : f32
    %184 = vector.broadcast %cst_64 : f32 to vector<1x256xf32>
    %185 = arith.subf %12, %184 : vector<1x256xf32>
    %cst_65 = arith.constant 0.000000e+00 : f32
    %186 = vector.broadcast %cst_65 : f32 to vector<1x256xf32>
    %187 = arith.cmpf oge, %185, %186 : vector<1x256xf32>
    %c1_i32_66 = arith.constant 1 : i32
    %188 = tpu.dynamic_rotate %175 by %c1_i32_66 dim 1 : vector<4x256xf32>, i32 -> vector<4x256xf32>
    %189 = vector.shape_cast %187 : vector<1x256xi1> to vector<1x256xi1>
    %190 = vector.broadcast %189 : vector<1x256xi1> to vector<4x256xi1>
    %191 = arith.select %190, %188, %175 : vector<4x256xi1>, vector<4x256xf32>
    %cst_67 = arith.constant 1.000000e+00 : f32
    %192 = vector.broadcast %cst_67 : f32 to vector<1x256xf32>
    %193 = arith.mulf %192, %127 : vector<1x256xf32>
    %194 = arith.addf %9, %193 : vector<1x256xf32>
    %cst_68 = arith.constant 0.000000e+00 : f32
    %cst_69 = arith.constant 1.500000e+01 : f32
    %195 = vector.broadcast %cst_68 : f32 to vector<1x256xf32>
    %196 = arith.maximumf %195, %194 : vector<1x256xf32>
    %197 = vector.broadcast %cst_69 : f32 to vector<1x256xf32>
    %198 = arith.minimumf %197, %196 : vector<1x256xf32>
    %199 = math.floor %198 : vector<1x256xf32>
    %200 = arith.subf %198, %199 : vector<1x256xf32>
    %cst_70 = arith.constant 1.000000e+00 : f32
    %201 = vector.broadcast %cst_70 : f32 to vector<1x256xf32>
    %202 = arith.addf %199, %201 : vector<1x256xf32>
    %cst_71 = arith.constant 1.500000e+01 : f32
    %203 = vector.broadcast %cst_71 : f32 to vector<1x256xf32>
    %204 = arith.minimumf %202, %203 : vector<1x256xf32>
    %cst_72 = arith.constant 0.000000e+00 : f32
    %205 = vector.broadcast %cst_72 : f32 to vector<4x256xf32>
    %cst_73 = arith.constant -5.000000e+00 : f32
    %206 = vector.broadcast %cst_73 : f32 to vector<1x256xf32>
    %207 = arith.addf %9, %206 : vector<1x256xf32>
    %208 = arith.cmpf oeq, %199, %207 : vector<1x256xf32>
    %cst_74 = arith.constant 1.000000e+00 : f32
    %209 = vector.broadcast %cst_74 : f32 to vector<1x256xf32>
    %210 = arith.subf %209, %200 : vector<1x256xf32>
    %cst_75 = arith.constant 0.000000e+00 : f32
    %211 = vector.broadcast %cst_75 : f32 to vector<1x256xf32>
    %212 = arith.select %208, %210, %211 : vector<1x256xi1>, vector<1x256xf32>
    %213 = arith.cmpf oeq, %204, %207 : vector<1x256xf32>
    %cst_76 = arith.constant 0.000000e+00 : f32
    %214 = vector.broadcast %cst_76 : f32 to vector<1x256xf32>
    %215 = arith.select %213, %200, %214 : vector<1x256xi1>, vector<1x256xf32>
    %216 = arith.addf %212, %215 : vector<1x256xf32>
    %c80_i32 = arith.constant 80 : i32
    %217 = tpu.dynamic_rotate %191 by %c80_i32 dim 1 : vector<4x256xf32>, i32 -> vector<4x256xf32>
    %218 = vector.broadcast %216 : vector<1x256xf32> to vector<4x256xf32>
    %219 = arith.mulf %218, %217 : vector<4x256xf32>
    %220 = arith.addf %205, %219 : vector<4x256xf32>
    %cst_77 = arith.constant -4.000000e+00 : f32
    %221 = vector.broadcast %cst_77 : f32 to vector<1x256xf32>
    %222 = arith.addf %9, %221 : vector<1x256xf32>
    %223 = arith.cmpf oeq, %199, %222 : vector<1x256xf32>
    %cst_78 = arith.constant 1.000000e+00 : f32
    %224 = vector.broadcast %cst_78 : f32 to vector<1x256xf32>
    %225 = arith.subf %224, %200 : vector<1x256xf32>
    %cst_79 = arith.constant 0.000000e+00 : f32
    %226 = vector.broadcast %cst_79 : f32 to vector<1x256xf32>
    %227 = arith.select %223, %225, %226 : vector<1x256xi1>, vector<1x256xf32>
    %228 = arith.cmpf oeq, %204, %222 : vector<1x256xf32>
    %cst_80 = arith.constant 0.000000e+00 : f32
    %229 = vector.broadcast %cst_80 : f32 to vector<1x256xf32>
    %230 = arith.select %228, %200, %229 : vector<1x256xi1>, vector<1x256xf32>
    %231 = arith.addf %227, %230 : vector<1x256xf32>
    %c64_i32 = arith.constant 64 : i32
    %232 = tpu.dynamic_rotate %191 by %c64_i32 dim 1 : vector<4x256xf32>, i32 -> vector<4x256xf32>
    %233 = vector.broadcast %231 : vector<1x256xf32> to vector<4x256xf32>
    %234 = arith.mulf %233, %232 : vector<4x256xf32>
    %235 = arith.addf %220, %234 : vector<4x256xf32>
    %cst_81 = arith.constant -3.000000e+00 : f32
    %236 = vector.broadcast %cst_81 : f32 to vector<1x256xf32>
    %237 = arith.addf %9, %236 : vector<1x256xf32>
    %238 = arith.cmpf oeq, %199, %237 : vector<1x256xf32>
    %cst_82 = arith.constant 1.000000e+00 : f32
    %239 = vector.broadcast %cst_82 : f32 to vector<1x256xf32>
    %240 = arith.subf %239, %200 : vector<1x256xf32>
    %cst_83 = arith.constant 0.000000e+00 : f32
    %241 = vector.broadcast %cst_83 : f32 to vector<1x256xf32>
    %242 = arith.select %238, %240, %241 : vector<1x256xi1>, vector<1x256xf32>
    %243 = arith.cmpf oeq, %204, %237 : vector<1x256xf32>
    %cst_84 = arith.constant 0.000000e+00 : f32
    %244 = vector.broadcast %cst_84 : f32 to vector<1x256xf32>
    %245 = arith.select %243, %200, %244 : vector<1x256xi1>, vector<1x256xf32>
    %246 = arith.addf %242, %245 : vector<1x256xf32>
    %c48_i32 = arith.constant 48 : i32
    %247 = tpu.dynamic_rotate %191 by %c48_i32 dim 1 : vector<4x256xf32>, i32 -> vector<4x256xf32>
    %248 = vector.broadcast %246 : vector<1x256xf32> to vector<4x256xf32>
    %249 = arith.mulf %248, %247 : vector<4x256xf32>
    %250 = arith.addf %235, %249 : vector<4x256xf32>
    %cst_85 = arith.constant -2.000000e+00 : f32
    %251 = vector.broadcast %cst_85 : f32 to vector<1x256xf32>
    %252 = arith.addf %9, %251 : vector<1x256xf32>
    %253 = arith.cmpf oeq, %199, %252 : vector<1x256xf32>
    %cst_86 = arith.constant 1.000000e+00 : f32
    %254 = vector.broadcast %cst_86 : f32 to vector<1x256xf32>
    %255 = arith.subf %254, %200 : vector<1x256xf32>
    %cst_87 = arith.constant 0.000000e+00 : f32
    %256 = vector.broadcast %cst_87 : f32 to vector<1x256xf32>
    %257 = arith.select %253, %255, %256 : vector<1x256xi1>, vector<1x256xf32>
    %258 = arith.cmpf oeq, %204, %252 : vector<1x256xf32>
    %cst_88 = arith.constant 0.000000e+00 : f32
    %259 = vector.broadcast %cst_88 : f32 to vector<1x256xf32>
    %260 = arith.select %258, %200, %259 : vector<1x256xi1>, vector<1x256xf32>
    %261 = arith.addf %257, %260 : vector<1x256xf32>
    %c32_i32 = arith.constant 32 : i32
    %262 = tpu.dynamic_rotate %191 by %c32_i32 dim 1 : vector<4x256xf32>, i32 -> vector<4x256xf32>
    %263 = vector.broadcast %261 : vector<1x256xf32> to vector<4x256xf32>
    %264 = arith.mulf %263, %262 : vector<4x256xf32>
    %265 = arith.addf %250, %264 : vector<4x256xf32>
    %cst_89 = arith.constant -1.000000e+00 : f32
    %266 = vector.broadcast %cst_89 : f32 to vector<1x256xf32>
    %267 = arith.addf %9, %266 : vector<1x256xf32>
    %268 = arith.cmpf oeq, %199, %267 : vector<1x256xf32>
    %cst_90 = arith.constant 1.000000e+00 : f32
    %269 = vector.broadcast %cst_90 : f32 to vector<1x256xf32>
    %270 = arith.subf %269, %200 : vector<1x256xf32>
    %cst_91 = arith.constant 0.000000e+00 : f32
    %271 = vector.broadcast %cst_91 : f32 to vector<1x256xf32>
    %272 = arith.select %268, %270, %271 : vector<1x256xi1>, vector<1x256xf32>
    %273 = arith.cmpf oeq, %204, %267 : vector<1x256xf32>
    %cst_92 = arith.constant 0.000000e+00 : f32
    %274 = vector.broadcast %cst_92 : f32 to vector<1x256xf32>
    %275 = arith.select %273, %200, %274 : vector<1x256xi1>, vector<1x256xf32>
    %276 = arith.addf %272, %275 : vector<1x256xf32>
    %c16_i32_93 = arith.constant 16 : i32
    %277 = tpu.dynamic_rotate %191 by %c16_i32_93 dim 1 : vector<4x256xf32>, i32 -> vector<4x256xf32>
    %278 = vector.broadcast %276 : vector<1x256xf32> to vector<4x256xf32>
    %279 = arith.mulf %278, %277 : vector<4x256xf32>
    %280 = arith.addf %265, %279 : vector<4x256xf32>
    %cst_94 = arith.constant 0.000000e+00 : f32
    %281 = vector.broadcast %cst_94 : f32 to vector<1x256xf32>
    %282 = arith.addf %9, %281 : vector<1x256xf32>
    %283 = arith.cmpf oeq, %199, %282 : vector<1x256xf32>
    %cst_95 = arith.constant 1.000000e+00 : f32
    %284 = vector.broadcast %cst_95 : f32 to vector<1x256xf32>
    %285 = arith.subf %284, %200 : vector<1x256xf32>
    %cst_96 = arith.constant 0.000000e+00 : f32
    %286 = vector.broadcast %cst_96 : f32 to vector<1x256xf32>
    %287 = arith.select %283, %285, %286 : vector<1x256xi1>, vector<1x256xf32>
    %288 = arith.cmpf oeq, %204, %282 : vector<1x256xf32>
    %cst_97 = arith.constant 0.000000e+00 : f32
    %289 = vector.broadcast %cst_97 : f32 to vector<1x256xf32>
    %290 = arith.select %288, %200, %289 : vector<1x256xi1>, vector<1x256xf32>
    %291 = arith.addf %287, %290 : vector<1x256xf32>
    %292 = vector.broadcast %291 : vector<1x256xf32> to vector<4x256xf32>
    %293 = arith.mulf %292, %191 : vector<4x256xf32>
    %294 = arith.addf %280, %293 : vector<4x256xf32>
    %cst_98 = arith.constant 1.000000e+00 : f32
    %295 = vector.broadcast %cst_98 : f32 to vector<1x256xf32>
    %296 = arith.addf %9, %295 : vector<1x256xf32>
    %297 = arith.cmpf oeq, %199, %296 : vector<1x256xf32>
    %cst_99 = arith.constant 1.000000e+00 : f32
    %298 = vector.broadcast %cst_99 : f32 to vector<1x256xf32>
    %299 = arith.subf %298, %200 : vector<1x256xf32>
    %cst_100 = arith.constant 0.000000e+00 : f32
    %300 = vector.broadcast %cst_100 : f32 to vector<1x256xf32>
    %301 = arith.select %297, %299, %300 : vector<1x256xi1>, vector<1x256xf32>
    %302 = arith.cmpf oeq, %204, %296 : vector<1x256xf32>
    %cst_101 = arith.constant 0.000000e+00 : f32
    %303 = vector.broadcast %cst_101 : f32 to vector<1x256xf32>
    %304 = arith.select %302, %200, %303 : vector<1x256xi1>, vector<1x256xf32>
    %305 = arith.addf %301, %304 : vector<1x256xf32>
    %c240_i32_102 = arith.constant 240 : i32
    %306 = tpu.dynamic_rotate %191 by %c240_i32_102 dim 1 : vector<4x256xf32>, i32 -> vector<4x256xf32>
    %307 = vector.broadcast %305 : vector<1x256xf32> to vector<4x256xf32>
    %308 = arith.mulf %307, %306 : vector<4x256xf32>
    %309 = arith.addf %294, %308 : vector<4x256xf32>
    %cst_103 = arith.constant 2.000000e+00 : f32
    %310 = vector.broadcast %cst_103 : f32 to vector<1x256xf32>
    %311 = arith.addf %9, %310 : vector<1x256xf32>
    %312 = arith.cmpf oeq, %199, %311 : vector<1x256xf32>
    %cst_104 = arith.constant 1.000000e+00 : f32
    %313 = vector.broadcast %cst_104 : f32 to vector<1x256xf32>
    %314 = arith.subf %313, %200 : vector<1x256xf32>
    %cst_105 = arith.constant 0.000000e+00 : f32
    %315 = vector.broadcast %cst_105 : f32 to vector<1x256xf32>
    %316 = arith.select %312, %314, %315 : vector<1x256xi1>, vector<1x256xf32>
    %317 = arith.cmpf oeq, %204, %311 : vector<1x256xf32>
    %cst_106 = arith.constant 0.000000e+00 : f32
    %318 = vector.broadcast %cst_106 : f32 to vector<1x256xf32>
    %319 = arith.select %317, %200, %318 : vector<1x256xi1>, vector<1x256xf32>
    %320 = arith.addf %316, %319 : vector<1x256xf32>
    %c224_i32 = arith.constant 224 : i32
    %321 = tpu.dynamic_rotate %191 by %c224_i32 dim 1 : vector<4x256xf32>, i32 -> vector<4x256xf32>
    %322 = vector.broadcast %320 : vector<1x256xf32> to vector<4x256xf32>
    %323 = arith.mulf %322, %321 : vector<4x256xf32>
    %324 = arith.addf %309, %323 : vector<4x256xf32>
    %cst_107 = arith.constant 3.000000e+00 : f32
    %325 = vector.broadcast %cst_107 : f32 to vector<1x256xf32>
    %326 = arith.addf %9, %325 : vector<1x256xf32>
    %327 = arith.cmpf oeq, %199, %326 : vector<1x256xf32>
    %cst_108 = arith.constant 1.000000e+00 : f32
    %328 = vector.broadcast %cst_108 : f32 to vector<1x256xf32>
    %329 = arith.subf %328, %200 : vector<1x256xf32>
    %cst_109 = arith.constant 0.000000e+00 : f32
    %330 = vector.broadcast %cst_109 : f32 to vector<1x256xf32>
    %331 = arith.select %327, %329, %330 : vector<1x256xi1>, vector<1x256xf32>
    %332 = arith.cmpf oeq, %204, %326 : vector<1x256xf32>
    %cst_110 = arith.constant 0.000000e+00 : f32
    %333 = vector.broadcast %cst_110 : f32 to vector<1x256xf32>
    %334 = arith.select %332, %200, %333 : vector<1x256xi1>, vector<1x256xf32>
    %335 = arith.addf %331, %334 : vector<1x256xf32>
    %c208_i32 = arith.constant 208 : i32
    %336 = tpu.dynamic_rotate %191 by %c208_i32 dim 1 : vector<4x256xf32>, i32 -> vector<4x256xf32>
    %337 = vector.broadcast %335 : vector<1x256xf32> to vector<4x256xf32>
    %338 = arith.mulf %337, %336 : vector<4x256xf32>
    %339 = arith.addf %324, %338 : vector<4x256xf32>
    %cst_111 = arith.constant 4.000000e+00 : f32
    %340 = vector.broadcast %cst_111 : f32 to vector<1x256xf32>
    %341 = arith.addf %9, %340 : vector<1x256xf32>
    %342 = arith.cmpf oeq, %199, %341 : vector<1x256xf32>
    %cst_112 = arith.constant 1.000000e+00 : f32
    %343 = vector.broadcast %cst_112 : f32 to vector<1x256xf32>
    %344 = arith.subf %343, %200 : vector<1x256xf32>
    %cst_113 = arith.constant 0.000000e+00 : f32
    %345 = vector.broadcast %cst_113 : f32 to vector<1x256xf32>
    %346 = arith.select %342, %344, %345 : vector<1x256xi1>, vector<1x256xf32>
    %347 = arith.cmpf oeq, %204, %341 : vector<1x256xf32>
    %cst_114 = arith.constant 0.000000e+00 : f32
    %348 = vector.broadcast %cst_114 : f32 to vector<1x256xf32>
    %349 = arith.select %347, %200, %348 : vector<1x256xi1>, vector<1x256xf32>
    %350 = arith.addf %346, %349 : vector<1x256xf32>
    %c192_i32 = arith.constant 192 : i32
    %351 = tpu.dynamic_rotate %191 by %c192_i32 dim 1 : vector<4x256xf32>, i32 -> vector<4x256xf32>
    %352 = vector.broadcast %350 : vector<1x256xf32> to vector<4x256xf32>
    %353 = arith.mulf %352, %351 : vector<4x256xf32>
    %354 = arith.addf %339, %353 : vector<4x256xf32>
    %cst_115 = arith.constant 5.000000e+00 : f32
    %355 = vector.broadcast %cst_115 : f32 to vector<1x256xf32>
    %356 = arith.addf %9, %355 : vector<1x256xf32>
    %357 = arith.cmpf oeq, %199, %356 : vector<1x256xf32>
    %cst_116 = arith.constant 1.000000e+00 : f32
    %358 = vector.broadcast %cst_116 : f32 to vector<1x256xf32>
    %359 = arith.subf %358, %200 : vector<1x256xf32>
    %cst_117 = arith.constant 0.000000e+00 : f32
    %360 = vector.broadcast %cst_117 : f32 to vector<1x256xf32>
    %361 = arith.select %357, %359, %360 : vector<1x256xi1>, vector<1x256xf32>
    %362 = arith.cmpf oeq, %204, %356 : vector<1x256xf32>
    %cst_118 = arith.constant 0.000000e+00 : f32
    %363 = vector.broadcast %cst_118 : f32 to vector<1x256xf32>
    %364 = arith.select %362, %200, %363 : vector<1x256xi1>, vector<1x256xf32>
    %365 = arith.addf %361, %364 : vector<1x256xf32>
    %c176_i32 = arith.constant 176 : i32
    %366 = tpu.dynamic_rotate %191 by %c176_i32 dim 1 : vector<4x256xf32>, i32 -> vector<4x256xf32>
    %367 = vector.broadcast %365 : vector<1x256xf32> to vector<4x256xf32>
    %368 = arith.mulf %367, %366 : vector<4x256xf32>
    %369 = arith.addf %354, %368 : vector<4x256xf32>
    %cst_119 = arith.constant 1.000000e+00 : f32
    %370 = vector.broadcast %cst_119 : f32 to vector<1x256xf32>
    %371 = arith.mulf %370, %123 : vector<1x256xf32>
    %372 = arith.addf %9, %371 : vector<1x256xf32>
    %cst_120 = arith.constant 0.000000e+00 : f32
    %cst_121 = arith.constant 1.500000e+01 : f32
    %373 = vector.broadcast %cst_120 : f32 to vector<1x256xf32>
    %374 = arith.maximumf %373, %372 : vector<1x256xf32>
    %375 = vector.broadcast %cst_121 : f32 to vector<1x256xf32>
    %376 = arith.minimumf %375, %374 : vector<1x256xf32>
    %377 = math.floor %376 : vector<1x256xf32>
    %378 = arith.subf %376, %377 : vector<1x256xf32>
    %cst_122 = arith.constant 1.000000e+00 : f32
    %379 = vector.broadcast %cst_122 : f32 to vector<1x256xf32>
    %380 = arith.addf %377, %379 : vector<1x256xf32>
    %cst_123 = arith.constant 1.500000e+01 : f32
    %381 = vector.broadcast %cst_123 : f32 to vector<1x256xf32>
    %382 = arith.minimumf %380, %381 : vector<1x256xf32>
    %cst_124 = arith.constant 0.000000e+00 : f32
    %383 = vector.broadcast %cst_124 : f32 to vector<4x256xf32>
    %cst_125 = arith.constant -4.000000e+00 : f32
    %384 = vector.broadcast %cst_125 : f32 to vector<1x256xf32>
    %385 = arith.addf %9, %384 : vector<1x256xf32>
    %386 = arith.cmpf oeq, %377, %385 : vector<1x256xf32>
    %cst_126 = arith.constant 1.000000e+00 : f32
    %387 = vector.broadcast %cst_126 : f32 to vector<1x256xf32>
    %388 = arith.subf %387, %378 : vector<1x256xf32>
    %cst_127 = arith.constant 0.000000e+00 : f32
    %389 = vector.broadcast %cst_127 : f32 to vector<1x256xf32>
    %390 = arith.select %386, %388, %389 : vector<1x256xi1>, vector<1x256xf32>
    %391 = arith.cmpf oeq, %382, %385 : vector<1x256xf32>
    %cst_128 = arith.constant 0.000000e+00 : f32
    %392 = vector.broadcast %cst_128 : f32 to vector<1x256xf32>
    %393 = arith.select %391, %378, %392 : vector<1x256xi1>, vector<1x256xf32>
    %394 = arith.addf %390, %393 : vector<1x256xf32>
    %c64_i32_129 = arith.constant 64 : i32
    %395 = tpu.dynamic_rotate %175 by %c64_i32_129 dim 1 : vector<4x256xf32>, i32 -> vector<4x256xf32>
    %396 = vector.broadcast %394 : vector<1x256xf32> to vector<4x256xf32>
    %397 = arith.mulf %396, %395 : vector<4x256xf32>
    %398 = arith.addf %383, %397 : vector<4x256xf32>
    %cst_130 = arith.constant -3.000000e+00 : f32
    %399 = vector.broadcast %cst_130 : f32 to vector<1x256xf32>
    %400 = arith.addf %9, %399 : vector<1x256xf32>
    %401 = arith.cmpf oeq, %377, %400 : vector<1x256xf32>
    %cst_131 = arith.constant 1.000000e+00 : f32
    %402 = vector.broadcast %cst_131 : f32 to vector<1x256xf32>
    %403 = arith.subf %402, %378 : vector<1x256xf32>
    %cst_132 = arith.constant 0.000000e+00 : f32
    %404 = vector.broadcast %cst_132 : f32 to vector<1x256xf32>
    %405 = arith.select %401, %403, %404 : vector<1x256xi1>, vector<1x256xf32>
    %406 = arith.cmpf oeq, %382, %400 : vector<1x256xf32>
    %cst_133 = arith.constant 0.000000e+00 : f32
    %407 = vector.broadcast %cst_133 : f32 to vector<1x256xf32>
    %408 = arith.select %406, %378, %407 : vector<1x256xi1>, vector<1x256xf32>
    %409 = arith.addf %405, %408 : vector<1x256xf32>
    %c48_i32_134 = arith.constant 48 : i32
    %410 = tpu.dynamic_rotate %175 by %c48_i32_134 dim 1 : vector<4x256xf32>, i32 -> vector<4x256xf32>
    %411 = vector.broadcast %409 : vector<1x256xf32> to vector<4x256xf32>
    %412 = arith.mulf %411, %410 : vector<4x256xf32>
    %413 = arith.addf %398, %412 : vector<4x256xf32>
    %cst_135 = arith.constant -2.000000e+00 : f32
    %414 = vector.broadcast %cst_135 : f32 to vector<1x256xf32>
    %415 = arith.addf %9, %414 : vector<1x256xf32>
    %416 = arith.cmpf oeq, %377, %415 : vector<1x256xf32>
    %cst_136 = arith.constant 1.000000e+00 : f32
    %417 = vector.broadcast %cst_136 : f32 to vector<1x256xf32>
    %418 = arith.subf %417, %378 : vector<1x256xf32>
    %cst_137 = arith.constant 0.000000e+00 : f32
    %419 = vector.broadcast %cst_137 : f32 to vector<1x256xf32>
    %420 = arith.select %416, %418, %419 : vector<1x256xi1>, vector<1x256xf32>
    %421 = arith.cmpf oeq, %382, %415 : vector<1x256xf32>
    %cst_138 = arith.constant 0.000000e+00 : f32
    %422 = vector.broadcast %cst_138 : f32 to vector<1x256xf32>
    %423 = arith.select %421, %378, %422 : vector<1x256xi1>, vector<1x256xf32>
    %424 = arith.addf %420, %423 : vector<1x256xf32>
    %c32_i32_139 = arith.constant 32 : i32
    %425 = tpu.dynamic_rotate %175 by %c32_i32_139 dim 1 : vector<4x256xf32>, i32 -> vector<4x256xf32>
    %426 = vector.broadcast %424 : vector<1x256xf32> to vector<4x256xf32>
    %427 = arith.mulf %426, %425 : vector<4x256xf32>
    %428 = arith.addf %413, %427 : vector<4x256xf32>
    %cst_140 = arith.constant -1.000000e+00 : f32
    %429 = vector.broadcast %cst_140 : f32 to vector<1x256xf32>
    %430 = arith.addf %9, %429 : vector<1x256xf32>
    %431 = arith.cmpf oeq, %377, %430 : vector<1x256xf32>
    %cst_141 = arith.constant 1.000000e+00 : f32
    %432 = vector.broadcast %cst_141 : f32 to vector<1x256xf32>
    %433 = arith.subf %432, %378 : vector<1x256xf32>
    %cst_142 = arith.constant 0.000000e+00 : f32
    %434 = vector.broadcast %cst_142 : f32 to vector<1x256xf32>
    %435 = arith.select %431, %433, %434 : vector<1x256xi1>, vector<1x256xf32>
    %436 = arith.cmpf oeq, %382, %430 : vector<1x256xf32>
    %cst_143 = arith.constant 0.000000e+00 : f32
    %437 = vector.broadcast %cst_143 : f32 to vector<1x256xf32>
    %438 = arith.select %436, %378, %437 : vector<1x256xi1>, vector<1x256xf32>
    %439 = arith.addf %435, %438 : vector<1x256xf32>
    %c16_i32_144 = arith.constant 16 : i32
    %440 = tpu.dynamic_rotate %175 by %c16_i32_144 dim 1 : vector<4x256xf32>, i32 -> vector<4x256xf32>
    %441 = vector.broadcast %439 : vector<1x256xf32> to vector<4x256xf32>
    %442 = arith.mulf %441, %440 : vector<4x256xf32>
    %443 = arith.addf %428, %442 : vector<4x256xf32>
    %cst_145 = arith.constant 0.000000e+00 : f32
    %444 = vector.broadcast %cst_145 : f32 to vector<1x256xf32>
    %445 = arith.addf %9, %444 : vector<1x256xf32>
    %446 = arith.cmpf oeq, %377, %445 : vector<1x256xf32>
    %cst_146 = arith.constant 1.000000e+00 : f32
    %447 = vector.broadcast %cst_146 : f32 to vector<1x256xf32>
    %448 = arith.subf %447, %378 : vector<1x256xf32>
    %cst_147 = arith.constant 0.000000e+00 : f32
    %449 = vector.broadcast %cst_147 : f32 to vector<1x256xf32>
    %450 = arith.select %446, %448, %449 : vector<1x256xi1>, vector<1x256xf32>
    %451 = arith.cmpf oeq, %382, %445 : vector<1x256xf32>
    %cst_148 = arith.constant 0.000000e+00 : f32
    %452 = vector.broadcast %cst_148 : f32 to vector<1x256xf32>
    %453 = arith.select %451, %378, %452 : vector<1x256xi1>, vector<1x256xf32>
    %454 = arith.addf %450, %453 : vector<1x256xf32>
    %455 = vector.broadcast %454 : vector<1x256xf32> to vector<4x256xf32>
    %456 = arith.mulf %455, %175 : vector<4x256xf32>
    %457 = arith.addf %443, %456 : vector<4x256xf32>
    %cst_149 = arith.constant 1.000000e+00 : f32
    %458 = vector.broadcast %cst_149 : f32 to vector<1x256xf32>
    %459 = arith.addf %9, %458 : vector<1x256xf32>
    %460 = arith.cmpf oeq, %377, %459 : vector<1x256xf32>
    %cst_150 = arith.constant 1.000000e+00 : f32
    %461 = vector.broadcast %cst_150 : f32 to vector<1x256xf32>
    %462 = arith.subf %461, %378 : vector<1x256xf32>
    %cst_151 = arith.constant 0.000000e+00 : f32
    %463 = vector.broadcast %cst_151 : f32 to vector<1x256xf32>
    %464 = arith.select %460, %462, %463 : vector<1x256xi1>, vector<1x256xf32>
    %465 = arith.cmpf oeq, %382, %459 : vector<1x256xf32>
    %cst_152 = arith.constant 0.000000e+00 : f32
    %466 = vector.broadcast %cst_152 : f32 to vector<1x256xf32>
    %467 = arith.select %465, %378, %466 : vector<1x256xi1>, vector<1x256xf32>
    %468 = arith.addf %464, %467 : vector<1x256xf32>
    %c240_i32_153 = arith.constant 240 : i32
    %469 = tpu.dynamic_rotate %175 by %c240_i32_153 dim 1 : vector<4x256xf32>, i32 -> vector<4x256xf32>
    %470 = vector.broadcast %468 : vector<1x256xf32> to vector<4x256xf32>
    %471 = arith.mulf %470, %469 : vector<4x256xf32>
    %472 = arith.addf %457, %471 : vector<4x256xf32>
    %cst_154 = arith.constant 2.000000e+00 : f32
    %473 = vector.broadcast %cst_154 : f32 to vector<1x256xf32>
    %474 = arith.addf %9, %473 : vector<1x256xf32>
    %475 = arith.cmpf oeq, %377, %474 : vector<1x256xf32>
    %cst_155 = arith.constant 1.000000e+00 : f32
    %476 = vector.broadcast %cst_155 : f32 to vector<1x256xf32>
    %477 = arith.subf %476, %378 : vector<1x256xf32>
    %cst_156 = arith.constant 0.000000e+00 : f32
    %478 = vector.broadcast %cst_156 : f32 to vector<1x256xf32>
    %479 = arith.select %475, %477, %478 : vector<1x256xi1>, vector<1x256xf32>
    %480 = arith.cmpf oeq, %382, %474 : vector<1x256xf32>
    %cst_157 = arith.constant 0.000000e+00 : f32
    %481 = vector.broadcast %cst_157 : f32 to vector<1x256xf32>
    %482 = arith.select %480, %378, %481 : vector<1x256xi1>, vector<1x256xf32>
    %483 = arith.addf %479, %482 : vector<1x256xf32>
    %c224_i32_158 = arith.constant 224 : i32
    %484 = tpu.dynamic_rotate %175 by %c224_i32_158 dim 1 : vector<4x256xf32>, i32 -> vector<4x256xf32>
    %485 = vector.broadcast %483 : vector<1x256xf32> to vector<4x256xf32>
    %486 = arith.mulf %485, %484 : vector<4x256xf32>
    %487 = arith.addf %472, %486 : vector<4x256xf32>
    %cst_159 = arith.constant 3.000000e+00 : f32
    %488 = vector.broadcast %cst_159 : f32 to vector<1x256xf32>
    %489 = arith.addf %9, %488 : vector<1x256xf32>
    %490 = arith.cmpf oeq, %377, %489 : vector<1x256xf32>
    %cst_160 = arith.constant 1.000000e+00 : f32
    %491 = vector.broadcast %cst_160 : f32 to vector<1x256xf32>
    %492 = arith.subf %491, %378 : vector<1x256xf32>
    %cst_161 = arith.constant 0.000000e+00 : f32
    %493 = vector.broadcast %cst_161 : f32 to vector<1x256xf32>
    %494 = arith.select %490, %492, %493 : vector<1x256xi1>, vector<1x256xf32>
    %495 = arith.cmpf oeq, %382, %489 : vector<1x256xf32>
    %cst_162 = arith.constant 0.000000e+00 : f32
    %496 = vector.broadcast %cst_162 : f32 to vector<1x256xf32>
    %497 = arith.select %495, %378, %496 : vector<1x256xi1>, vector<1x256xf32>
    %498 = arith.addf %494, %497 : vector<1x256xf32>
    %c208_i32_163 = arith.constant 208 : i32
    %499 = tpu.dynamic_rotate %175 by %c208_i32_163 dim 1 : vector<4x256xf32>, i32 -> vector<4x256xf32>
    %500 = vector.broadcast %498 : vector<1x256xf32> to vector<4x256xf32>
    %501 = arith.mulf %500, %499 : vector<4x256xf32>
    %502 = arith.addf %487, %501 : vector<4x256xf32>
    %cst_164 = arith.constant 4.000000e+00 : f32
    %503 = vector.broadcast %cst_164 : f32 to vector<1x256xf32>
    %504 = arith.addf %9, %503 : vector<1x256xf32>
    %505 = arith.cmpf oeq, %377, %504 : vector<1x256xf32>
    %cst_165 = arith.constant 1.000000e+00 : f32
    %506 = vector.broadcast %cst_165 : f32 to vector<1x256xf32>
    %507 = arith.subf %506, %378 : vector<1x256xf32>
    %cst_166 = arith.constant 0.000000e+00 : f32
    %508 = vector.broadcast %cst_166 : f32 to vector<1x256xf32>
    %509 = arith.select %505, %507, %508 : vector<1x256xi1>, vector<1x256xf32>
    %510 = arith.cmpf oeq, %382, %504 : vector<1x256xf32>
    %cst_167 = arith.constant 0.000000e+00 : f32
    %511 = vector.broadcast %cst_167 : f32 to vector<1x256xf32>
    %512 = arith.select %510, %378, %511 : vector<1x256xi1>, vector<1x256xf32>
    %513 = arith.addf %509, %512 : vector<1x256xf32>
    %c192_i32_168 = arith.constant 192 : i32
    %514 = tpu.dynamic_rotate %175 by %c192_i32_168 dim 1 : vector<4x256xf32>, i32 -> vector<4x256xf32>
    %515 = vector.broadcast %513 : vector<1x256xf32> to vector<4x256xf32>
    %516 = arith.mulf %515, %514 : vector<4x256xf32>
    %517 = arith.addf %502, %516 : vector<4x256xf32>
    %cst_169 = arith.constant 1.000000e+00 : f32
    %518 = vector.broadcast %cst_169 : f32 to vector<1x256xf32>
    %519 = arith.mulf %518, %119 : vector<1x256xf32>
    %520 = arith.addf %9, %519 : vector<1x256xf32>
    %cst_170 = arith.constant 0.000000e+00 : f32
    %cst_171 = arith.constant 1.500000e+01 : f32
    %521 = vector.broadcast %cst_170 : f32 to vector<1x256xf32>
    %522 = arith.maximumf %521, %520 : vector<1x256xf32>
    %523 = vector.broadcast %cst_171 : f32 to vector<1x256xf32>
    %524 = arith.minimumf %523, %522 : vector<1x256xf32>
    %525 = math.floor %524 : vector<1x256xf32>
    %526 = arith.subf %524, %525 : vector<1x256xf32>
    %cst_172 = arith.constant 1.000000e+00 : f32
    %527 = vector.broadcast %cst_172 : f32 to vector<1x256xf32>
    %528 = arith.addf %525, %527 : vector<1x256xf32>
    %cst_173 = arith.constant 1.500000e+01 : f32
    %529 = vector.broadcast %cst_173 : f32 to vector<1x256xf32>
    %530 = arith.minimumf %528, %529 : vector<1x256xf32>
    %cst_174 = arith.constant 0.000000e+00 : f32
    %531 = vector.broadcast %cst_174 : f32 to vector<4x256xf32>
    %cst_175 = arith.constant -3.000000e+00 : f32
    %532 = vector.broadcast %cst_175 : f32 to vector<1x256xf32>
    %533 = arith.addf %9, %532 : vector<1x256xf32>
    %534 = arith.cmpf oeq, %525, %533 : vector<1x256xf32>
    %cst_176 = arith.constant 1.000000e+00 : f32
    %535 = vector.broadcast %cst_176 : f32 to vector<1x256xf32>
    %536 = arith.subf %535, %526 : vector<1x256xf32>
    %cst_177 = arith.constant 0.000000e+00 : f32
    %537 = vector.broadcast %cst_177 : f32 to vector<1x256xf32>
    %538 = arith.select %534, %536, %537 : vector<1x256xi1>, vector<1x256xf32>
    %539 = arith.cmpf oeq, %530, %533 : vector<1x256xf32>
    %cst_178 = arith.constant 0.000000e+00 : f32
    %540 = vector.broadcast %cst_178 : f32 to vector<1x256xf32>
    %541 = arith.select %539, %526, %540 : vector<1x256xi1>, vector<1x256xf32>
    %542 = arith.addf %538, %541 : vector<1x256xf32>
    %c48_i32_179 = arith.constant 48 : i32
    %543 = tpu.dynamic_rotate %159 by %c48_i32_179 dim 1 : vector<4x256xf32>, i32 -> vector<4x256xf32>
    %544 = vector.broadcast %542 : vector<1x256xf32> to vector<4x256xf32>
    %545 = arith.mulf %544, %543 : vector<4x256xf32>
    %546 = arith.addf %531, %545 : vector<4x256xf32>
    %cst_180 = arith.constant -2.000000e+00 : f32
    %547 = vector.broadcast %cst_180 : f32 to vector<1x256xf32>
    %548 = arith.addf %9, %547 : vector<1x256xf32>
    %549 = arith.cmpf oeq, %525, %548 : vector<1x256xf32>
    %cst_181 = arith.constant 1.000000e+00 : f32
    %550 = vector.broadcast %cst_181 : f32 to vector<1x256xf32>
    %551 = arith.subf %550, %526 : vector<1x256xf32>
    %cst_182 = arith.constant 0.000000e+00 : f32
    %552 = vector.broadcast %cst_182 : f32 to vector<1x256xf32>
    %553 = arith.select %549, %551, %552 : vector<1x256xi1>, vector<1x256xf32>
    %554 = arith.cmpf oeq, %530, %548 : vector<1x256xf32>
    %cst_183 = arith.constant 0.000000e+00 : f32
    %555 = vector.broadcast %cst_183 : f32 to vector<1x256xf32>
    %556 = arith.select %554, %526, %555 : vector<1x256xi1>, vector<1x256xf32>
    %557 = arith.addf %553, %556 : vector<1x256xf32>
    %c32_i32_184 = arith.constant 32 : i32
    %558 = tpu.dynamic_rotate %159 by %c32_i32_184 dim 1 : vector<4x256xf32>, i32 -> vector<4x256xf32>
    %559 = vector.broadcast %557 : vector<1x256xf32> to vector<4x256xf32>
    %560 = arith.mulf %559, %558 : vector<4x256xf32>
    %561 = arith.addf %546, %560 : vector<4x256xf32>
    %cst_185 = arith.constant -1.000000e+00 : f32
    %562 = vector.broadcast %cst_185 : f32 to vector<1x256xf32>
    %563 = arith.addf %9, %562 : vector<1x256xf32>
    %564 = arith.cmpf oeq, %525, %563 : vector<1x256xf32>
    %cst_186 = arith.constant 1.000000e+00 : f32
    %565 = vector.broadcast %cst_186 : f32 to vector<1x256xf32>
    %566 = arith.subf %565, %526 : vector<1x256xf32>
    %cst_187 = arith.constant 0.000000e+00 : f32
    %567 = vector.broadcast %cst_187 : f32 to vector<1x256xf32>
    %568 = arith.select %564, %566, %567 : vector<1x256xi1>, vector<1x256xf32>
    %569 = arith.cmpf oeq, %530, %563 : vector<1x256xf32>
    %cst_188 = arith.constant 0.000000e+00 : f32
    %570 = vector.broadcast %cst_188 : f32 to vector<1x256xf32>
    %571 = arith.select %569, %526, %570 : vector<1x256xi1>, vector<1x256xf32>
    %572 = arith.addf %568, %571 : vector<1x256xf32>
    %c16_i32_189 = arith.constant 16 : i32
    %573 = tpu.dynamic_rotate %159 by %c16_i32_189 dim 1 : vector<4x256xf32>, i32 -> vector<4x256xf32>
    %574 = vector.broadcast %572 : vector<1x256xf32> to vector<4x256xf32>
    %575 = arith.mulf %574, %573 : vector<4x256xf32>
    %576 = arith.addf %561, %575 : vector<4x256xf32>
    %cst_190 = arith.constant 0.000000e+00 : f32
    %577 = vector.broadcast %cst_190 : f32 to vector<1x256xf32>
    %578 = arith.addf %9, %577 : vector<1x256xf32>
    %579 = arith.cmpf oeq, %525, %578 : vector<1x256xf32>
    %cst_191 = arith.constant 1.000000e+00 : f32
    %580 = vector.broadcast %cst_191 : f32 to vector<1x256xf32>
    %581 = arith.subf %580, %526 : vector<1x256xf32>
    %cst_192 = arith.constant 0.000000e+00 : f32
    %582 = vector.broadcast %cst_192 : f32 to vector<1x256xf32>
    %583 = arith.select %579, %581, %582 : vector<1x256xi1>, vector<1x256xf32>
    %584 = arith.cmpf oeq, %530, %578 : vector<1x256xf32>
    %cst_193 = arith.constant 0.000000e+00 : f32
    %585 = vector.broadcast %cst_193 : f32 to vector<1x256xf32>
    %586 = arith.select %584, %526, %585 : vector<1x256xi1>, vector<1x256xf32>
    %587 = arith.addf %583, %586 : vector<1x256xf32>
    %588 = vector.broadcast %587 : vector<1x256xf32> to vector<4x256xf32>
    %589 = arith.mulf %588, %159 : vector<4x256xf32>
    %590 = arith.addf %576, %589 : vector<4x256xf32>
    %cst_194 = arith.constant 1.000000e+00 : f32
    %591 = vector.broadcast %cst_194 : f32 to vector<1x256xf32>
    %592 = arith.addf %9, %591 : vector<1x256xf32>
    %593 = arith.cmpf oeq, %525, %592 : vector<1x256xf32>
    %cst_195 = arith.constant 1.000000e+00 : f32
    %594 = vector.broadcast %cst_195 : f32 to vector<1x256xf32>
    %595 = arith.subf %594, %526 : vector<1x256xf32>
    %cst_196 = arith.constant 0.000000e+00 : f32
    %596 = vector.broadcast %cst_196 : f32 to vector<1x256xf32>
    %597 = arith.select %593, %595, %596 : vector<1x256xi1>, vector<1x256xf32>
    %598 = arith.cmpf oeq, %530, %592 : vector<1x256xf32>
    %cst_197 = arith.constant 0.000000e+00 : f32
    %599 = vector.broadcast %cst_197 : f32 to vector<1x256xf32>
    %600 = arith.select %598, %526, %599 : vector<1x256xi1>, vector<1x256xf32>
    %601 = arith.addf %597, %600 : vector<1x256xf32>
    %c240_i32_198 = arith.constant 240 : i32
    %602 = tpu.dynamic_rotate %159 by %c240_i32_198 dim 1 : vector<4x256xf32>, i32 -> vector<4x256xf32>
    %603 = vector.broadcast %601 : vector<1x256xf32> to vector<4x256xf32>
    %604 = arith.mulf %603, %602 : vector<4x256xf32>
    %605 = arith.addf %590, %604 : vector<4x256xf32>
    %cst_199 = arith.constant 2.000000e+00 : f32
    %606 = vector.broadcast %cst_199 : f32 to vector<1x256xf32>
    %607 = arith.addf %9, %606 : vector<1x256xf32>
    %608 = arith.cmpf oeq, %525, %607 : vector<1x256xf32>
    %cst_200 = arith.constant 1.000000e+00 : f32
    %609 = vector.broadcast %cst_200 : f32 to vector<1x256xf32>
    %610 = arith.subf %609, %526 : vector<1x256xf32>
    %cst_201 = arith.constant 0.000000e+00 : f32
    %611 = vector.broadcast %cst_201 : f32 to vector<1x256xf32>
    %612 = arith.select %608, %610, %611 : vector<1x256xi1>, vector<1x256xf32>
    %613 = arith.cmpf oeq, %530, %607 : vector<1x256xf32>
    %cst_202 = arith.constant 0.000000e+00 : f32
    %614 = vector.broadcast %cst_202 : f32 to vector<1x256xf32>
    %615 = arith.select %613, %526, %614 : vector<1x256xi1>, vector<1x256xf32>
    %616 = arith.addf %612, %615 : vector<1x256xf32>
    %c224_i32_203 = arith.constant 224 : i32
    %617 = tpu.dynamic_rotate %159 by %c224_i32_203 dim 1 : vector<4x256xf32>, i32 -> vector<4x256xf32>
    %618 = vector.broadcast %616 : vector<1x256xf32> to vector<4x256xf32>
    %619 = arith.mulf %618, %617 : vector<4x256xf32>
    %620 = arith.addf %605, %619 : vector<4x256xf32>
    %cst_204 = arith.constant 3.000000e+00 : f32
    %621 = vector.broadcast %cst_204 : f32 to vector<1x256xf32>
    %622 = arith.addf %9, %621 : vector<1x256xf32>
    %623 = arith.cmpf oeq, %525, %622 : vector<1x256xf32>
    %cst_205 = arith.constant 1.000000e+00 : f32
    %624 = vector.broadcast %cst_205 : f32 to vector<1x256xf32>
    %625 = arith.subf %624, %526 : vector<1x256xf32>
    %cst_206 = arith.constant 0.000000e+00 : f32
    %626 = vector.broadcast %cst_206 : f32 to vector<1x256xf32>
    %627 = arith.select %623, %625, %626 : vector<1x256xi1>, vector<1x256xf32>
    %628 = arith.cmpf oeq, %530, %622 : vector<1x256xf32>
    %cst_207 = arith.constant 0.000000e+00 : f32
    %629 = vector.broadcast %cst_207 : f32 to vector<1x256xf32>
    %630 = arith.select %628, %526, %629 : vector<1x256xi1>, vector<1x256xf32>
    %631 = arith.addf %627, %630 : vector<1x256xf32>
    %c208_i32_208 = arith.constant 208 : i32
    %632 = tpu.dynamic_rotate %159 by %c208_i32_208 dim 1 : vector<4x256xf32>, i32 -> vector<4x256xf32>
    %633 = vector.broadcast %631 : vector<1x256xf32> to vector<4x256xf32>
    %634 = arith.mulf %633, %632 : vector<4x256xf32>
    %635 = arith.addf %620, %634 : vector<4x256xf32>
    %cst_209 = arith.constant 1.000000e+00 : f32
    %636 = vector.broadcast %cst_209 : f32 to vector<1x256xf32>
    %637 = arith.mulf %636, %115 : vector<1x256xf32>
    %638 = arith.addf %9, %637 : vector<1x256xf32>
    %cst_210 = arith.constant 0.000000e+00 : f32
    %cst_211 = arith.constant 1.500000e+01 : f32
    %639 = vector.broadcast %cst_210 : f32 to vector<1x256xf32>
    %640 = arith.maximumf %639, %638 : vector<1x256xf32>
    %641 = vector.broadcast %cst_211 : f32 to vector<1x256xf32>
    %642 = arith.minimumf %641, %640 : vector<1x256xf32>
    %643 = math.floor %642 : vector<1x256xf32>
    %644 = arith.subf %642, %643 : vector<1x256xf32>
    %cst_212 = arith.constant 1.000000e+00 : f32
    %645 = vector.broadcast %cst_212 : f32 to vector<1x256xf32>
    %646 = arith.addf %643, %645 : vector<1x256xf32>
    %cst_213 = arith.constant 1.500000e+01 : f32
    %647 = vector.broadcast %cst_213 : f32 to vector<1x256xf32>
    %648 = arith.minimumf %646, %647 : vector<1x256xf32>
    %cst_214 = arith.constant 0.000000e+00 : f32
    %649 = vector.broadcast %cst_214 : f32 to vector<4x256xf32>
    %cst_215 = arith.constant -2.000000e+00 : f32
    %650 = vector.broadcast %cst_215 : f32 to vector<1x256xf32>
    %651 = arith.addf %9, %650 : vector<1x256xf32>
    %652 = arith.cmpf oeq, %643, %651 : vector<1x256xf32>
    %cst_216 = arith.constant 1.000000e+00 : f32
    %653 = vector.broadcast %cst_216 : f32 to vector<1x256xf32>
    %654 = arith.subf %653, %644 : vector<1x256xf32>
    %cst_217 = arith.constant 0.000000e+00 : f32
    %655 = vector.broadcast %cst_217 : f32 to vector<1x256xf32>
    %656 = arith.select %652, %654, %655 : vector<1x256xi1>, vector<1x256xf32>
    %657 = arith.cmpf oeq, %648, %651 : vector<1x256xf32>
    %cst_218 = arith.constant 0.000000e+00 : f32
    %658 = vector.broadcast %cst_218 : f32 to vector<1x256xf32>
    %659 = arith.select %657, %644, %658 : vector<1x256xi1>, vector<1x256xf32>
    %660 = arith.addf %656, %659 : vector<1x256xf32>
    %c32_i32_219 = arith.constant 32 : i32
    %661 = tpu.dynamic_rotate %143 by %c32_i32_219 dim 1 : vector<4x256xf32>, i32 -> vector<4x256xf32>
    %662 = vector.broadcast %660 : vector<1x256xf32> to vector<4x256xf32>
    %663 = arith.mulf %662, %661 : vector<4x256xf32>
    %664 = arith.addf %649, %663 : vector<4x256xf32>
    %cst_220 = arith.constant -1.000000e+00 : f32
    %665 = vector.broadcast %cst_220 : f32 to vector<1x256xf32>
    %666 = arith.addf %9, %665 : vector<1x256xf32>
    %667 = arith.cmpf oeq, %643, %666 : vector<1x256xf32>
    %cst_221 = arith.constant 1.000000e+00 : f32
    %668 = vector.broadcast %cst_221 : f32 to vector<1x256xf32>
    %669 = arith.subf %668, %644 : vector<1x256xf32>
    %cst_222 = arith.constant 0.000000e+00 : f32
    %670 = vector.broadcast %cst_222 : f32 to vector<1x256xf32>
    %671 = arith.select %667, %669, %670 : vector<1x256xi1>, vector<1x256xf32>
    %672 = arith.cmpf oeq, %648, %666 : vector<1x256xf32>
    %cst_223 = arith.constant 0.000000e+00 : f32
    %673 = vector.broadcast %cst_223 : f32 to vector<1x256xf32>
    %674 = arith.select %672, %644, %673 : vector<1x256xi1>, vector<1x256xf32>
    %675 = arith.addf %671, %674 : vector<1x256xf32>
    %c16_i32_224 = arith.constant 16 : i32
    %676 = tpu.dynamic_rotate %143 by %c16_i32_224 dim 1 : vector<4x256xf32>, i32 -> vector<4x256xf32>
    %677 = vector.broadcast %675 : vector<1x256xf32> to vector<4x256xf32>
    %678 = arith.mulf %677, %676 : vector<4x256xf32>
    %679 = arith.addf %664, %678 : vector<4x256xf32>
    %cst_225 = arith.constant 0.000000e+00 : f32
    %680 = vector.broadcast %cst_225 : f32 to vector<1x256xf32>
    %681 = arith.addf %9, %680 : vector<1x256xf32>
    %682 = arith.cmpf oeq, %643, %681 : vector<1x256xf32>
    %cst_226 = arith.constant 1.000000e+00 : f32
    %683 = vector.broadcast %cst_226 : f32 to vector<1x256xf32>
    %684 = arith.subf %683, %644 : vector<1x256xf32>
    %cst_227 = arith.constant 0.000000e+00 : f32
    %685 = vector.broadcast %cst_227 : f32 to vector<1x256xf32>
    %686 = arith.select %682, %684, %685 : vector<1x256xi1>, vector<1x256xf32>
    %687 = arith.cmpf oeq, %648, %681 : vector<1x256xf32>
    %cst_228 = arith.constant 0.000000e+00 : f32
    %688 = vector.broadcast %cst_228 : f32 to vector<1x256xf32>
    %689 = arith.select %687, %644, %688 : vector<1x256xi1>, vector<1x256xf32>
    %690 = arith.addf %686, %689 : vector<1x256xf32>
    %691 = vector.broadcast %690 : vector<1x256xf32> to vector<4x256xf32>
    %692 = arith.mulf %691, %143 : vector<4x256xf32>
    %693 = arith.addf %679, %692 : vector<4x256xf32>
    %cst_229 = arith.constant 1.000000e+00 : f32
    %694 = vector.broadcast %cst_229 : f32 to vector<1x256xf32>
    %695 = arith.addf %9, %694 : vector<1x256xf32>
    %696 = arith.cmpf oeq, %643, %695 : vector<1x256xf32>
    %cst_230 = arith.constant 1.000000e+00 : f32
    %697 = vector.broadcast %cst_230 : f32 to vector<1x256xf32>
    %698 = arith.subf %697, %644 : vector<1x256xf32>
    %cst_231 = arith.constant 0.000000e+00 : f32
    %699 = vector.broadcast %cst_231 : f32 to vector<1x256xf32>
    %700 = arith.select %696, %698, %699 : vector<1x256xi1>, vector<1x256xf32>
    %701 = arith.cmpf oeq, %648, %695 : vector<1x256xf32>
    %cst_232 = arith.constant 0.000000e+00 : f32
    %702 = vector.broadcast %cst_232 : f32 to vector<1x256xf32>
    %703 = arith.select %701, %644, %702 : vector<1x256xi1>, vector<1x256xf32>
    %704 = arith.addf %700, %703 : vector<1x256xf32>
    %c240_i32_233 = arith.constant 240 : i32
    %705 = tpu.dynamic_rotate %143 by %c240_i32_233 dim 1 : vector<4x256xf32>, i32 -> vector<4x256xf32>
    %706 = vector.broadcast %704 : vector<1x256xf32> to vector<4x256xf32>
    %707 = arith.mulf %706, %705 : vector<4x256xf32>
    %708 = arith.addf %693, %707 : vector<4x256xf32>
    %cst_234 = arith.constant 2.000000e+00 : f32
    %709 = vector.broadcast %cst_234 : f32 to vector<1x256xf32>
    %710 = arith.addf %9, %709 : vector<1x256xf32>
    %711 = arith.cmpf oeq, %643, %710 : vector<1x256xf32>
    %cst_235 = arith.constant 1.000000e+00 : f32
    %712 = vector.broadcast %cst_235 : f32 to vector<1x256xf32>
    %713 = arith.subf %712, %644 : vector<1x256xf32>
    %cst_236 = arith.constant 0.000000e+00 : f32
    %714 = vector.broadcast %cst_236 : f32 to vector<1x256xf32>
    %715 = arith.select %711, %713, %714 : vector<1x256xi1>, vector<1x256xf32>
    %716 = arith.cmpf oeq, %648, %710 : vector<1x256xf32>
    %cst_237 = arith.constant 0.000000e+00 : f32
    %717 = vector.broadcast %cst_237 : f32 to vector<1x256xf32>
    %718 = arith.select %716, %644, %717 : vector<1x256xi1>, vector<1x256xf32>
    %719 = arith.addf %715, %718 : vector<1x256xf32>
    %c224_i32_238 = arith.constant 224 : i32
    %720 = tpu.dynamic_rotate %143 by %c224_i32_238 dim 1 : vector<4x256xf32>, i32 -> vector<4x256xf32>
    %721 = vector.broadcast %719 : vector<1x256xf32> to vector<4x256xf32>
    %722 = arith.mulf %721, %720 : vector<4x256xf32>
    %723 = arith.addf %708, %722 : vector<4x256xf32>
    %cst_239 = arith.constant 1.000000e+00 : f32
    %724 = vector.broadcast %cst_239 : f32 to vector<1x256xf32>
    %725 = arith.mulf %724, %113 : vector<1x256xf32>
    %726 = arith.addf %9, %725 : vector<1x256xf32>
    %cst_240 = arith.constant 0.000000e+00 : f32
    %cst_241 = arith.constant 1.500000e+01 : f32
    %727 = vector.broadcast %cst_240 : f32 to vector<1x256xf32>
    %728 = arith.maximumf %727, %726 : vector<1x256xf32>
    %729 = vector.broadcast %cst_241 : f32 to vector<1x256xf32>
    %730 = arith.minimumf %729, %728 : vector<1x256xf32>
    %731 = math.floor %730 : vector<1x256xf32>
    %732 = arith.subf %730, %731 : vector<1x256xf32>
    %cst_242 = arith.constant 1.000000e+00 : f32
    %733 = vector.broadcast %cst_242 : f32 to vector<1x256xf32>
    %734 = arith.addf %731, %733 : vector<1x256xf32>
    %cst_243 = arith.constant 1.500000e+01 : f32
    %735 = vector.broadcast %cst_243 : f32 to vector<1x256xf32>
    %736 = arith.minimumf %734, %735 : vector<1x256xf32>
    %cst_244 = arith.constant 0.000000e+00 : f32
    %737 = vector.broadcast %cst_244 : f32 to vector<4x256xf32>
    %cst_245 = arith.constant -2.000000e+00 : f32
    %738 = vector.broadcast %cst_245 : f32 to vector<1x256xf32>
    %739 = arith.addf %9, %738 : vector<1x256xf32>
    %740 = arith.cmpf oeq, %731, %739 : vector<1x256xf32>
    %cst_246 = arith.constant 1.000000e+00 : f32
    %741 = vector.broadcast %cst_246 : f32 to vector<1x256xf32>
    %742 = arith.subf %741, %732 : vector<1x256xf32>
    %cst_247 = arith.constant 0.000000e+00 : f32
    %743 = vector.broadcast %cst_247 : f32 to vector<1x256xf32>
    %744 = arith.select %740, %742, %743 : vector<1x256xi1>, vector<1x256xf32>
    %745 = arith.cmpf oeq, %736, %739 : vector<1x256xf32>
    %cst_248 = arith.constant 0.000000e+00 : f32
    %746 = vector.broadcast %cst_248 : f32 to vector<1x256xf32>
    %747 = arith.select %745, %732, %746 : vector<1x256xi1>, vector<1x256xf32>
    %748 = arith.addf %744, %747 : vector<1x256xf32>
    %c32_i32_249 = arith.constant 32 : i32
    %749 = tpu.dynamic_rotate %135 by %c32_i32_249 dim 1 : vector<4x256xf32>, i32 -> vector<4x256xf32>
    %750 = vector.broadcast %748 : vector<1x256xf32> to vector<4x256xf32>
    %751 = arith.mulf %750, %749 : vector<4x256xf32>
    %752 = arith.addf %737, %751 : vector<4x256xf32>
    %cst_250 = arith.constant -1.000000e+00 : f32
    %753 = vector.broadcast %cst_250 : f32 to vector<1x256xf32>
    %754 = arith.addf %9, %753 : vector<1x256xf32>
    %755 = arith.cmpf oeq, %731, %754 : vector<1x256xf32>
    %cst_251 = arith.constant 1.000000e+00 : f32
    %756 = vector.broadcast %cst_251 : f32 to vector<1x256xf32>
    %757 = arith.subf %756, %732 : vector<1x256xf32>
    %cst_252 = arith.constant 0.000000e+00 : f32
    %758 = vector.broadcast %cst_252 : f32 to vector<1x256xf32>
    %759 = arith.select %755, %757, %758 : vector<1x256xi1>, vector<1x256xf32>
    %760 = arith.cmpf oeq, %736, %754 : vector<1x256xf32>
    %cst_253 = arith.constant 0.000000e+00 : f32
    %761 = vector.broadcast %cst_253 : f32 to vector<1x256xf32>
    %762 = arith.select %760, %732, %761 : vector<1x256xi1>, vector<1x256xf32>
    %763 = arith.addf %759, %762 : vector<1x256xf32>
    %c16_i32_254 = arith.constant 16 : i32
    %764 = tpu.dynamic_rotate %135 by %c16_i32_254 dim 1 : vector<4x256xf32>, i32 -> vector<4x256xf32>
    %765 = vector.broadcast %763 : vector<1x256xf32> to vector<4x256xf32>
    %766 = arith.mulf %765, %764 : vector<4x256xf32>
    %767 = arith.addf %752, %766 : vector<4x256xf32>
    %cst_255 = arith.constant 0.000000e+00 : f32
    %768 = vector.broadcast %cst_255 : f32 to vector<1x256xf32>
    %769 = arith.addf %9, %768 : vector<1x256xf32>
    %770 = arith.cmpf oeq, %731, %769 : vector<1x256xf32>
    %cst_256 = arith.constant 1.000000e+00 : f32
    %771 = vector.broadcast %cst_256 : f32 to vector<1x256xf32>
    %772 = arith.subf %771, %732 : vector<1x256xf32>
    %cst_257 = arith.constant 0.000000e+00 : f32
    %773 = vector.broadcast %cst_257 : f32 to vector<1x256xf32>
    %774 = arith.select %770, %772, %773 : vector<1x256xi1>, vector<1x256xf32>
    %775 = arith.cmpf oeq, %736, %769 : vector<1x256xf32>
    %cst_258 = arith.constant 0.000000e+00 : f32
    %776 = vector.broadcast %cst_258 : f32 to vector<1x256xf32>
    %777 = arith.select %775, %732, %776 : vector<1x256xi1>, vector<1x256xf32>
    %778 = arith.addf %774, %777 : vector<1x256xf32>
    %779 = vector.broadcast %778 : vector<1x256xf32> to vector<4x256xf32>
    %780 = arith.mulf %779, %135 : vector<4x256xf32>
    %781 = arith.addf %767, %780 : vector<4x256xf32>
    %cst_259 = arith.constant 1.000000e+00 : f32
    %782 = vector.broadcast %cst_259 : f32 to vector<1x256xf32>
    %783 = arith.addf %9, %782 : vector<1x256xf32>
    %784 = arith.cmpf oeq, %731, %783 : vector<1x256xf32>
    %cst_260 = arith.constant 1.000000e+00 : f32
    %785 = vector.broadcast %cst_260 : f32 to vector<1x256xf32>
    %786 = arith.subf %785, %732 : vector<1x256xf32>
    %cst_261 = arith.constant 0.000000e+00 : f32
    %787 = vector.broadcast %cst_261 : f32 to vector<1x256xf32>
    %788 = arith.select %784, %786, %787 : vector<1x256xi1>, vector<1x256xf32>
    %789 = arith.cmpf oeq, %736, %783 : vector<1x256xf32>
    %cst_262 = arith.constant 0.000000e+00 : f32
    %790 = vector.broadcast %cst_262 : f32 to vector<1x256xf32>
    %791 = arith.select %789, %732, %790 : vector<1x256xi1>, vector<1x256xf32>
    %792 = arith.addf %788, %791 : vector<1x256xf32>
    %c240_i32_263 = arith.constant 240 : i32
    %793 = tpu.dynamic_rotate %135 by %c240_i32_263 dim 1 : vector<4x256xf32>, i32 -> vector<4x256xf32>
    %794 = vector.broadcast %792 : vector<1x256xf32> to vector<4x256xf32>
    %795 = arith.mulf %794, %793 : vector<4x256xf32>
    %796 = arith.addf %781, %795 : vector<4x256xf32>
    %cst_264 = arith.constant 2.000000e+00 : f32
    %797 = vector.broadcast %cst_264 : f32 to vector<1x256xf32>
    %798 = arith.addf %9, %797 : vector<1x256xf32>
    %799 = arith.cmpf oeq, %731, %798 : vector<1x256xf32>
    %cst_265 = arith.constant 1.000000e+00 : f32
    %800 = vector.broadcast %cst_265 : f32 to vector<1x256xf32>
    %801 = arith.subf %800, %732 : vector<1x256xf32>
    %cst_266 = arith.constant 0.000000e+00 : f32
    %802 = vector.broadcast %cst_266 : f32 to vector<1x256xf32>
    %803 = arith.select %799, %801, %802 : vector<1x256xi1>, vector<1x256xf32>
    %804 = arith.cmpf oeq, %736, %798 : vector<1x256xf32>
    %cst_267 = arith.constant 0.000000e+00 : f32
    %805 = vector.broadcast %cst_267 : f32 to vector<1x256xf32>
    %806 = arith.select %804, %732, %805 : vector<1x256xi1>, vector<1x256xf32>
    %807 = arith.addf %803, %806 : vector<1x256xf32>
    %c224_i32_268 = arith.constant 224 : i32
    %808 = tpu.dynamic_rotate %135 by %c224_i32_268 dim 1 : vector<4x256xf32>, i32 -> vector<4x256xf32>
    %809 = vector.broadcast %807 : vector<1x256xf32> to vector<4x256xf32>
    %810 = arith.mulf %809, %808 : vector<4x256xf32>
    %811 = arith.addf %796, %810 : vector<4x256xf32>
    %cst_269 = arith.constant 1.000000e+00 : f32
    %812 = vector.broadcast %cst_269 : f32 to vector<1x256xf32>
    %813 = arith.mulf %812, %117 : vector<1x256xf32>
    %814 = arith.addf %9, %813 : vector<1x256xf32>
    %cst_270 = arith.constant 0.000000e+00 : f32
    %cst_271 = arith.constant 1.500000e+01 : f32
    %815 = vector.broadcast %cst_270 : f32 to vector<1x256xf32>
    %816 = arith.maximumf %815, %814 : vector<1x256xf32>
    %817 = vector.broadcast %cst_271 : f32 to vector<1x256xf32>
    %818 = arith.minimumf %817, %816 : vector<1x256xf32>
    %819 = math.floor %818 : vector<1x256xf32>
    %820 = arith.subf %818, %819 : vector<1x256xf32>
    %cst_272 = arith.constant 1.000000e+00 : f32
    %821 = vector.broadcast %cst_272 : f32 to vector<1x256xf32>
    %822 = arith.addf %819, %821 : vector<1x256xf32>
    %cst_273 = arith.constant 1.500000e+01 : f32
    %823 = vector.broadcast %cst_273 : f32 to vector<1x256xf32>
    %824 = arith.minimumf %822, %823 : vector<1x256xf32>
    %cst_274 = arith.constant 0.000000e+00 : f32
    %825 = vector.broadcast %cst_274 : f32 to vector<4x256xf32>
    %cst_275 = arith.constant -3.000000e+00 : f32
    %826 = vector.broadcast %cst_275 : f32 to vector<1x256xf32>
    %827 = arith.addf %9, %826 : vector<1x256xf32>
    %828 = arith.cmpf oeq, %819, %827 : vector<1x256xf32>
    %cst_276 = arith.constant 1.000000e+00 : f32
    %829 = vector.broadcast %cst_276 : f32 to vector<1x256xf32>
    %830 = arith.subf %829, %820 : vector<1x256xf32>
    %cst_277 = arith.constant 0.000000e+00 : f32
    %831 = vector.broadcast %cst_277 : f32 to vector<1x256xf32>
    %832 = arith.select %828, %830, %831 : vector<1x256xi1>, vector<1x256xf32>
    %833 = arith.cmpf oeq, %824, %827 : vector<1x256xf32>
    %cst_278 = arith.constant 0.000000e+00 : f32
    %834 = vector.broadcast %cst_278 : f32 to vector<1x256xf32>
    %835 = arith.select %833, %820, %834 : vector<1x256xi1>, vector<1x256xf32>
    %836 = arith.addf %832, %835 : vector<1x256xf32>
    %c48_i32_279 = arith.constant 48 : i32
    %837 = tpu.dynamic_rotate %151 by %c48_i32_279 dim 1 : vector<4x256xf32>, i32 -> vector<4x256xf32>
    %838 = vector.broadcast %836 : vector<1x256xf32> to vector<4x256xf32>
    %839 = arith.mulf %838, %837 : vector<4x256xf32>
    %840 = arith.addf %825, %839 : vector<4x256xf32>
    %cst_280 = arith.constant -2.000000e+00 : f32
    %841 = vector.broadcast %cst_280 : f32 to vector<1x256xf32>
    %842 = arith.addf %9, %841 : vector<1x256xf32>
    %843 = arith.cmpf oeq, %819, %842 : vector<1x256xf32>
    %cst_281 = arith.constant 1.000000e+00 : f32
    %844 = vector.broadcast %cst_281 : f32 to vector<1x256xf32>
    %845 = arith.subf %844, %820 : vector<1x256xf32>
    %cst_282 = arith.constant 0.000000e+00 : f32
    %846 = vector.broadcast %cst_282 : f32 to vector<1x256xf32>
    %847 = arith.select %843, %845, %846 : vector<1x256xi1>, vector<1x256xf32>
    %848 = arith.cmpf oeq, %824, %842 : vector<1x256xf32>
    %cst_283 = arith.constant 0.000000e+00 : f32
    %849 = vector.broadcast %cst_283 : f32 to vector<1x256xf32>
    %850 = arith.select %848, %820, %849 : vector<1x256xi1>, vector<1x256xf32>
    %851 = arith.addf %847, %850 : vector<1x256xf32>
    %c32_i32_284 = arith.constant 32 : i32
    %852 = tpu.dynamic_rotate %151 by %c32_i32_284 dim 1 : vector<4x256xf32>, i32 -> vector<4x256xf32>
    %853 = vector.broadcast %851 : vector<1x256xf32> to vector<4x256xf32>
    %854 = arith.mulf %853, %852 : vector<4x256xf32>
    %855 = arith.addf %840, %854 : vector<4x256xf32>
    %cst_285 = arith.constant -1.000000e+00 : f32
    %856 = vector.broadcast %cst_285 : f32 to vector<1x256xf32>
    %857 = arith.addf %9, %856 : vector<1x256xf32>
    %858 = arith.cmpf oeq, %819, %857 : vector<1x256xf32>
    %cst_286 = arith.constant 1.000000e+00 : f32
    %859 = vector.broadcast %cst_286 : f32 to vector<1x256xf32>
    %860 = arith.subf %859, %820 : vector<1x256xf32>
    %cst_287 = arith.constant 0.000000e+00 : f32
    %861 = vector.broadcast %cst_287 : f32 to vector<1x256xf32>
    %862 = arith.select %858, %860, %861 : vector<1x256xi1>, vector<1x256xf32>
    %863 = arith.cmpf oeq, %824, %857 : vector<1x256xf32>
    %cst_288 = arith.constant 0.000000e+00 : f32
    %864 = vector.broadcast %cst_288 : f32 to vector<1x256xf32>
    %865 = arith.select %863, %820, %864 : vector<1x256xi1>, vector<1x256xf32>
    %866 = arith.addf %862, %865 : vector<1x256xf32>
    %c16_i32_289 = arith.constant 16 : i32
    %867 = tpu.dynamic_rotate %151 by %c16_i32_289 dim 1 : vector<4x256xf32>, i32 -> vector<4x256xf32>
    %868 = vector.broadcast %866 : vector<1x256xf32> to vector<4x256xf32>
    %869 = arith.mulf %868, %867 : vector<4x256xf32>
    %870 = arith.addf %855, %869 : vector<4x256xf32>
    %cst_290 = arith.constant 0.000000e+00 : f32
    %871 = vector.broadcast %cst_290 : f32 to vector<1x256xf32>
    %872 = arith.addf %9, %871 : vector<1x256xf32>
    %873 = arith.cmpf oeq, %819, %872 : vector<1x256xf32>
    %cst_291 = arith.constant 1.000000e+00 : f32
    %874 = vector.broadcast %cst_291 : f32 to vector<1x256xf32>
    %875 = arith.subf %874, %820 : vector<1x256xf32>
    %cst_292 = arith.constant 0.000000e+00 : f32
    %876 = vector.broadcast %cst_292 : f32 to vector<1x256xf32>
    %877 = arith.select %873, %875, %876 : vector<1x256xi1>, vector<1x256xf32>
    %878 = arith.cmpf oeq, %824, %872 : vector<1x256xf32>
    %cst_293 = arith.constant 0.000000e+00 : f32
    %879 = vector.broadcast %cst_293 : f32 to vector<1x256xf32>
    %880 = arith.select %878, %820, %879 : vector<1x256xi1>, vector<1x256xf32>
    %881 = arith.addf %877, %880 : vector<1x256xf32>
    %882 = vector.broadcast %881 : vector<1x256xf32> to vector<4x256xf32>
    %883 = arith.mulf %882, %151 : vector<4x256xf32>
    %884 = arith.addf %870, %883 : vector<4x256xf32>
    %cst_294 = arith.constant 1.000000e+00 : f32
    %885 = vector.broadcast %cst_294 : f32 to vector<1x256xf32>
    %886 = arith.addf %9, %885 : vector<1x256xf32>
    %887 = arith.cmpf oeq, %819, %886 : vector<1x256xf32>
    %cst_295 = arith.constant 1.000000e+00 : f32
    %888 = vector.broadcast %cst_295 : f32 to vector<1x256xf32>
    %889 = arith.subf %888, %820 : vector<1x256xf32>
    %cst_296 = arith.constant 0.000000e+00 : f32
    %890 = vector.broadcast %cst_296 : f32 to vector<1x256xf32>
    %891 = arith.select %887, %889, %890 : vector<1x256xi1>, vector<1x256xf32>
    %892 = arith.cmpf oeq, %824, %886 : vector<1x256xf32>
    %cst_297 = arith.constant 0.000000e+00 : f32
    %893 = vector.broadcast %cst_297 : f32 to vector<1x256xf32>
    %894 = arith.select %892, %820, %893 : vector<1x256xi1>, vector<1x256xf32>
    %895 = arith.addf %891, %894 : vector<1x256xf32>
    %c240_i32_298 = arith.constant 240 : i32
    %896 = tpu.dynamic_rotate %151 by %c240_i32_298 dim 1 : vector<4x256xf32>, i32 -> vector<4x256xf32>
    %897 = vector.broadcast %895 : vector<1x256xf32> to vector<4x256xf32>
    %898 = arith.mulf %897, %896 : vector<4x256xf32>
    %899 = arith.addf %884, %898 : vector<4x256xf32>
    %cst_299 = arith.constant 2.000000e+00 : f32
    %900 = vector.broadcast %cst_299 : f32 to vector<1x256xf32>
    %901 = arith.addf %9, %900 : vector<1x256xf32>
    %902 = arith.cmpf oeq, %819, %901 : vector<1x256xf32>
    %cst_300 = arith.constant 1.000000e+00 : f32
    %903 = vector.broadcast %cst_300 : f32 to vector<1x256xf32>
    %904 = arith.subf %903, %820 : vector<1x256xf32>
    %cst_301 = arith.constant 0.000000e+00 : f32
    %905 = vector.broadcast %cst_301 : f32 to vector<1x256xf32>
    %906 = arith.select %902, %904, %905 : vector<1x256xi1>, vector<1x256xf32>
    %907 = arith.cmpf oeq, %824, %901 : vector<1x256xf32>
    %cst_302 = arith.constant 0.000000e+00 : f32
    %908 = vector.broadcast %cst_302 : f32 to vector<1x256xf32>
    %909 = arith.select %907, %820, %908 : vector<1x256xi1>, vector<1x256xf32>
    %910 = arith.addf %906, %909 : vector<1x256xf32>
    %c224_i32_303 = arith.constant 224 : i32
    %911 = tpu.dynamic_rotate %151 by %c224_i32_303 dim 1 : vector<4x256xf32>, i32 -> vector<4x256xf32>
    %912 = vector.broadcast %910 : vector<1x256xf32> to vector<4x256xf32>
    %913 = arith.mulf %912, %911 : vector<4x256xf32>
    %914 = arith.addf %899, %913 : vector<4x256xf32>
    %cst_304 = arith.constant 3.000000e+00 : f32
    %915 = vector.broadcast %cst_304 : f32 to vector<1x256xf32>
    %916 = arith.addf %9, %915 : vector<1x256xf32>
    %917 = arith.cmpf oeq, %819, %916 : vector<1x256xf32>
    %cst_305 = arith.constant 1.000000e+00 : f32
    %918 = vector.broadcast %cst_305 : f32 to vector<1x256xf32>
    %919 = arith.subf %918, %820 : vector<1x256xf32>
    %cst_306 = arith.constant 0.000000e+00 : f32
    %920 = vector.broadcast %cst_306 : f32 to vector<1x256xf32>
    %921 = arith.select %917, %919, %920 : vector<1x256xi1>, vector<1x256xf32>
    %922 = arith.cmpf oeq, %824, %916 : vector<1x256xf32>
    %cst_307 = arith.constant 0.000000e+00 : f32
    %923 = vector.broadcast %cst_307 : f32 to vector<1x256xf32>
    %924 = arith.select %922, %820, %923 : vector<1x256xi1>, vector<1x256xf32>
    %925 = arith.addf %921, %924 : vector<1x256xf32>
    %c208_i32_308 = arith.constant 208 : i32
    %926 = tpu.dynamic_rotate %151 by %c208_i32_308 dim 1 : vector<4x256xf32>, i32 -> vector<4x256xf32>
    %927 = vector.broadcast %925 : vector<1x256xf32> to vector<4x256xf32>
    %928 = arith.mulf %927, %926 : vector<4x256xf32>
    %929 = arith.addf %914, %928 : vector<4x256xf32>
    %cst_309 = arith.constant 1.000000e+00 : f32
    %930 = vector.broadcast %cst_309 : f32 to vector<1x256xf32>
    %931 = arith.mulf %930, %121 : vector<1x256xf32>
    %932 = arith.addf %9, %931 : vector<1x256xf32>
    %cst_310 = arith.constant 0.000000e+00 : f32
    %cst_311 = arith.constant 1.500000e+01 : f32
    %933 = vector.broadcast %cst_310 : f32 to vector<1x256xf32>
    %934 = arith.maximumf %933, %932 : vector<1x256xf32>
    %935 = vector.broadcast %cst_311 : f32 to vector<1x256xf32>
    %936 = arith.minimumf %935, %934 : vector<1x256xf32>
    %937 = math.floor %936 : vector<1x256xf32>
    %938 = arith.subf %936, %937 : vector<1x256xf32>
    %cst_312 = arith.constant 1.000000e+00 : f32
    %939 = vector.broadcast %cst_312 : f32 to vector<1x256xf32>
    %940 = arith.addf %937, %939 : vector<1x256xf32>
    %cst_313 = arith.constant 1.500000e+01 : f32
    %941 = vector.broadcast %cst_313 : f32 to vector<1x256xf32>
    %942 = arith.minimumf %940, %941 : vector<1x256xf32>
    %cst_314 = arith.constant 0.000000e+00 : f32
    %943 = vector.broadcast %cst_314 : f32 to vector<4x256xf32>
    %cst_315 = arith.constant -4.000000e+00 : f32
    %944 = vector.broadcast %cst_315 : f32 to vector<1x256xf32>
    %945 = arith.addf %9, %944 : vector<1x256xf32>
    %946 = arith.cmpf oeq, %937, %945 : vector<1x256xf32>
    %cst_316 = arith.constant 1.000000e+00 : f32
    %947 = vector.broadcast %cst_316 : f32 to vector<1x256xf32>
    %948 = arith.subf %947, %938 : vector<1x256xf32>
    %cst_317 = arith.constant 0.000000e+00 : f32
    %949 = vector.broadcast %cst_317 : f32 to vector<1x256xf32>
    %950 = arith.select %946, %948, %949 : vector<1x256xi1>, vector<1x256xf32>
    %951 = arith.cmpf oeq, %942, %945 : vector<1x256xf32>
    %cst_318 = arith.constant 0.000000e+00 : f32
    %952 = vector.broadcast %cst_318 : f32 to vector<1x256xf32>
    %953 = arith.select %951, %938, %952 : vector<1x256xi1>, vector<1x256xf32>
    %954 = arith.addf %950, %953 : vector<1x256xf32>
    %c64_i32_319 = arith.constant 64 : i32
    %955 = tpu.dynamic_rotate %167 by %c64_i32_319 dim 1 : vector<4x256xf32>, i32 -> vector<4x256xf32>
    %956 = vector.broadcast %954 : vector<1x256xf32> to vector<4x256xf32>
    %957 = arith.mulf %956, %955 : vector<4x256xf32>
    %958 = arith.addf %943, %957 : vector<4x256xf32>
    %cst_320 = arith.constant -3.000000e+00 : f32
    %959 = vector.broadcast %cst_320 : f32 to vector<1x256xf32>
    %960 = arith.addf %9, %959 : vector<1x256xf32>
    %961 = arith.cmpf oeq, %937, %960 : vector<1x256xf32>
    %cst_321 = arith.constant 1.000000e+00 : f32
    %962 = vector.broadcast %cst_321 : f32 to vector<1x256xf32>
    %963 = arith.subf %962, %938 : vector<1x256xf32>
    %cst_322 = arith.constant 0.000000e+00 : f32
    %964 = vector.broadcast %cst_322 : f32 to vector<1x256xf32>
    %965 = arith.select %961, %963, %964 : vector<1x256xi1>, vector<1x256xf32>
    %966 = arith.cmpf oeq, %942, %960 : vector<1x256xf32>
    %cst_323 = arith.constant 0.000000e+00 : f32
    %967 = vector.broadcast %cst_323 : f32 to vector<1x256xf32>
    %968 = arith.select %966, %938, %967 : vector<1x256xi1>, vector<1x256xf32>
    %969 = arith.addf %965, %968 : vector<1x256xf32>
    %c48_i32_324 = arith.constant 48 : i32
    %970 = tpu.dynamic_rotate %167 by %c48_i32_324 dim 1 : vector<4x256xf32>, i32 -> vector<4x256xf32>
    %971 = vector.broadcast %969 : vector<1x256xf32> to vector<4x256xf32>
    %972 = arith.mulf %971, %970 : vector<4x256xf32>
    %973 = arith.addf %958, %972 : vector<4x256xf32>
    %cst_325 = arith.constant -2.000000e+00 : f32
    %974 = vector.broadcast %cst_325 : f32 to vector<1x256xf32>
    %975 = arith.addf %9, %974 : vector<1x256xf32>
    %976 = arith.cmpf oeq, %937, %975 : vector<1x256xf32>
    %cst_326 = arith.constant 1.000000e+00 : f32
    %977 = vector.broadcast %cst_326 : f32 to vector<1x256xf32>
    %978 = arith.subf %977, %938 : vector<1x256xf32>
    %cst_327 = arith.constant 0.000000e+00 : f32
    %979 = vector.broadcast %cst_327 : f32 to vector<1x256xf32>
    %980 = arith.select %976, %978, %979 : vector<1x256xi1>, vector<1x256xf32>
    %981 = arith.cmpf oeq, %942, %975 : vector<1x256xf32>
    %cst_328 = arith.constant 0.000000e+00 : f32
    %982 = vector.broadcast %cst_328 : f32 to vector<1x256xf32>
    %983 = arith.select %981, %938, %982 : vector<1x256xi1>, vector<1x256xf32>
    %984 = arith.addf %980, %983 : vector<1x256xf32>
    %c32_i32_329 = arith.constant 32 : i32
    %985 = tpu.dynamic_rotate %167 by %c32_i32_329 dim 1 : vector<4x256xf32>, i32 -> vector<4x256xf32>
    %986 = vector.broadcast %984 : vector<1x256xf32> to vector<4x256xf32>
    %987 = arith.mulf %986, %985 : vector<4x256xf32>
    %988 = arith.addf %973, %987 : vector<4x256xf32>
    %cst_330 = arith.constant -1.000000e+00 : f32
    %989 = vector.broadcast %cst_330 : f32 to vector<1x256xf32>
    %990 = arith.addf %9, %989 : vector<1x256xf32>
    %991 = arith.cmpf oeq, %937, %990 : vector<1x256xf32>
    %cst_331 = arith.constant 1.000000e+00 : f32
    %992 = vector.broadcast %cst_331 : f32 to vector<1x256xf32>
    %993 = arith.subf %992, %938 : vector<1x256xf32>
    %cst_332 = arith.constant 0.000000e+00 : f32
    %994 = vector.broadcast %cst_332 : f32 to vector<1x256xf32>
    %995 = arith.select %991, %993, %994 : vector<1x256xi1>, vector<1x256xf32>
    %996 = arith.cmpf oeq, %942, %990 : vector<1x256xf32>
    %cst_333 = arith.constant 0.000000e+00 : f32
    %997 = vector.broadcast %cst_333 : f32 to vector<1x256xf32>
    %998 = arith.select %996, %938, %997 : vector<1x256xi1>, vector<1x256xf32>
    %999 = arith.addf %995, %998 : vector<1x256xf32>
    %c16_i32_334 = arith.constant 16 : i32
    %1000 = tpu.dynamic_rotate %167 by %c16_i32_334 dim 1 : vector<4x256xf32>, i32 -> vector<4x256xf32>
    %1001 = vector.broadcast %999 : vector<1x256xf32> to vector<4x256xf32>
    %1002 = arith.mulf %1001, %1000 : vector<4x256xf32>
    %1003 = arith.addf %988, %1002 : vector<4x256xf32>
    %cst_335 = arith.constant 0.000000e+00 : f32
    %1004 = vector.broadcast %cst_335 : f32 to vector<1x256xf32>
    %1005 = arith.addf %9, %1004 : vector<1x256xf32>
    %1006 = arith.cmpf oeq, %937, %1005 : vector<1x256xf32>
    %cst_336 = arith.constant 1.000000e+00 : f32
    %1007 = vector.broadcast %cst_336 : f32 to vector<1x256xf32>
    %1008 = arith.subf %1007, %938 : vector<1x256xf32>
    %cst_337 = arith.constant 0.000000e+00 : f32
    %1009 = vector.broadcast %cst_337 : f32 to vector<1x256xf32>
    %1010 = arith.select %1006, %1008, %1009 : vector<1x256xi1>, vector<1x256xf32>
    %1011 = arith.cmpf oeq, %942, %1005 : vector<1x256xf32>
    %cst_338 = arith.constant 0.000000e+00 : f32
    %1012 = vector.broadcast %cst_338 : f32 to vector<1x256xf32>
    %1013 = arith.select %1011, %938, %1012 : vector<1x256xi1>, vector<1x256xf32>
    %1014 = arith.addf %1010, %1013 : vector<1x256xf32>
    %1015 = vector.broadcast %1014 : vector<1x256xf32> to vector<4x256xf32>
    %1016 = arith.mulf %1015, %167 : vector<4x256xf32>
    %1017 = arith.addf %1003, %1016 : vector<4x256xf32>
    %cst_339 = arith.constant 1.000000e+00 : f32
    %1018 = vector.broadcast %cst_339 : f32 to vector<1x256xf32>
    %1019 = arith.addf %9, %1018 : vector<1x256xf32>
    %1020 = arith.cmpf oeq, %937, %1019 : vector<1x256xf32>
    %cst_340 = arith.constant 1.000000e+00 : f32
    %1021 = vector.broadcast %cst_340 : f32 to vector<1x256xf32>
    %1022 = arith.subf %1021, %938 : vector<1x256xf32>
    %cst_341 = arith.constant 0.000000e+00 : f32
    %1023 = vector.broadcast %cst_341 : f32 to vector<1x256xf32>
    %1024 = arith.select %1020, %1022, %1023 : vector<1x256xi1>, vector<1x256xf32>
    %1025 = arith.cmpf oeq, %942, %1019 : vector<1x256xf32>
    %cst_342 = arith.constant 0.000000e+00 : f32
    %1026 = vector.broadcast %cst_342 : f32 to vector<1x256xf32>
    %1027 = arith.select %1025, %938, %1026 : vector<1x256xi1>, vector<1x256xf32>
    %1028 = arith.addf %1024, %1027 : vector<1x256xf32>
    %c240_i32_343 = arith.constant 240 : i32
    %1029 = tpu.dynamic_rotate %167 by %c240_i32_343 dim 1 : vector<4x256xf32>, i32 -> vector<4x256xf32>
    %1030 = vector.broadcast %1028 : vector<1x256xf32> to vector<4x256xf32>
    %1031 = arith.mulf %1030, %1029 : vector<4x256xf32>
    %1032 = arith.addf %1017, %1031 : vector<4x256xf32>
    %cst_344 = arith.constant 2.000000e+00 : f32
    %1033 = vector.broadcast %cst_344 : f32 to vector<1x256xf32>
    %1034 = arith.addf %9, %1033 : vector<1x256xf32>
    %1035 = arith.cmpf oeq, %937, %1034 : vector<1x256xf32>
    %cst_345 = arith.constant 1.000000e+00 : f32
    %1036 = vector.broadcast %cst_345 : f32 to vector<1x256xf32>
    %1037 = arith.subf %1036, %938 : vector<1x256xf32>
    %cst_346 = arith.constant 0.000000e+00 : f32
    %1038 = vector.broadcast %cst_346 : f32 to vector<1x256xf32>
    %1039 = arith.select %1035, %1037, %1038 : vector<1x256xi1>, vector<1x256xf32>
    %1040 = arith.cmpf oeq, %942, %1034 : vector<1x256xf32>
    %cst_347 = arith.constant 0.000000e+00 : f32
    %1041 = vector.broadcast %cst_347 : f32 to vector<1x256xf32>
    %1042 = arith.select %1040, %938, %1041 : vector<1x256xi1>, vector<1x256xf32>
    %1043 = arith.addf %1039, %1042 : vector<1x256xf32>
    %c224_i32_348 = arith.constant 224 : i32
    %1044 = tpu.dynamic_rotate %167 by %c224_i32_348 dim 1 : vector<4x256xf32>, i32 -> vector<4x256xf32>
    %1045 = vector.broadcast %1043 : vector<1x256xf32> to vector<4x256xf32>
    %1046 = arith.mulf %1045, %1044 : vector<4x256xf32>
    %1047 = arith.addf %1032, %1046 : vector<4x256xf32>
    %cst_349 = arith.constant 3.000000e+00 : f32
    %1048 = vector.broadcast %cst_349 : f32 to vector<1x256xf32>
    %1049 = arith.addf %9, %1048 : vector<1x256xf32>
    %1050 = arith.cmpf oeq, %937, %1049 : vector<1x256xf32>
    %cst_350 = arith.constant 1.000000e+00 : f32
    %1051 = vector.broadcast %cst_350 : f32 to vector<1x256xf32>
    %1052 = arith.subf %1051, %938 : vector<1x256xf32>
    %cst_351 = arith.constant 0.000000e+00 : f32
    %1053 = vector.broadcast %cst_351 : f32 to vector<1x256xf32>
    %1054 = arith.select %1050, %1052, %1053 : vector<1x256xi1>, vector<1x256xf32>
    %1055 = arith.cmpf oeq, %942, %1049 : vector<1x256xf32>
    %cst_352 = arith.constant 0.000000e+00 : f32
    %1056 = vector.broadcast %cst_352 : f32 to vector<1x256xf32>
    %1057 = arith.select %1055, %938, %1056 : vector<1x256xi1>, vector<1x256xf32>
    %1058 = arith.addf %1054, %1057 : vector<1x256xf32>
    %c208_i32_353 = arith.constant 208 : i32
    %1059 = tpu.dynamic_rotate %167 by %c208_i32_353 dim 1 : vector<4x256xf32>, i32 -> vector<4x256xf32>
    %1060 = vector.broadcast %1058 : vector<1x256xf32> to vector<4x256xf32>
    %1061 = arith.mulf %1060, %1059 : vector<4x256xf32>
    %1062 = arith.addf %1047, %1061 : vector<4x256xf32>
    %cst_354 = arith.constant 4.000000e+00 : f32
    %1063 = vector.broadcast %cst_354 : f32 to vector<1x256xf32>
    %1064 = arith.addf %9, %1063 : vector<1x256xf32>
    %1065 = arith.cmpf oeq, %937, %1064 : vector<1x256xf32>
    %cst_355 = arith.constant 1.000000e+00 : f32
    %1066 = vector.broadcast %cst_355 : f32 to vector<1x256xf32>
    %1067 = arith.subf %1066, %938 : vector<1x256xf32>
    %cst_356 = arith.constant 0.000000e+00 : f32
    %1068 = vector.broadcast %cst_356 : f32 to vector<1x256xf32>
    %1069 = arith.select %1065, %1067, %1068 : vector<1x256xi1>, vector<1x256xf32>
    %1070 = arith.cmpf oeq, %942, %1064 : vector<1x256xf32>
    %cst_357 = arith.constant 0.000000e+00 : f32
    %1071 = vector.broadcast %cst_357 : f32 to vector<1x256xf32>
    %1072 = arith.select %1070, %938, %1071 : vector<1x256xi1>, vector<1x256xf32>
    %1073 = arith.addf %1069, %1072 : vector<1x256xf32>
    %c192_i32_358 = arith.constant 192 : i32
    %1074 = tpu.dynamic_rotate %167 by %c192_i32_358 dim 1 : vector<4x256xf32>, i32 -> vector<4x256xf32>
    %1075 = vector.broadcast %1073 : vector<1x256xf32> to vector<4x256xf32>
    %1076 = arith.mulf %1075, %1074 : vector<4x256xf32>
    %1077 = arith.addf %1062, %1076 : vector<4x256xf32>
    %cst_359 = arith.constant 1.000000e+00 : f32
    %1078 = vector.broadcast %cst_359 : f32 to vector<1x256xf32>
    %1079 = arith.mulf %1078, %125 : vector<1x256xf32>
    %1080 = arith.addf %9, %1079 : vector<1x256xf32>
    %cst_360 = arith.constant 0.000000e+00 : f32
    %cst_361 = arith.constant 1.500000e+01 : f32
    %1081 = vector.broadcast %cst_360 : f32 to vector<1x256xf32>
    %1082 = arith.maximumf %1081, %1080 : vector<1x256xf32>
    %1083 = vector.broadcast %cst_361 : f32 to vector<1x256xf32>
    %1084 = arith.minimumf %1083, %1082 : vector<1x256xf32>
    %1085 = math.floor %1084 : vector<1x256xf32>
    %1086 = arith.subf %1084, %1085 : vector<1x256xf32>
    %cst_362 = arith.constant 1.000000e+00 : f32
    %1087 = vector.broadcast %cst_362 : f32 to vector<1x256xf32>
    %1088 = arith.addf %1085, %1087 : vector<1x256xf32>
    %cst_363 = arith.constant 1.500000e+01 : f32
    %1089 = vector.broadcast %cst_363 : f32 to vector<1x256xf32>
    %1090 = arith.minimumf %1088, %1089 : vector<1x256xf32>
    %cst_364 = arith.constant 0.000000e+00 : f32
    %1091 = vector.broadcast %cst_364 : f32 to vector<4x256xf32>
    %cst_365 = arith.constant -5.000000e+00 : f32
    %1092 = vector.broadcast %cst_365 : f32 to vector<1x256xf32>
    %1093 = arith.addf %9, %1092 : vector<1x256xf32>
    %1094 = arith.cmpf oeq, %1085, %1093 : vector<1x256xf32>
    %cst_366 = arith.constant 1.000000e+00 : f32
    %1095 = vector.broadcast %cst_366 : f32 to vector<1x256xf32>
    %1096 = arith.subf %1095, %1086 : vector<1x256xf32>
    %cst_367 = arith.constant 0.000000e+00 : f32
    %1097 = vector.broadcast %cst_367 : f32 to vector<1x256xf32>
    %1098 = arith.select %1094, %1096, %1097 : vector<1x256xi1>, vector<1x256xf32>
    %1099 = arith.cmpf oeq, %1090, %1093 : vector<1x256xf32>
    %cst_368 = arith.constant 0.000000e+00 : f32
    %1100 = vector.broadcast %cst_368 : f32 to vector<1x256xf32>
    %1101 = arith.select %1099, %1086, %1100 : vector<1x256xi1>, vector<1x256xf32>
    %1102 = arith.addf %1098, %1101 : vector<1x256xf32>
    %c80_i32_369 = arith.constant 80 : i32
    %1103 = tpu.dynamic_rotate %183 by %c80_i32_369 dim 1 : vector<4x256xf32>, i32 -> vector<4x256xf32>
    %1104 = vector.broadcast %1102 : vector<1x256xf32> to vector<4x256xf32>
    %1105 = arith.mulf %1104, %1103 : vector<4x256xf32>
    %1106 = arith.addf %1091, %1105 : vector<4x256xf32>
    %cst_370 = arith.constant -4.000000e+00 : f32
    %1107 = vector.broadcast %cst_370 : f32 to vector<1x256xf32>
    %1108 = arith.addf %9, %1107 : vector<1x256xf32>
    %1109 = arith.cmpf oeq, %1085, %1108 : vector<1x256xf32>
    %cst_371 = arith.constant 1.000000e+00 : f32
    %1110 = vector.broadcast %cst_371 : f32 to vector<1x256xf32>
    %1111 = arith.subf %1110, %1086 : vector<1x256xf32>
    %cst_372 = arith.constant 0.000000e+00 : f32
    %1112 = vector.broadcast %cst_372 : f32 to vector<1x256xf32>
    %1113 = arith.select %1109, %1111, %1112 : vector<1x256xi1>, vector<1x256xf32>
    %1114 = arith.cmpf oeq, %1090, %1108 : vector<1x256xf32>
    %cst_373 = arith.constant 0.000000e+00 : f32
    %1115 = vector.broadcast %cst_373 : f32 to vector<1x256xf32>
    %1116 = arith.select %1114, %1086, %1115 : vector<1x256xi1>, vector<1x256xf32>
    %1117 = arith.addf %1113, %1116 : vector<1x256xf32>
    %c64_i32_374 = arith.constant 64 : i32
    %1118 = tpu.dynamic_rotate %183 by %c64_i32_374 dim 1 : vector<4x256xf32>, i32 -> vector<4x256xf32>
    %1119 = vector.broadcast %1117 : vector<1x256xf32> to vector<4x256xf32>
    %1120 = arith.mulf %1119, %1118 : vector<4x256xf32>
    %1121 = arith.addf %1106, %1120 : vector<4x256xf32>
    %cst_375 = arith.constant -3.000000e+00 : f32
    %1122 = vector.broadcast %cst_375 : f32 to vector<1x256xf32>
    %1123 = arith.addf %9, %1122 : vector<1x256xf32>
    %1124 = arith.cmpf oeq, %1085, %1123 : vector<1x256xf32>
    %cst_376 = arith.constant 1.000000e+00 : f32
    %1125 = vector.broadcast %cst_376 : f32 to vector<1x256xf32>
    %1126 = arith.subf %1125, %1086 : vector<1x256xf32>
    %cst_377 = arith.constant 0.000000e+00 : f32
    %1127 = vector.broadcast %cst_377 : f32 to vector<1x256xf32>
    %1128 = arith.select %1124, %1126, %1127 : vector<1x256xi1>, vector<1x256xf32>
    %1129 = arith.cmpf oeq, %1090, %1123 : vector<1x256xf32>
    %cst_378 = arith.constant 0.000000e+00 : f32
    %1130 = vector.broadcast %cst_378 : f32 to vector<1x256xf32>
    %1131 = arith.select %1129, %1086, %1130 : vector<1x256xi1>, vector<1x256xf32>
    %1132 = arith.addf %1128, %1131 : vector<1x256xf32>
    %c48_i32_379 = arith.constant 48 : i32
    %1133 = tpu.dynamic_rotate %183 by %c48_i32_379 dim 1 : vector<4x256xf32>, i32 -> vector<4x256xf32>
    %1134 = vector.broadcast %1132 : vector<1x256xf32> to vector<4x256xf32>
    %1135 = arith.mulf %1134, %1133 : vector<4x256xf32>
    %1136 = arith.addf %1121, %1135 : vector<4x256xf32>
    %cst_380 = arith.constant -2.000000e+00 : f32
    %1137 = vector.broadcast %cst_380 : f32 to vector<1x256xf32>
    %1138 = arith.addf %9, %1137 : vector<1x256xf32>
    %1139 = arith.cmpf oeq, %1085, %1138 : vector<1x256xf32>
    %cst_381 = arith.constant 1.000000e+00 : f32
    %1140 = vector.broadcast %cst_381 : f32 to vector<1x256xf32>
    %1141 = arith.subf %1140, %1086 : vector<1x256xf32>
    %cst_382 = arith.constant 0.000000e+00 : f32
    %1142 = vector.broadcast %cst_382 : f32 to vector<1x256xf32>
    %1143 = arith.select %1139, %1141, %1142 : vector<1x256xi1>, vector<1x256xf32>
    %1144 = arith.cmpf oeq, %1090, %1138 : vector<1x256xf32>
    %cst_383 = arith.constant 0.000000e+00 : f32
    %1145 = vector.broadcast %cst_383 : f32 to vector<1x256xf32>
    %1146 = arith.select %1144, %1086, %1145 : vector<1x256xi1>, vector<1x256xf32>
    %1147 = arith.addf %1143, %1146 : vector<1x256xf32>
    %c32_i32_384 = arith.constant 32 : i32
    %1148 = tpu.dynamic_rotate %183 by %c32_i32_384 dim 1 : vector<4x256xf32>, i32 -> vector<4x256xf32>
    %1149 = vector.broadcast %1147 : vector<1x256xf32> to vector<4x256xf32>
    %1150 = arith.mulf %1149, %1148 : vector<4x256xf32>
    %1151 = arith.addf %1136, %1150 : vector<4x256xf32>
    %cst_385 = arith.constant -1.000000e+00 : f32
    %1152 = vector.broadcast %cst_385 : f32 to vector<1x256xf32>
    %1153 = arith.addf %9, %1152 : vector<1x256xf32>
    %1154 = arith.cmpf oeq, %1085, %1153 : vector<1x256xf32>
    %cst_386 = arith.constant 1.000000e+00 : f32
    %1155 = vector.broadcast %cst_386 : f32 to vector<1x256xf32>
    %1156 = arith.subf %1155, %1086 : vector<1x256xf32>
    %cst_387 = arith.constant 0.000000e+00 : f32
    %1157 = vector.broadcast %cst_387 : f32 to vector<1x256xf32>
    %1158 = arith.select %1154, %1156, %1157 : vector<1x256xi1>, vector<1x256xf32>
    %1159 = arith.cmpf oeq, %1090, %1153 : vector<1x256xf32>
    %cst_388 = arith.constant 0.000000e+00 : f32
    %1160 = vector.broadcast %cst_388 : f32 to vector<1x256xf32>
    %1161 = arith.select %1159, %1086, %1160 : vector<1x256xi1>, vector<1x256xf32>
    %1162 = arith.addf %1158, %1161 : vector<1x256xf32>
    %c16_i32_389 = arith.constant 16 : i32
    %1163 = tpu.dynamic_rotate %183 by %c16_i32_389 dim 1 : vector<4x256xf32>, i32 -> vector<4x256xf32>
    %1164 = vector.broadcast %1162 : vector<1x256xf32> to vector<4x256xf32>
    %1165 = arith.mulf %1164, %1163 : vector<4x256xf32>
    %1166 = arith.addf %1151, %1165 : vector<4x256xf32>
    %cst_390 = arith.constant 0.000000e+00 : f32
    %1167 = vector.broadcast %cst_390 : f32 to vector<1x256xf32>
    %1168 = arith.addf %9, %1167 : vector<1x256xf32>
    %1169 = arith.cmpf oeq, %1085, %1168 : vector<1x256xf32>
    %cst_391 = arith.constant 1.000000e+00 : f32
    %1170 = vector.broadcast %cst_391 : f32 to vector<1x256xf32>
    %1171 = arith.subf %1170, %1086 : vector<1x256xf32>
    %cst_392 = arith.constant 0.000000e+00 : f32
    %1172 = vector.broadcast %cst_392 : f32 to vector<1x256xf32>
    %1173 = arith.select %1169, %1171, %1172 : vector<1x256xi1>, vector<1x256xf32>
    %1174 = arith.cmpf oeq, %1090, %1168 : vector<1x256xf32>
    %cst_393 = arith.constant 0.000000e+00 : f32
    %1175 = vector.broadcast %cst_393 : f32 to vector<1x256xf32>
    %1176 = arith.select %1174, %1086, %1175 : vector<1x256xi1>, vector<1x256xf32>
    %1177 = arith.addf %1173, %1176 : vector<1x256xf32>
    %1178 = vector.broadcast %1177 : vector<1x256xf32> to vector<4x256xf32>
    %1179 = arith.mulf %1178, %183 : vector<4x256xf32>
    %1180 = arith.addf %1166, %1179 : vector<4x256xf32>
    %cst_394 = arith.constant 1.000000e+00 : f32
    %1181 = vector.broadcast %cst_394 : f32 to vector<1x256xf32>
    %1182 = arith.addf %9, %1181 : vector<1x256xf32>
    %1183 = arith.cmpf oeq, %1085, %1182 : vector<1x256xf32>
    %cst_395 = arith.constant 1.000000e+00 : f32
    %1184 = vector.broadcast %cst_395 : f32 to vector<1x256xf32>
    %1185 = arith.subf %1184, %1086 : vector<1x256xf32>
    %cst_396 = arith.constant 0.000000e+00 : f32
    %1186 = vector.broadcast %cst_396 : f32 to vector<1x256xf32>
    %1187 = arith.select %1183, %1185, %1186 : vector<1x256xi1>, vector<1x256xf32>
    %1188 = arith.cmpf oeq, %1090, %1182 : vector<1x256xf32>
    %cst_397 = arith.constant 0.000000e+00 : f32
    %1189 = vector.broadcast %cst_397 : f32 to vector<1x256xf32>
    %1190 = arith.select %1188, %1086, %1189 : vector<1x256xi1>, vector<1x256xf32>
    %1191 = arith.addf %1187, %1190 : vector<1x256xf32>
    %c240_i32_398 = arith.constant 240 : i32
    %1192 = tpu.dynamic_rotate %183 by %c240_i32_398 dim 1 : vector<4x256xf32>, i32 -> vector<4x256xf32>
    %1193 = vector.broadcast %1191 : vector<1x256xf32> to vector<4x256xf32>
    %1194 = arith.mulf %1193, %1192 : vector<4x256xf32>
    %1195 = arith.addf %1180, %1194 : vector<4x256xf32>
    %cst_399 = arith.constant 2.000000e+00 : f32
    %1196 = vector.broadcast %cst_399 : f32 to vector<1x256xf32>
    %1197 = arith.addf %9, %1196 : vector<1x256xf32>
    %1198 = arith.cmpf oeq, %1085, %1197 : vector<1x256xf32>
    %cst_400 = arith.constant 1.000000e+00 : f32
    %1199 = vector.broadcast %cst_400 : f32 to vector<1x256xf32>
    %1200 = arith.subf %1199, %1086 : vector<1x256xf32>
    %cst_401 = arith.constant 0.000000e+00 : f32
    %1201 = vector.broadcast %cst_401 : f32 to vector<1x256xf32>
    %1202 = arith.select %1198, %1200, %1201 : vector<1x256xi1>, vector<1x256xf32>
    %1203 = arith.cmpf oeq, %1090, %1197 : vector<1x256xf32>
    %cst_402 = arith.constant 0.000000e+00 : f32
    %1204 = vector.broadcast %cst_402 : f32 to vector<1x256xf32>
    %1205 = arith.select %1203, %1086, %1204 : vector<1x256xi1>, vector<1x256xf32>
    %1206 = arith.addf %1202, %1205 : vector<1x256xf32>
    %c224_i32_403 = arith.constant 224 : i32
    %1207 = tpu.dynamic_rotate %183 by %c224_i32_403 dim 1 : vector<4x256xf32>, i32 -> vector<4x256xf32>
    %1208 = vector.broadcast %1206 : vector<1x256xf32> to vector<4x256xf32>
    %1209 = arith.mulf %1208, %1207 : vector<4x256xf32>
    %1210 = arith.addf %1195, %1209 : vector<4x256xf32>
    %cst_404 = arith.constant 3.000000e+00 : f32
    %1211 = vector.broadcast %cst_404 : f32 to vector<1x256xf32>
    %1212 = arith.addf %9, %1211 : vector<1x256xf32>
    %1213 = arith.cmpf oeq, %1085, %1212 : vector<1x256xf32>
    %cst_405 = arith.constant 1.000000e+00 : f32
    %1214 = vector.broadcast %cst_405 : f32 to vector<1x256xf32>
    %1215 = arith.subf %1214, %1086 : vector<1x256xf32>
    %cst_406 = arith.constant 0.000000e+00 : f32
    %1216 = vector.broadcast %cst_406 : f32 to vector<1x256xf32>
    %1217 = arith.select %1213, %1215, %1216 : vector<1x256xi1>, vector<1x256xf32>
    %1218 = arith.cmpf oeq, %1090, %1212 : vector<1x256xf32>
    %cst_407 = arith.constant 0.000000e+00 : f32
    %1219 = vector.broadcast %cst_407 : f32 to vector<1x256xf32>
    %1220 = arith.select %1218, %1086, %1219 : vector<1x256xi1>, vector<1x256xf32>
    %1221 = arith.addf %1217, %1220 : vector<1x256xf32>
    %c208_i32_408 = arith.constant 208 : i32
    %1222 = tpu.dynamic_rotate %183 by %c208_i32_408 dim 1 : vector<4x256xf32>, i32 -> vector<4x256xf32>
    %1223 = vector.broadcast %1221 : vector<1x256xf32> to vector<4x256xf32>
    %1224 = arith.mulf %1223, %1222 : vector<4x256xf32>
    %1225 = arith.addf %1210, %1224 : vector<4x256xf32>
    %cst_409 = arith.constant 4.000000e+00 : f32
    %1226 = vector.broadcast %cst_409 : f32 to vector<1x256xf32>
    %1227 = arith.addf %9, %1226 : vector<1x256xf32>
    %1228 = arith.cmpf oeq, %1085, %1227 : vector<1x256xf32>
    %cst_410 = arith.constant 1.000000e+00 : f32
    %1229 = vector.broadcast %cst_410 : f32 to vector<1x256xf32>
    %1230 = arith.subf %1229, %1086 : vector<1x256xf32>
    %cst_411 = arith.constant 0.000000e+00 : f32
    %1231 = vector.broadcast %cst_411 : f32 to vector<1x256xf32>
    %1232 = arith.select %1228, %1230, %1231 : vector<1x256xi1>, vector<1x256xf32>
    %1233 = arith.cmpf oeq, %1090, %1227 : vector<1x256xf32>
    %cst_412 = arith.constant 0.000000e+00 : f32
    %1234 = vector.broadcast %cst_412 : f32 to vector<1x256xf32>
    %1235 = arith.select %1233, %1086, %1234 : vector<1x256xi1>, vector<1x256xf32>
    %1236 = arith.addf %1232, %1235 : vector<1x256xf32>
    %c192_i32_413 = arith.constant 192 : i32
    %1237 = tpu.dynamic_rotate %183 by %c192_i32_413 dim 1 : vector<4x256xf32>, i32 -> vector<4x256xf32>
    %1238 = vector.broadcast %1236 : vector<1x256xf32> to vector<4x256xf32>
    %1239 = arith.mulf %1238, %1237 : vector<4x256xf32>
    %1240 = arith.addf %1225, %1239 : vector<4x256xf32>
    %cst_414 = arith.constant 5.000000e+00 : f32
    %1241 = vector.broadcast %cst_414 : f32 to vector<1x256xf32>
    %1242 = arith.addf %9, %1241 : vector<1x256xf32>
    %1243 = arith.cmpf oeq, %1085, %1242 : vector<1x256xf32>
    %cst_415 = arith.constant 1.000000e+00 : f32
    %1244 = vector.broadcast %cst_415 : f32 to vector<1x256xf32>
    %1245 = arith.subf %1244, %1086 : vector<1x256xf32>
    %cst_416 = arith.constant 0.000000e+00 : f32
    %1246 = vector.broadcast %cst_416 : f32 to vector<1x256xf32>
    %1247 = arith.select %1243, %1245, %1246 : vector<1x256xi1>, vector<1x256xf32>
    %1248 = arith.cmpf oeq, %1090, %1242 : vector<1x256xf32>
    %cst_417 = arith.constant 0.000000e+00 : f32
    %1249 = vector.broadcast %cst_417 : f32 to vector<1x256xf32>
    %1250 = arith.select %1248, %1086, %1249 : vector<1x256xi1>, vector<1x256xf32>
    %1251 = arith.addf %1247, %1250 : vector<1x256xf32>
    %c176_i32_418 = arith.constant 176 : i32
    %1252 = tpu.dynamic_rotate %183 by %c176_i32_418 dim 1 : vector<4x256xf32>, i32 -> vector<4x256xf32>
    %1253 = vector.broadcast %1251 : vector<1x256xf32> to vector<4x256xf32>
    %1254 = arith.mulf %1253, %1252 : vector<4x256xf32>
    %1255 = arith.addf %1240, %1254 : vector<4x256xf32>
    %1256 = tpu.concatenate %369, %517, %635, %723, %2, %811, %929, %1077, %1255 in 0 : vector<4x256xf32>, vector<4x256xf32>, vector<4x256xf32>, vector<4x256xf32>, vector<4x256xf32>, vector<4x256xf32>, vector<4x256xf32>, vector<4x256xf32>, vector<4x256xf32> -> vector<36x256xf32>
    %1257 = arith.truncf %1256 : vector<36x256xf32> to vector<36x256xbf16>
    %c0_419 = arith.constant 0 : index
    %c0_420 = arith.constant 0 : index
    %1258 = vector.load %arg7[%c0_419, %c0_420] : memref<8x36xbf16, #tpu.memory_space<vmem>>, vector<8x36xbf16>
    %cst_421 = arith.constant dense<0.000000e+00> : vector<8x256xf32>
    %1259 = tpu.matmul %1258, %1257, %cst_421 {dimension_numbers = #tpu.dot_dimension_numbers<[1], [0], [0], [1], [0, 0, 1, 1], [], []>} : vector<8x36xbf16>, vector<36x256xbf16>, vector<8x256xf32> -> vector<8x256xf32>
    %c0_422 = arith.constant 0 : index
    %c0_423 = arith.constant 0 : index
    %1260 = vector.load %arg8[%c0_422, %c0_423] : memref<8x1xf32, #tpu.memory_space<vmem>>, vector<8x1xf32>
    %1261 = vector.broadcast %1260 : vector<8x1xf32> to vector<8x256xf32>
    %1262 = arith.addf %1259, %1261 : vector<8x256xf32>
    %cst_424 = arith.constant dense<0.000000e+00> : vector<8xf32>
    %1263 = vector.multi_reduction <add>, %1262, %cst_424 [1] : vector<8x256xf32> to vector<8xf32>
    %1264 = vector.shape_cast %1263 : vector<8xf32> to vector<8x1xf32>
    %c0_425 = arith.constant 0 : index
    %c0_426 = arith.constant 0 : index
    %1265 = vector.load %arg11[%c0_425, %c0_426] : memref<8x8xf32, #tpu.memory_space<vmem>>, vector<8x8xf32>
    %cst_427 = arith.constant dense<0.000000e+00> : vector<8x1xf32>
    %1266 = tpu.matmul %1265, %1264, %cst_427 {dimension_numbers = #tpu.dot_dimension_numbers<[1], [0], [0], [1], [0, 0, 1, 1], [], []>} : vector<8x8xf32>, vector<8x1xf32>, vector<8x1xf32> -> vector<8x1xf32>
    %1267 = vector.broadcast %1266 : vector<8x1xf32> to vector<8x256xf32>
    %1268 = arith.subf %1262, %1267 : vector<8x256xf32>
    %1269 = arith.mulf %1268, %1268 : vector<8x256xf32>
    %cst_428 = arith.constant dense<0.000000e+00> : vector<8xf32>
    %1270 = vector.multi_reduction <add>, %1269, %cst_428 [1] : vector<8x256xf32> to vector<8xf32>
    %1271 = vector.shape_cast %1270 : vector<8xf32> to vector<8x1xf32>
    %c0_429 = arith.constant 0 : index
    %c0_430 = arith.constant 0 : index
    %1272 = vector.load %arg11[%c0_429, %c0_430] : memref<8x8xf32, #tpu.memory_space<vmem>>, vector<8x8xf32>
    %cst_431 = arith.constant dense<0.000000e+00> : vector<8x1xf32>
    %1273 = tpu.matmul %1272, %1271, %cst_431 {dimension_numbers = #tpu.dot_dimension_numbers<[1], [0], [0], [1], [0, 0, 1, 1], [], []>} : vector<8x8xf32>, vector<8x1xf32>, vector<8x1xf32> -> vector<8x1xf32>
    %cst_432 = arith.constant 9.99999974E-6 : f32
    %1274 = vector.broadcast %cst_432 : f32 to vector<8x1xf32>
    %1275 = arith.addf %1273, %1274 : vector<8x1xf32>
    %1276 = math.rsqrt %1275 : vector<8x1xf32>
    %1277 = vector.broadcast %1276 : vector<8x1xf32> to vector<8x256xf32>
    %1278 = arith.mulf %1268, %1277 : vector<8x256xf32>
    %c0_433 = arith.constant 0 : index
    %c0_434 = arith.constant 0 : index
    %1279 = vector.load %arg9[%c0_433, %c0_434] : memref<8x1xf32, #tpu.memory_space<vmem>>, vector<8x1xf32>
    %1280 = vector.broadcast %1279 : vector<8x1xf32> to vector<8x256xf32>
    %1281 = arith.mulf %1278, %1280 : vector<8x256xf32>
    %c0_435 = arith.constant 0 : index
    %c0_436 = arith.constant 0 : index
    %1282 = vector.load %arg10[%c0_435, %c0_436] : memref<8x1xf32, #tpu.memory_space<vmem>>, vector<8x1xf32>
    %1283 = vector.broadcast %1282 : vector<8x1xf32> to vector<8x256xf32>
    %1284 = arith.addf %1281, %1283 : vector<8x256xf32>
    %cst_437 = arith.constant 0.000000e+00 : f32
    %1285 = vector.broadcast %cst_437 : f32 to vector<8x256xf32>
    %1286 = arith.maximumf %1284, %1285 : vector<8x256xf32>
    %c0_438 = arith.constant 0 : index
    %c0_439 = arith.constant 0 : index
    %c0_440 = arith.constant 0 : index
    %1287 = vector.load %arg12[%c0_438, %c0_439, %c0_440] : memref<1x8x256xf32, #tpu.memory_space<vmem>>, vector<1x8x256xf32>
    %1288 = vector.shape_cast %1287 : vector<1x8x256xf32> to vector<8x256xf32>
    %1289 = vector.shape_cast %1286 : vector<8x256xf32> to vector<1x8x256xf32>
    tpu.vector_store %arg12[%c0_438, %c0_439, %c0_440], %1289 {strides = array<i32>} : memref<1x8x256xf32, #tpu.memory_space<vmem>>, vector<1x8x256xf32>,
    return
  }
  func.func @transform_0(%arg0: i32) -> (i32, i32, i32) {
    %c0_i32 = arith.constant 0 : i32
    %c0_i32_0 = arith.constant 0 : i32
    %c0_i32_1 = arith.constant 0 : i32
    return %arg0, %c0_i32, %c0_i32_0 : i32, i32, i32
  }
  func.func @transform_1(%arg0: i32) -> (i32, i32) {
    %c0_i32 = arith.constant 0 : i32
    %c0_i32_0 = arith.constant 0 : i32
    %c0_i32_1 = arith.constant 0 : i32
    return %c0_i32, %c0_i32_0 : i32, i32
  }
  func.func @transform_2(%arg0: i32) -> (i32, i32) {
    %c0_i32 = arith.constant 0 : i32
    %c0_i32_0 = arith.constant 0 : i32
    %c0_i32_1 = arith.constant 0 : i32
    return %c0_i32, %c0_i32_0 : i32, i32
  }
  func.func @transform_3(%arg0: i32) -> (i32, i32) {
    %c0_i32 = arith.constant 0 : i32
    %c0_i32_0 = arith.constant 0 : i32
    %c0_i32_1 = arith.constant 0 : i32
    return %c0_i32, %c0_i32_0 : i32, i32
  }
  func.func @transform_4(%arg0: i32) -> (i32, i32) {
    %c0_i32 = arith.constant 0 : i32
    %c0_i32_0 = arith.constant 0 : i32
    %c0_i32_1 = arith.constant 0 : i32
    return %c0_i32, %c0_i32_0 : i32, i32
  }
  func.func @transform_5(%arg0: i32) -> (i32, i32) {
    %c0_i32 = arith.constant 0 : i32
    %c0_i32_0 = arith.constant 0 : i32
    %c0_i32_1 = arith.constant 0 : i32
    return %c0_i32, %c0_i32_0 : i32, i32
  }
  func.func @transform_6(%arg0: i32) -> (i32, i32) {
    %c0_i32 = arith.constant 0 : i32
    %c0_i32_0 = arith.constant 0 : i32
    %c0_i32_1 = arith.constant 0 : i32
    return %c0_i32, %c0_i32_0 : i32, i32
  }
  func.func @transform_7(%arg0: i32) -> (i32, i32) {
    %c0_i32 = arith.constant 0 : i32
    %c0_i32_0 = arith.constant 0 : i32
    %c0_i32_1 = arith.constant 0 : i32
    return %c0_i32, %c0_i32_0 : i32, i32
  }
  func.func @transform_8(%arg0: i32) -> (i32, i32) {
    %c0_i32 = arith.constant 0 : i32
    %c0_i32_0 = arith.constant 0 : i32
    %c0_i32_1 = arith.constant 0 : i32
    return %c0_i32, %c0_i32_0 : i32, i32
  }
  func.func @transform_9(%arg0: i32) -> (i32, i32) {
    %c0_i32 = arith.constant 0 : i32
    %c0_i32_0 = arith.constant 0 : i32
    %c0_i32_1 = arith.constant 0 : i32
    return %c0_i32, %c0_i32_0 : i32, i32
  }
  func.func @transform_10(%arg0: i32) -> (i32, i32) {
    %c0_i32 = arith.constant 0 : i32
    %c0_i32_0 = arith.constant 0 : i32
    %c0_i32_1 = arith.constant 0 : i32
    return %c0_i32, %c0_i32_0 : i32, i32
  }
  func.func @transform_11(%arg0: i32) -> (i32, i32, i32) {
    %c0_i32 = arith.constant 0 : i32
    %c0_i32_0 = arith.constant 0 : i32
    %c0_i32_1 = arith.constant 0 : i32
    return %arg0, %c0_i32, %c0_i32_0 : i32, i32, i32
  }
}

</mosaic_0001>

<bundles_post_ra>
// kernel: dsconv_pro_forward.1
= control target key start
LH: loop header
LB: loop body
LE: loop exit
PB: predicated region body
PF: predicated region fallthrough
CT: control target
= control target key end

     0   :  { %s3747_s17 = smov 0   ;;  %s6092_s0 = inlined_call_operand.vmem [shape: bf16[2,4,256], index: 0, kind: input, shape index: {}]   ;;  %s6093_s1 = inlined_call_operand.vmem [shape: bf16[24,36], index: 1, kind: input, shape index: {}]   ;;  %s6094_s2 = inlined_call_operand.vmem [shape: f32[24,1], index: 2, kind: input, shape index: {}]   ;;  %s6095_s3 = inlined_call_operand.vmem [shape: f32[24,1], index: 3, kind: input, shape index: {}]   ;;  %s6096_s4 = inlined_call_operand.vmem [shape: f32[24,1], index: 4, kind: input, shape index: {}]   ;;  %s6097_s5 = inlined_call_operand.vmem [shape: f32[24,24], index: 5, kind: input, shape index: {}]   ;;  %s6098_s6 = inlined_call_operand.vmem [shape: bf16[8,36], index: 6, kind: input, shape index: {}]   ;;  %s6099_s7 = inlined_call_operand.vmem [shape: f32[8,1], index: 7, kind: input, shape index: {}]   ;;  %s6100_s8 = inlined_call_operand.vmem [shape: f32[8,1], index: 8, kind: input, shape index: {}]   ;;  %s6101_s9 = inlined_call_operand.vmem [shape: f32[8,1], index: 9, kind: input, shape index: {}]   ;;  %s6102_s10 = inlined_call_operand.vmem [shape: f32[8,8], index: 10, kind: input, shape index: {}]   ;;  %s6103_s11 = inlined_call_operand.vmem [shape: f32[2,8,256], index: 11, kind: output, shape index: {}]  }
   0x1 LB: > { %s3211_s18 = sadd.s32 4294967295, %s3668_s17   ;;  %p3215_p0 = scmp.ge.s32.totalorder %s3668_s17, 1  ;;  %s3668_s17 = sphi %s3747_s17, %s21_s17  }
   0x2   : > { %p337_p1 = scmp.lt.s32.totalorder %s3668_s17, 3 }
   0x4   : > { %p338_p2 = pnand %p3215_p0, %p337_p1 }
   0x6   : > { %341 = sbr.rel (%p338_p2) target bundleno = 2989 (0xbad), region = 64 }
   0xd   : > { %p377_p3 = scmp.lt.s32.totalorder %s3211_s18, 1  ;;  %s3670_s23 = smov 16   ;;  %v3678_v4 = vmov 0   ;;  %v571_v5 = vld [vmem:[%s6094_s2 + $0x8] sm:$0xff]  ;;  %v570_v6 = vld [vmem:[%s6094_s2] sm:$0xff]  ;;  %v572_v7 = vld [vmem:[%s6094_s2 + $0x10] sm:$0xff]  ;;  %v390_v8 = vlaneseq }
   0xe   : > { %s3671_s24 = smov 17   ;;  %s3672_s25 = smov 1   ;;  %642 = vmatprep.mubr.bf16.mxu0 %v3678_v4  ;;  %3375 = vset.pattern.permute.xlu1 %v3678_v4  ;;  %vm552_vm7 = vcmask 1043456  }
   0xf   : > { %s6637_s18 = smov (!%p377_p3, %s3211_s18), 1  ;;  %s3673_s26 = smov 15   ;;  %3374 = vset.pattern.permute.xlu0 %v3678_v4  ;;  %v3786_v9 = vand.u32 127, %v390_v8 }
  0x10   : > { %s3245_s19 = sshll.u32 %s6637_s18, 2  ;;  %s3674_s27 = smov 127  }
  0x11   : > { %s381_s22 = scalar_lea.vmem %s6092_s0, %s3245_s19  ;;  %s3675_s28 = smov 112   ;;  %6289 = vst [vmem:[#allocation4_spill] sm:$0xff] %v3786_v9  ;;  %v392_v10 = vadd.s32 128, %v3786_v9  ;;  %v393_v12 = vcvt.s32.f32 %v3786_v9  ;;  %vm6104_vm0 = vcmp.lt.s32.totalorder %v3786_v9, 16  ;;  %vm461_vm1 = vcmp.lt.s32.totalorder %v3786_v9, 1 }
  0x12   : > { %v388_v0 = vld [vmem:[%s381_s22] sm:$0xf]  ;;  %s3676_s29 = smov 113   ;;  %s3677_s30 = smov 111   ;;  %vm474_vm2 = vcmp.lt.s32.totalorder %v3786_v9, 127  ;;  %vm412_vm3 = vcmp.lt.s32.totalorder %v3786_v9, 17 }
  0x13   : > { %v3761_v1 = vunpack.c.l.bf16 %v388_v0  ;;  %v394_v11 = vcvt.s32.f32 %v392_v10  ;;  %v395_v14 = vadd.f32 0.5, %v393_v12  ;;  %vm444_vm6 = vcmp.lt.s32.totalorder %v3786_v9, 15  ;;  %s3686_s12 = smov 96   ;;  %s3246_s22 = sshll.u32 %s6637_s18, 4 }
  0x14   : > { %vm504_vm11 = vcmp.lt.s32.totalorder %v3786_v9, 112  ;;  %vm517_vm10 = vcmp.lt.s32.totalorder %v3786_v9, 111 }
  0x15   : > { %6287 = vst [vmem:[#allocation2_spill] sm:$0xff] %v3761_v1  ;;  %v3765_v2 = vcombine.high %v3761_v1, %v3761_v1  ;;  %v396_v13 = vadd.f32 0.5, %v394_v11  ;;  %v397_v16 = vmul.f32 0.0625, %v395_v14 }
  0x17   : > { %6288 = vst [vmem:[#allocation3_spill] sm:$0xff] %v3765_v2  ;;  %v3334_v3 = vpack.i.bf16 %v3765_v2, %v3761_v1  ;;  %v398_v15 = vmul.f32 0.0625, %v396_v13  ;;  %v3792_v18 = vfloor.f32 %v397_v16 }
  0x19   : > { %3335 = vrot.lane.b32.xlu0 %v3334_v3, %s3670_s23  ;;  %3345 = vrot.lane.b32.xlu1 %v3334_v3, %s3671_s24  ;;  %v3790_v17 = vfloor.f32 %v398_v15  ;;  %v401_v20 = vmul.f32 16.0, %v3792_v18  ;;  %vm417_vm9 = vcmp.ge.f32.partialorder %v3792_v18, 1.0 }
  0x1b   : > { %6290 = vst [vmem:[#allocation5_spill] sm:$0xff] %v3790_v17  ;;  %v402_v19 = vmul.f32 16.0, %v3790_v17  ;;  %v3798_v22 = vsub.f32 %v393_v12, %v401_v20  ;;  %vm418_vm5 = vcmp.ge.f32.partialorder %v3790_v17, 1.0 }
  0x1d   : > { %3340 = vrot.lane.b32.xlu0 %v3334_v3, %s3672_s25  ;;  %3350 = vrot.lane.b32.xlu1 %v3334_v3, %s3673_s26  ;;  %v3796_v21 = vsub.f32 %v394_v11, %v402_v19  ;;  %vm415_vm8 = vcmp.ge.f32.partialorder %v3798_v22, 1.0  ;;  %vm447_vm15 = vcmp.le.f32.partialorder %v3798_v22, 14.0  ;;  %s3683_s26 = smov 64  }
  0x1e   : > { %vm3834_vm14 = vmand %vm415_vm8, %vm417_vm9 }
  0x1f   : > { %vm416_vm4 = vcmp.ge.f32.partialorder %v3796_v21, 1.0  ;;  %vm448_vm12 = vcmp.le.f32.partialorder %v3796_v21, 14.0 }
  0x20   : > { %vm3822_vm13 = vmand %vm416_vm4, %vm418_vm5 }
  0x21   : > { %3355 = vrot.lane.b32.xlu0 %v3334_v3, %s3674_s27  ;;  %3360 = vrot.lane.b32.xlu1 %v3334_v3, %s3675_s28 }
  0x25   : > { %3365 = vrot.lane.b32.xlu0 %v3334_v3, %s3676_s29  ;;  %3370 = vrot.lane.b32.xlu1 %v3334_v3, %s3677_s30  ;;  %s3684_s29 = smov 48   ;;  %s3685_s30 = smov 32  }
  0x29   : > { %580 = vperm.xlu1 %3375, %v571_v5   ;;  %575 = vperm.xlu0 %3374, %v570_v6  }
  0x2d   : > { %585 = vperm.xlu1 %3375, %v572_v7  }
  0x8b   : > { %v3336_v23 = vpop.permute.xlu0 %3335  ;;  %v3346_v24 = vpop.permute.xlu1 %3345 }
  0x8c   : > { %v3338_v25 = vunpack.i.h.bf16 %v3336_v23  ;;  %v3337_v26 = vunpack.i.l.bf16 %v3336_v23  ;;  %v3348_v27 = vunpack.i.h.bf16 %v3346_v24  ;;  %v3347_v28 = vunpack.i.l.bf16 %v3346_v24 }
  0x8e   : > { %v432_v29 = vsel %vm6104_vm0, %v3337_v26, %v3338_v25  ;;  %v433_v30 = vsel %vm6104_vm0, %v3338_v25, %v3337_v26  ;;  %v413_v33 = vsel %vm412_vm3, %v3347_v28, %v3348_v27  ;;  %v414_v36 = vsel %vm412_vm3, %v3348_v27, %v3347_v28  ;;  %vm3853_vm3 = vmand %vm448_vm12, %vm418_vm5 }
  0x8f   : > { %v3341_v31 = vpop.permute.xlu0 %3340  ;;  %v3351_v32 = vpop.permute.xlu1 %3350  ;;  %v439_v35 = vsel %vm418_vm5, %v432_v29, 0.0  ;;  %vm491_vm0 = vcmp.le.f32.partialorder %v3790_v17, 14.0  ;;  %v426_v44 = vsel %vm3822_vm13, %v413_v33, 0.0  ;;  %v438_v47 = vsel %vm417_vm9, %v433_v30, 0.0  ;;  %vm3875_vm5 = vmand %vm447_vm15, %vm417_vm9 }
  0x90   : > { %v3343_v37 = vunpack.i.h.bf16 %v3341_v31  ;;  %v3342_v38 = vunpack.i.l.bf16 %v3341_v31  ;;  %v3353_v39 = vunpack.i.h.bf16 %v3351_v32  ;;  %v3352_v40 = vunpack.i.l.bf16 %v3351_v32 }
  0x91   : > { %v531_v42 = vrot.slane %v439_v35, 4  ;;  %v425_v52 = vsel %vm3834_vm14, %v414_v36, 0.0  ;;  %v530_v62 = vrot.slane %v438_v47, 4  ;;  %vm3922_vm14 = vmand %vm416_vm4, %vm491_vm0 }
  0x92   : > { %v3843_v43 = vsel %vm461_vm1, %v3342_v38, %v3343_v37  ;;  %v445_v45 = vsel %vm444_vm6, %v3352_v40, %v3353_v39  ;;  %v3862_v48 = vsel %vm461_vm1, %v3343_v37, %v3342_v38  ;;  %v446_v53 = vsel %vm444_vm6, %v3353_v39, %v3352_v40 }
  0x93   : > { %v3356_v49 = vpop.permute.xlu0 %3355  ;;  %v3361_v50 = vpop.permute.xlu1 %3360  ;;  %v469_v51 = vsel %vm416_vm4, %v3843_v43, 0.0  ;;  %v456_v59 = vsel %vm3853_vm3, %v445_v45, 0.0  ;;  %v554_v61 = vsel %vm552_vm7, %v426_v44, %v531_v42  ;;  %vm6299_vm6 = vcmp.le.f32.partialorder %v3792_v18, 14.0 }
  0x94   : > { %v3358_v54 = vunpack.i.h.bf16 %v3356_v49  ;;  %v3357_v55 = vunpack.i.l.bf16 %v3356_v49  ;;  %v3363_v56 = vunpack.i.h.bf16 %v3361_v50  ;;  %v3362_v57 = vunpack.i.l.bf16 %v3361_v50  ;;  %vm6300_vm9 = vmmov %vm6299_vm6 }
  0x95   : > { %v537_v60 = vrot.slane %v469_v51, 4  ;;  %v455_v11 = vsel %vm3875_vm5, %v446_v53, 0.0  ;;  %v468_v12 = vsel %vm415_vm8, %v3862_v48, 0.0  ;;  %vm3910_vm13 = vmand %vm415_vm8, %vm6300_vm9  ;;  %v553_v31 = vsel %vm552_vm7, %v425_v52, %v530_v62 }
  0x96   : > { %v3884_v63 = vsel %vm474_vm2, %v3357_v55, %v3358_v54  ;;  %v3888_v0 = vsel %vm474_vm2, %v3358_v54, %v3357_v55  ;;  %v505_v3 = vsel %vm504_vm11, %v3362_v57, %v3363_v56  ;;  %v506_v5 = vsel %vm504_vm11, %v3363_v56, %v3362_v57  ;;  %vm521_vm5 = vmand %vm448_vm12, %vm491_vm0  ;;  %v3646_v55 = vld [vmem:[%s6093_s1] sm:$0xff]   ;;  %v3647_v56 = vld [vmem:[%s6093_s1 + $0x8] ss:$0 sps:$4 sm:$0xff]  }
  0x97   : > { %v481_v6 = vsel %vm447_vm15, %v3884_v63, 0.0  ;;  %v511_v7 = vsel %vm6299_vm6, %v505_v3, 0.0  ;;  %v3366_v10 = vpop.permute.xlu0 %3365  ;;  %v512_v14 = vsel %vm491_vm0, %v506_v5, 0.0  ;;  %v3371_v19 = vpop.permute.xlu1 %3370  ;;  %v482_v25 = vsel %vm448_vm12, %v3888_v0, 0.0  ;;  %vm6307_vm4 = vmmov %vm6299_vm6 }
  0x98   : > { %v542_v13 = vrot.slane %v481_v6, 4  ;;  %v548_v15 = vrot.slane %v511_v7, 4  ;;  %v3368_v16 = vunpack.i.h.bf16 %v3366_v10  ;;  %v549_v23 = vrot.slane %v512_v14, 4  ;;  %vm520_vm6 = vmand %vm447_vm15, %vm6307_vm4 }
  0x99   : > { %v3367_v24 = vunpack.i.l.bf16 %v3366_v10  ;;  %v556_v26 = vsel %vm552_vm7, %v456_v59, %v537_v60  ;;  %v543_v28 = vrot.slane %v482_v25, 4  ;;  %v536_v30 = vrot.slane %v468_v12, 4 }
  0x9a   : > { %v562_v29 = vpack.c.bf16 %v556_v26, %v554_v61  ;;  %vm6305_vm8 = vcmp.lt.s32.totalorder %v3786_v9, 113  ;;  %v3373_v34 = vunpack.i.h.bf16 %v3371_v19  ;;  %v3372_v35 = vunpack.i.l.bf16 %v3371_v19 }
  0x9b   : > { %v488_v32 = vsel %vm6305_vm8, %v3367_v24, %v3368_v16  ;;  %vm6306_vm3 = vmmov %vm6305_vm8  ;;  %v555_v36 = vsel %vm552_vm7, %v455_v11, %v536_v30  ;;  %v558_v38 = vsel %vm552_vm7, %v3765_v2, %v543_v28  ;;  %v557_v44 = vsel %vm552_vm7, %v3761_v1, %v542_v13  ;;  %v3972_v28 = vld [vmem:[%s6097_s5] sm:$0xff]  ;;  %v3981_v30 = vld [vmem:[%s6097_s5 + $0x8] sm:$0xff] }
  0x9c   : > { %v489_v33 = vsel %vm6306_vm3, %v3368_v16, %v3367_v24  ;;  %610 = vmatprep.subr.bf16.mxu0 %v562_v29  ;;  %v498_v39 = vsel %vm3910_vm13, %v488_v32, 0.0  ;;  %v561_v40 = vpack.c.bf16 %v555_v36, %v553_v31  ;;  %v519_v41 = vsel %vm517_vm10, %v3373_v34, %v3372_v35  ;;  %v3990_v31 = vld [vmem:[%s6097_s5 + $0x10] sm:$0xff] }
  0x9d   : > { %v499_v37 = vsel %vm3922_vm14, %v489_v33, 0.0  ;;  %v527_v45 = vsel %vm521_vm5, %v519_v41, 0.0  ;;  %v559_v47 = vsel %vm552_vm7, %v498_v39, %v548_v15  ;;  %v518_v49 = vsel %vm517_vm10, %v3372_v35, %v3373_v34 }
  0x9e   : > { %v560_v42 = vsel %vm552_vm7, %v499_v37, %v549_v23  ;;  %611 = vmatpush1.bf16.msra.mxu0 %v561_v40  ;;  %v563_v50 = vpack.c.bf16 %v559_v47, %v557_v44  ;;  %v526_v51 = vsel %vm520_vm6, %v518_v49, 0.0  ;;  %v566_v52 = vpack.c.bf16 %v527_v45, %v527_v45 }
  0x9f   : > { %v564_v46 = vpack.c.bf16 %v560_v42, %v558_v38  ;;  %v565_v53 = vpack.c.bf16 %v526_v51, %v526_v51  ;;  %vm603_vm0 = vcmask 1041408   ;;  %vm596_vm12 = vcmask 293888  }
  0xa0   : > { %v3679_v23 = vmov 0.0|0.0   ;;  %vm3680_vm10 = vmmov 0   ;;  %v6105_v24 = vmov 0.0   ;;  %vm673_vm15 = vcmask 195584  }
  0xa1   : > { %612 = vmatprep.subr.bf16.mxu0 %v564_v46  ;;  %v605_v54 = vsel %vm603_vm0, %v565_v53, 0  ;;  %3303 = vmatprep.subr.bf16.mxu1 %v3679_v23 }
  0xa2   : > { %613 = vmatpush1.bf16.msra.mxu0 %v563_v50  ;;  %3269 = vmatprep.mubr.msk.f32.mxu1 %vm3680_vm10, %v6105_v24 }
  0xa3   : > { %3222 = vmatprep.subr.msk.bf16.mxu0 %vm603_vm0, %v566_v52 }
  0xa6   : > { %615 = vmatpush1.bf16.msra.mxu0 %v605_v54 }
  0xa8   : > { %v576_v57 = vpop.permute.xlu0 %575  ;;  %v581_v61 = vpop.permute.xlu1 %580 }
  0xa9   : > { %3223 = vmatmul.mubr.msk.bf16.vlgmr.msra.gmra.mrb[0].mxu0 %vm596_vm12, %v3646_v55 }
  0xaa   : > { %652 = vmatprep.mubr.bf16.mxu0 %v3678_v4 }
  0xac   : > { %v586_v12 = vpop.permute.xlu1 %585 }
  0xb1   : > { %3224 = vmatmul.mubr.msk.bf16.gmra.mrb[4].mxu0 %vm596_vm12, %v3647_v56 }
  0xb2   : > { %2959 = vmatprep.mubr.bf16.mxu0 %v3678_v4 }
 0x17c   : > { %v644_v58 = vpop.f32.mrb[0].mxu0 }
 0x17d   : > { %v645_v59 = vadd.f32 %v644_v58, %v576_v57  ;;  %v646_v60 = vpop.f32.mrb[1].mxu0  ;;  %v972_v58 = vadd.f32 1.0, %v3798_v22 }
 0x17e   : > { %v647_v62 = vadd.f32 %v646_v60, %v576_v57  ;;  %v648_v3 = vpop.f32.mrb[2].mxu0 }
 0x17f   : > { %v649_v5 = vadd.f32 %v648_v3, %v581_v61  ;;  %v650_v6 = vpop.f32.mrb[3].mxu0  ;;  %vm974_vm9 = vcmp.le.f32.partialorder %v972_v58, 15.0  ;;  %v3232_v3 = vadd.f32 -1.0, %v3796_v21 }
 0x180   : > { %v651_v7 = vadd.f32 %v650_v6, %v581_v61  ;;  %v661_v10 = vadd.f32 %v647_v62, %v645_v59  ;;  %v4016_v60 = vsel %vm974_vm9, %v3884_v63, %v3761_v1 }
 0x181   : > { %6308 = vst [vmem:[#allocation6_spill] sm:$0xff] %v4016_v60  ;;  %vm985_vm8 = vcmp.ge.f32.partialorder %v3232_v3, 0.0 }
 0x182   : > { %662 = vadd.xlane.f32.xlu0 %v661_v10  ;;  %v664_v11 = vadd.f32 %v651_v7, %v649_v5 }
 0x184   : > { %v654_v13 = vpop.f32.mrb[4].mxu0  ;;  %665 = vadd.xlane.f32.xlu1 %v664_v11  ;;  %v992_v11 = vadd.f32 2.0, %v3798_v22 }
 0x185   : > { %v655_v14 = vadd.f32 %v654_v13, %v586_v12  ;;  %v656_v15 = vpop.f32.mrb[5].mxu0  ;;  %v993_v13 = vadd.f32 2.0, %v3796_v21 }
 0x186   : > { %v657_v16 = vadd.f32 %v656_v15, %v586_v12  ;;  %v658_v4 = vpop.f32.mrb[6].mxu0  ;;  %vm994_vm3 = vcmp.le.f32.partialorder %v992_v11, 15.0  ;;  %v895_v11 = vld [vmem:[%s6095_s3 + $0x8] sm:$0xff] }
 0x187   : > { %v659_v19 = vpop.f32.mrb[7].mxu0  ;;  %vm995_vm5 = vcmp.le.f32.partialorder %v993_v13, 15.0  ;;  %v3234_v4 = vadd.f32 -2.0, %v3796_v21 }
 0x188   : > { %v667_v20 = vadd.f32 %v657_v16, %v655_v14 }
 0x189   : > { %vm1011_vm6 = vcmp.ge.f32.partialorder %v3234_v4, 0.0  ;;  %v3238_v4 = vadd.f32 -4.0, %v3796_v21 }
 0x18a   : > { %668 = vadd.xlane.f32.xlu0 %v667_v20 }
 0x20f   : > { %v663_v25 = vpop.xlane.xlu0 %662 }
 0x211   : > { %v666_v26 = vpop.xlane.xlu1 %665 }
 0x212   : > { %v3304_v27 = vpack.c.bf16 %v666_v26, %v663_v25 }
 0x214   : > { %3305 = vmatpush3.bf16.msra.mxu1 %v3304_v27 }
 0x215   : > { %3267 = vmatprep.subr.mxu1 %v6105_v24 }
 0x217   : > { %v669_v29 = vpop.xlane.xlu0 %668 }
 0x218   : > { %3268 = vmatpush3.msra.mxu1 %v669_v29 }
 0x219   : > { %3270 = vmatmul.mubr.msk.f32.vlgmr.msra.gmra.mrb[0].mxu1 %vm673_vm15, %v3972_v28  ;;  %3306 = vmatprep.subr.bf16.mxu1 %v3679_v23 }
 0x21a   : > { %3272 = vmatprep.mubr.msk.f32.mxu1 %vm3680_vm10, %v6105_v24 }
 0x21d   : > { %3273 = vmatmul.mubr.msk.f32.gmra.mrb[2].mxu1 %vm673_vm15, %v3981_v30 }
 0x21e   : > { %3275 = vmatprep.mubr.msk.f32.mxu1 %vm3680_vm10, %v6105_v24 }
 0x221   : > { %3276 = vmatmul.mubr.msk.f32.gmra.mrb[4].mxu1 %vm673_vm15, %v3990_v31 }
 0x222   : > { %3284 = vmatprep.mubr.msk.f32.mxu1 %vm3680_vm10, %v6105_v24 }
 0x2ec   : > { %v749_v32 = vpop.f32.mrb[0].mxu1 }
 0x2ed   : > { %765 = vperm.xlu0 %3374, %v749_v32   ;;  %v3271_v33 = vpop.f32.mrb[1].mxu1 }
 0x2f0   : > { %v754_v34 = vpop.f32.mrb[2].mxu1 }
 0x2f1   : > { %770 = vperm.xlu1 %3375, %v754_v34   ;;  %v3274_v35 = vpop.f32.mrb[3].mxu1 }
 0x2f4   : > { %v759_v36 = vpop.f32.mrb[4].mxu1 }
 0x2f5   : > { %775 = vperm.xlu1 %3375, %v759_v36   ;;  %v3277_v37 = vpop.f32.mrb[5].mxu1 }
 0x2f6   : > { %v1024_v37 = vadd.f32 3.0, %v3798_v22 }
 0x2f8   : > { %vm1026_vm9 = vcmp.le.f32.partialorder %v1024_v37, 15.0 }
 0x36c   : > { %v766_v38 = vpop.permute.xlu0 %765 }
 0x36d   : > { %v3996_v39 = vsub.f32 %v645_v59, %v766_v38  ;;  %v3998_v40 = vsub.f32 %v647_v62, %v766_v38  ;;  %v973_v59 = vadd.f32 1.0, %v3796_v21  ;;  %v3231_v62 = vadd.f32 -1.0, %v3798_v22 }
 0x36f   : > { %v784_v41 = vmul.f32 %v3996_v39, %v3996_v39  ;;  %v785_v42 = vmul.f32 %v3998_v40, %v3998_v40  ;;  %vm975_vm13 = vcmp.le.f32.partialorder %v973_v59, 15.0  ;;  %vm984_vm14 = vcmp.ge.f32.partialorder %v3231_v62, 0.0  ;;  %v894_v62 = vld [vmem:[%s6095_s3] sm:$0xff] }
 0x370   : > { %v771_v44 = vpop.permute.xlu1 %770  ;;  %v4020_v61 = vsel %vm975_vm13, %v3888_v0, %v3765_v2  ;;  %v4032_v63 = vsel %vm984_vm14, %v3862_v48, %v3761_v1  ;;  %v4036_v0 = vsel %vm985_vm8, %v3843_v43, %v3765_v2  ;;  %v3233_v43 = vadd.f32 -2.0, %v3798_v22 }
 0x371   : > { %v4004_v45 = vsub.f32 %v649_v5, %v771_v44  ;;  %v4006_v46 = vsub.f32 %v651_v7, %v771_v44  ;;  %v790_v47 = vadd.f32 %v785_v42, %v784_v41  ;;  %6309 = vst [vmem:[#allocation7_spill] sm:$0xff] %v4020_v61  ;;  %v4026_v5 = vpack.i.bf16 %v4020_v61, %v4016_v60 }
 0x372   : > { %6310 = vst [vmem:[#allocation8_spill] sm:$0xff] %v4032_v63  ;;  %6311 = vst [vmem:[#allocation9_spill] sm:$0xff] %v4036_v0  ;;  %v4040_v6 = vpack.i.bf16 %v4036_v0, %v4032_v63  ;;  %vm1010_vm4 = vcmp.ge.f32.partialorder %v3233_v43, 0.0  ;;  %v3235_v41 = vadd.f32 -3.0, %v3798_v22 }
 0x373   : > { %791 = vadd.xlane.f32.xlu0 %v790_v47  ;;  %v786_v49 = vmul.f32 %v4004_v45, %v4004_v45  ;;  %v787_v50 = vmul.f32 %v4006_v46, %v4006_v46  ;;  %v3236_v47 = vadd.f32 -3.0, %v3796_v21 }
 0x374   : > { %v776_v51 = vpop.permute.xlu1 %775 }
 0x375   : > { %v782_v52 = vsub.f32 %v655_v14, %v776_v51  ;;  %v783_v53 = vsub.f32 %v657_v16, %v776_v51  ;;  %v793_v54 = vadd.f32 %v787_v50, %v786_v49  ;;  %vm1043_vm14 = vcmp.ge.f32.partialorder %v3236_v47, 0.0 }
 0x377   : > { %v788_v55 = vmul.f32 %v782_v52, %v782_v52  ;;  %v789_v56 = vmul.f32 %v783_v53, %v783_v53  ;;  %794 = vadd.xlane.f32.xlu1 %v793_v54 }
 0x379   : > { %v796_v57 = vadd.f32 %v789_v56, %v788_v55 }
 0x37b   : > { %797 = vadd.xlane.f32.xlu0 %v796_v57 }
 0x388   : > { %3382 = vrot.lane.b32.xlu1 %v4026_v5, %s3674_s27 }
 0x391   : > { %3377 = vrot.lane.b32.xlu0 %v4040_v6, %s3672_s25 }
 0x400   : > { %v792_v7 = vpop.xlane.xlu0 %791 }
 0x404   : > { %v795_v10 = vpop.xlane.xlu1 %794 }
 0x405   : > { %v3307_v12 = vpack.c.bf16 %v795_v10, %v792_v7  ;;  %v910_v7 = vld [vmem:[%s6096_s4] sm:$0xff]  ;;  %v911_v10 = vld [vmem:[%s6096_s4 + $0x8] sm:$0xff] }
 0x407   : > { %3308 = vmatpush3.bf16.msra.mxu1 %v3307_v12 }
 0x408   : > { %v798_v48 = vpop.xlane.xlu0 %797  ;;  %v3383_v14 = vpop.permute.xlu1 %3382  ;;  %3282 = vmatprep.subr.mxu1 %v6105_v24 }
 0x409   : > { %v3385_v15 = vunpack.i.h.bf16 %v3383_v14  ;;  %v3384_v16 = vunpack.i.l.bf16 %v3383_v14 }
 0x40b   : > { %v1000_v19 = vsel %vm474_vm2, %v3384_v16, %v3385_v15  ;;  %v1001_v20 = vsel %vm474_vm2, %v3385_v15, %v3384_v16  ;;  %3283 = vmatpush3.msra.mxu1 %v798_v48  ;;  %v3237_v16 = vadd.f32 -4.0, %v3798_v22 }
 0x40c   : > { %v4054_v23 = vsel %vm994_vm3, %v1000_v19, %v4016_v60  ;;  %v4057_v25 = vsel %vm995_vm5, %v1001_v20, %v4020_v61  ;;  %v3378_v26 = vpop.permute.xlu0 %3377  ;;  %3285 = vmatmul.mubr.msk.f32.vlgmr.msra.gmra.mrb[6].mxu1 %vm673_vm15, %v3972_v28  ;;  %3293 = vmatprep.subr.mxu1 %v6105_v24  ;;  %vm1075_vm3 = vcmp.ge.f32.partialorder %v3238_v4, 0.0 }
 0x40d   : > { %6312 = vst [vmem:[#allocation10_spill] sm:$0xff] %v4054_v23  ;;  %6313 = vst [vmem:[#allocation11_spill] sm:$0xff] %v4057_v25  ;;  %v3380_v27 = vunpack.i.h.bf16 %v3378_v26  ;;  %v3379_v29 = vunpack.i.l.bf16 %v3378_v26  ;;  %v4064_v32 = vpack.i.bf16 %v4057_v25, %v4054_v23  ;;  %3287 = vmatprep.mubr.msk.f32.mxu1 %vm3680_vm10, %v6105_v24  ;;  %vm1074_vm8 = vcmp.ge.f32.partialorder %v3237_v16, 0.0 }
 0x40f   : > { %v1016_v33 = vsel %vm461_vm1, %v3379_v29, %v3380_v27  ;;  %v1017_v34 = vsel %vm461_vm1, %v3380_v27, %v3379_v29  ;;  %3392 = vrot.lane.b32.xlu0 %v4064_v32, %s3674_s27 }
 0x410   : > { %v4075_v28 = vsel %vm1010_vm4, %v1017_v34, %v4032_v63  ;;  %v4078_v35 = vsel %vm1011_vm6, %v1016_v33, %v4036_v0  ;;  %3288 = vmatmul.mubr.msk.f32.gmra.mrb[8].mxu1 %vm673_vm15, %v3981_v30  ;;  %v1025_v30 = vadd.f32 3.0, %v3796_v21  ;;  %vm1151_vm4 = vcmp.lt.s32.totalorder %v3786_v9, 64 }
 0x411   : > { %6314 = vst [vmem:[#allocation12_spill] sm:$0xff] %v4075_v28  ;;  %6315 = vst [vmem:[#allocation13_spill] sm:$0xff] %v4078_v35  ;;  %v4084_v36 = vpack.i.bf16 %v4078_v35, %v4075_v28  ;;  %3290 = vmatprep.mubr.msk.f32.mxu1 %vm3680_vm10, %v6105_v24  ;;  %vm1182_vm6 = vcmp.lt.s32.totalorder %v3786_v9, 48 }
 0x412   : > { %vm1027_vm13 = vcmp.le.f32.partialorder %v1025_v30, 15.0 }
 0x413   : > { %3387 = vrot.lane.b32.xlu1 %v4084_v36, %s3672_s25 }
 0x414   : > { %3291 = vmatmul.mubr.msk.f32.gmra.mrb[10].mxu1 %vm673_vm15, %v3990_v31  ;;  %vm1042_vm15 = vcmp.ge.f32.partialorder %v3235_v41, 0.0  ;;  %v1056_v41 = vadd.f32 4.0, %v3798_v22 }
 0x415   : > { %3295 = vmatprep.mubr.msk.f32.mxu1 %vm3680_vm10, %v6105_v24 }
 0x481   : > { %v3393_v38 = vpop.permute.xlu0 %3392 }
 0x482   : > { %v3395_v42 = vunpack.i.h.bf16 %v3393_v38  ;;  %v3394_v44 = vunpack.i.l.bf16 %v3393_v38 }
 0x484   : > { %v1032_v49 = vsel %vm474_vm2, %v3394_v44, %v3395_v42  ;;  %v1033_v31 = vsel %vm474_vm2, %v3395_v42, %v3394_v44  ;;  %v1057_v42 = vadd.f32 4.0, %v3796_v21 }
 0x485   : > { %v4103_v50 = vsel %vm1026_vm9, %v1032_v49, %v4054_v23  ;;  %v4106_v51 = vsel %vm1027_vm13, %v1033_v31, %v4057_v25  ;;  %v3388_v52 = vpop.permute.xlu1 %3387  ;;  %vm1213_vm9 = vcmp.lt.s32.totalorder %v3786_v9, 32  ;;  %vm6343_vm13 = vcmp.lt.s32.totalorder %v3786_v9, 16 }
 0x486   : > { %6316 = vst [vmem:[#allocation14_spill] sm:$0xff] %v4103_v50  ;;  %6317 = vst [vmem:[#allocation15_spill] sm:$0xff] %v4106_v51  ;;  %v3390_v53 = vunpack.i.h.bf16 %v3388_v52  ;;  %v3389_v54 = vunpack.i.l.bf16 %v3388_v52  ;;  %v4110_v55 = vpack.i.bf16 %v4106_v51, %v4103_v50  ;;  %vm1059_vm5 = vcmp.le.f32.partialorder %v1057_v42, 15.0 }
 0x488   : > { %v1048_v56 = vsel %vm461_vm1, %v3389_v54, %v3390_v53  ;;  %v1049_v57 = vsel %vm461_vm1, %v3390_v53, %v3389_v54  ;;  %3402 = vrot.lane.b32.xlu0 %v4110_v55, %s3674_s27 }
 0x489   : > { %v4119_v58 = vsel %vm1042_vm15, %v1049_v57, %v4075_v28  ;;  %v4122_v59 = vsel %vm1043_vm14, %v1048_v56, %v4078_v35  ;;  %vm6344_vm15 = vmmov %vm6343_vm13 }
 0x48a   : > { %6318 = vst [vmem:[#allocation16_spill] sm:$0xff] %v4119_v58  ;;  %6319 = vst [vmem:[#allocation17_spill] sm:$0xff] %v4122_v59  ;;  %v4129_v3 = vpack.i.bf16 %v4122_v59, %v4119_v58 }
 0x48b   : > { %vm6345_vm14 = vmmov %vm6343_vm13 }
 0x48c   : > { %3397 = vrot.lane.b32.xlu1 %v4129_v3, %s3672_s25  ;;  %898 = vperm.xlu0 %3374, %v894_v62   ;;  %s3682_s25 = smov 80  }
 0x490   : > { %914 = vperm.xlu1 %3375, %v910_v7   ;;  %919 = vperm.xlu0 %3374, %v911_v10  }
 0x494   : > { %903 = vperm.xlu1 %3375, %v895_v11  }
 0x4df   : > { %v865_v12 = vpop.f32.mrb[6].mxu1 }
 0x4e0   : > { %v3286_v13 = vpop.f32.mrb[7].mxu1  ;;  %v866_v30 = vadd.f32 1e-05, %v865_v12 }
 0x4e2   : > { %3648 = vrsqrt.f32 %v866_v30  ;;  %v4290_v30 = vadd.f32 -5.0, %v3792_v18 }
 0x4e3   : > { %v870_v48 = vpop.f32.mrb[8].mxu1 }
 0x4e4   : > { %v3289_v14 = vpop.f32.mrb[9].mxu1  ;;  %v871_v49 = vadd.f32 1e-05, %v870_v48  ;;  %6325 = vst [vmem:[#allocation23_spill] sm:$0xff] %v4290_v30 }
 0x4e5   : > { %v1124_v14 = vshrl.u32 %v390_v8, 7  ;;  %v4278_v8 = vadd.f32 -3.0, %v3792_v18 }
 0x4e6   : > { %3650 = vrsqrt.f32 %v871_v49 }
 0x4e7   : > { %v875_v43 = vpop.f32.mrb[10].mxu1  ;;  %v4266_v16 = vsub.s32 3, %v1124_v14  ;;  %v4268_v4 = vsub.s32 5, %v1124_v14  ;;  %v4304_v14 = vadd.f32 -1.0, %v3790_v17 }
 0x4e8   : > { %v3292_v15 = vpop.f32.mrb[11].mxu1 }
 0x4e9   : > { %6322 = vst [vmem:[#allocation20_spill] sm:$0xff] %v4266_v16  ;;  %6323 = vst [vmem:[#allocation21_spill] sm:$0xff] %v4268_v4 }
 0x4ea   : > { %6329 = vst [vmem:[#allocation27_spill] sm:$0xff] %v4304_v14 }
 0x4ec   : > { %v3649_v21 = vpop.eup %3648 }
 0x4f0   : > { %v3651_v56 = vpop.eup %3650 }
 0x4fa   : > { %v3403_v38 = vpop.permute.xlu0 %3402 }
 0x4fb   : > { %v3405_v44 = vunpack.i.h.bf16 %v3403_v38  ;;  %v3404_v47 = vunpack.i.l.bf16 %v3403_v38  ;;  %v4293_v38 = vadd.f32 -4.0, %v3790_v17 }
 0x4fd   : > { %v1064_v31 = vsel %vm474_vm2, %v3404_v47, %v3405_v44  ;;  %v1065_v52 = vsel %vm474_vm2, %v3405_v44, %v3404_v47  ;;  %vm1120_vm2 = vcmp.lt.s32.totalorder %v3786_v9, 80  ;;  %6326 = vst [vmem:[#allocation24_spill] sm:$0xff] %v4293_v38  ;;  %v4296_v44 = vadd.f32 -5.0, %v3790_v17 }
 0x4fe   : > { %v3398_v19 = vpop.permute.xlu1 %3397  ;;  %v4185_v53 = vsel %vm1059_vm5, %v1065_v52, %v4106_v51  ;;  %v4299_v47 = vadd.f32 -1.0, %v3792_v18 }
 0x4ff   : > { %v3400_v20 = vunpack.i.h.bf16 %v3398_v19  ;;  %v3399_v26 = vunpack.i.l.bf16 %v3398_v19  ;;  %6321 = vst [vmem:[#allocation19_spill] sm:$0xff] %v4185_v53  ;;  %v4275_v19 = vadd.f32 -2.0, %v3792_v18  ;;  %6327 = vst [vmem:[#allocation25_spill] sm:$0xff] %v4296_v44 }
 0x500   : > { %6328 = vst [vmem:[#allocation26_spill] sm:$0xff] %v4299_v47 }
 0x501   : > { %v1080_v27 = vsel %vm461_vm1, %v3399_v26, %v3400_v20  ;;  %v1081_v29 = vsel %vm461_vm1, %v3400_v20, %v3399_v26  ;;  %vm1058_vm1 = vcmp.le.f32.partialorder %v1056_v41, 15.0  ;;  %v4281_v20 = vadd.f32 -3.0, %v3790_v17 }
 0x502   : > { %v4149_v33 = vsel %vm1074_vm8, %v1081_v29, %v4119_v58  ;;  %v4152_v34 = vsel %vm1075_vm3, %v1080_v27, %v4122_v59  ;;  %v4182_v22 = vsel %vm1058_vm1, %v1064_v31, %v4103_v50  ;;  %v4284_v26 = vadd.f32 -2.0, %v3790_v17  ;;  %vm6347_vm8 = vmmov %vm6343_vm13 }
 0x503   : > { %v3406_v37 = vpack.i.bf16 %v4152_v34, %v4149_v33  ;;  %6320 = vst [vmem:[#allocation18_spill] sm:$0xff] %v4182_v22  ;;  %v3481_v54 = vpack.i.bf16 %v4185_v53, %v4182_v22  ;;  %v4287_v27 = vadd.f32 -4.0, %v3792_v18  ;;  %vm6375_vm3 = vmmov %vm6347_vm8 }
 0x505   : > { %3407 = vrot.lane.b32.xlu1 %v3406_v37, %s3682_s25  ;;  %3412 = vrot.lane.b32.xlu0 %v3406_v37, %s3683_s26  ;;  %6324 = vst [vmem:[#allocation22_spill] sm:$0xff] %v4287_v27 }
 0x509   : > { %3417 = vrot.lane.b32.xlu1 %v3406_v37, %s3684_s29  ;;  %3422 = vrot.lane.b32.xlu0 %v4129_v3, %s3683_s26 }
 0x50d   : > { %3427 = vrot.lane.b32.xlu1 %v4129_v3, %s3684_s29  ;;  %3432 = vrot.lane.b32.xlu0 %v3406_v37, %s3685_s30 }
 0x50f   : > { %v4249_v57 = vpop.permute.xlu1 %914 }
 0x511   : > { %3437 = vrot.lane.b32.xlu1 %v4129_v3, %s3685_s30  ;;  %3442 = vrot.lane.b32.xlu0 %v3406_v37, %s3670_s23 }
 0x513   : > { %v4253_v62 = vpop.permute.xlu1 %903 }
 0x515   : > { %3447 = vrot.lane.b32.xlu1 %v4129_v3, %s3670_s23  ;;  %3452 = vrot.lane.b32.xlu0 %v4110_v55, %s3683_s26 }
 0x519   : > { %3457 = vrot.lane.b32.xlu1 %v4110_v55, %s3684_s29  ;;  %3462 = vrot.lane.b32.xlu0 %v4084_v36, %s3684_s29 }
 0x51d   : > { %3472 = vrot.lane.b32.xlu0 %v4110_v55, %s3685_s30  ;;  %882 = vperm.xlu1 %3375, %v3649_v21  }
 0x521   : > { %3482 = vrot.lane.b32.xlu0 %v3481_v54, %s3683_s26  ;;  %3467 = vrot.lane.b32.xlu1 %v4084_v36, %s3685_s30  ;;  %s386_s26 = scalar_lea.vmem %s6103_s11, %s3246_s22 }
 0x525   : > { %3492 = vrot.lane.b32.xlu0 %v4129_v3, %s3675_s28  ;;  %3477 = vrot.lane.b32.xlu1 %v3481_v54, %s3682_s25 }
 0x529   : > { %3487 = vrot.lane.b32.xlu1 %v3406_v37, %s3675_s28  ;;  %887 = vperm.xlu0 %3374, %v3651_v56  }
 0x52d   : > { %3497 = vrot.lane.b32.xlu1 %v4084_v36, %s3670_s23  ;;  %3502 = vrot.lane.b32.xlu0 %v4040_v6, %s3685_s30 }
 0x531   : > { %3507 = vrot.lane.b32.xlu1 %v4040_v6, %s3670_s23  ;;  %3512 = vrot.lane.b32.xlu0 %v4110_v55, %s3670_s23 }
 0x535   : > { %3517 = vrot.lane.b32.xlu1 %v3481_v54, %s3684_s29  ;;  %3522 = vrot.lane.b32.xlu0 %v3406_v37, %s3686_s12 }
 0x539   : > { %3527 = vrot.lane.b32.xlu1 %v4129_v3, %s3686_s12  ;;  %3532 = vrot.lane.b32.xlu0 %v4064_v32, %s3684_s29 }
 0x53d   : > { %3537 = vrot.lane.b32.xlu1 %v4064_v32, %s3685_s30  ;;  %3542 = vrot.lane.b32.xlu0 %v3481_v54, %s3685_s30 }
 0x541   : > { %3547 = vrot.lane.b32.xlu1 %v4129_v3, %s3682_s25  ;;  %3552 = vrot.lane.b32.xlu0 %v4084_v36, %s3675_s28 }
 0x545   : > { %3557 = vrot.lane.b32.xlu1 %v4040_v6, %s3675_s28  ;;  %3562 = vrot.lane.b32.xlu0 %v4026_v5, %s3685_s30 }
 0x549   : > { %3567 = vrot.lane.b32.xlu1 %v4026_v5, %s3670_s23  ;;  %3572 = vrot.lane.b32.xlu0 %v4064_v32, %s3670_s23 }
 0x54d   : > { %3577 = vrot.lane.b32.xlu1 %v4110_v55, %s3675_s28  ;;  %3582 = vrot.lane.b32.xlu0 %v3481_v54, %s3670_s23 }
 0x551   : > { %3587 = vrot.lane.b32.xlu1 %v4084_v36, %s3686_s12  ;;  %3592 = vrot.lane.b32.xlu0 %v4040_v6, %s3686_s12  ;;  %v2912_v6 = vld [vmem:[%s6099_s7] sm:$0xff] }
 0x555   : > { %3597 = vrot.lane.b32.xlu1 %v4110_v55, %s3686_s12  ;;  %3602 = vrot.lane.b32.xlu0 %v4084_v36, %s3682_s25  ;;  %v4247_v36 = vpop.permute.xlu0 %898 }
 0x559   : > { %3607 = vrot.lane.b32.xlu1 %v4026_v5, %s3675_s28  ;;  %3612 = vrot.lane.b32.xlu0 %v4064_v32, %s3675_s28 }
 0x55d   : > { %3617 = vrot.lane.b32.xlu1 %v4110_v55, %s3682_s25  ;;  %3622 = vrot.lane.b32.xlu0 %v3481_v54, %s3675_s28  ;;  %v4251_v55 = vpop.permute.xlu0 %919 }
 0x561   : > { %3627 = vrot.lane.b32.xlu1 %v4026_v5, %s3686_s12  ;;  %3632 = vrot.lane.b32.xlu0 %v4064_v32, %s3686_s12 }
 0x565   : > { %3637 = vrot.lane.b32.xlu1 %v3481_v54, %s3686_s12  ;;  %3642 = vrot.lane.b32.xlu0 %v4064_v32, %s3682_s25 }
 0x569   : > { %2915 = vperm.xlu1 %3375, %v2912_v6  }
 0x577   : > { %v3413_v5 = vpop.permute.xlu0 %3412  ;;  %v3408_v3 = vpop.permute.xlu1 %3407 }
 0x578   : > { %v3410_v29 = vunpack.i.h.bf16 %v3408_v3  ;;  %v3409_v37 = vunpack.i.l.bf16 %v3408_v3  ;;  %v3415_v41 = vunpack.i.h.bf16 %v3413_v5  ;;  %v3414_v42 = vunpack.i.l.bf16 %v3413_v5 }
 0x579   : > { %v4307_v5 = vadd.f32 1.0, %v3792_v18 }
 0x57a   : > { %v4311_v24 = vsel %vm1120_vm2, %v3409_v37, %v3410_v29  ;;  %v4328_v25 = vsel %vm1151_vm4, %v3415_v41, %v3414_v42 }
 0x57b   : > { %v3423_v7 = vpop.permute.xlu0 %3422  ;;  %v3418_v10 = vpop.permute.xlu1 %3417  ;;  %6330 = vst [vmem:[#allocation28_spill] sm:$0xff] %v4307_v5  ;;  %6331 = vst [vmem:[#allocation29_spill] sm:$0xff] %v4311_v24 }
 0x57c   : > { %v3420_v49 = vunpack.i.h.bf16 %v3418_v10  ;;  %v3419_v31 = vunpack.i.l.bf16 %v3418_v10  ;;  %v3425_v52 = vunpack.i.h.bf16 %v3423_v7  ;;  %v3424_v21 = vunpack.i.l.bf16 %v3423_v7  ;;  %6334 = vst [vmem:[#allocation32_spill] sm:$0xff] %v4328_v25 }
 0x57d   : > { %v4314_v10 = vadd.f32 1.0, %v3790_v17  ;;  %v4318_v7 = vsel %vm1120_vm2, %v3410_v29, %v3409_v37 }
 0x57e   : > { %6333 = vst [vmem:[#allocation31_spill] sm:$0xff] %v4318_v7  ;;  %v4336_v29 = vsel %vm1182_vm6, %v3420_v49, %v3419_v31  ;;  %v4340_v37 = vsel %vm1151_vm4, %v3424_v21, %v3425_v52 }
 0x57f   : > { %v3433_v11 = vpop.permute.xlu0 %3432  ;;  %v3428_v12 = vpop.permute.xlu1 %3427  ;;  %6332 = vst [vmem:[#allocation30_spill] sm:$0xff] %v4314_v10  ;;  %6336 = vst [vmem:[#allocation34_spill] sm:$0xff] %v4336_v29 }
 0x580   : > { %v3430_v6 = vunpack.i.h.bf16 %v3428_v12  ;;  %v3429_v3 = vunpack.i.l.bf16 %v3428_v12  ;;  %v3435_v2 = vunpack.i.h.bf16 %v3433_v11  ;;  %v3434_v1 = vunpack.i.l.bf16 %v3433_v11  ;;  %6337 = vst [vmem:[#allocation35_spill] sm:$0xff] %v4340_v37 }
 0x581   : > { %v4322_v12 = vsel %vm1151_vm4, %v3414_v42, %v3415_v41  ;;  %v4332_v11 = vsel %vm1182_vm6, %v3419_v31, %v3420_v49 }
 0x582   : > { %6335 = vst [vmem:[#allocation33_spill] sm:$0xff] %v4332_v11  ;;  %v4348_v41 = vsel %vm1182_vm6, %v3429_v3, %v3430_v6  ;;  %v4354_v49 = vsel %vm1182_vm6, %v3430_v6, %v3429_v3  ;;  %v4358_v31 = vsel %vm1213_vm9, %v3434_v1, %v3435_v2  ;;  %v4364_v51 = vsel %vm1213_vm9, %v3435_v2, %v3434_v1 }
 0x583   : > { %v4255_v32 = vpop.permute.xlu0 %3442  ;;  %v4257_v13 = vpop.permute.xlu1 %3437  ;;  %6339 = vst [vmem:[#allocation37_spill] sm:$0xff] %v4348_v41  ;;  %6340 = vst [vmem:[#allocation38_spill] sm:$0xff] %v4354_v49  ;;  %v4451_v49 = vadd.f32 2.0, %v3792_v18 }
 0x584   : > { %v3440_v53 = vunpack.i.h.bf16 %v4257_v13  ;;  %v3439_v22 = vunpack.i.l.bf16 %v4257_v13  ;;  %v4344_v13 = vsel %vm1151_vm4, %v3425_v52, %v3424_v21  ;;  %v3445_v60 = vunpack.i.h.bf16 %v4255_v32 }
 0x585   : > { %6338 = vst [vmem:[#allocation36_spill] sm:$0xff] %v4344_v13  ;;  %v3444_v52 = vunpack.i.l.bf16 %v4255_v32  ;;  %6359 = vst [vmem:[#allocation53_spill] sm:$0xff] %v4451_v49 }
 0x587   : > { %v4259_v48 = vpop.permute.xlu0 %3452  ;;  %v4262_v43 = vpop.permute.xlu1 %3447 }
 0x588   : > { %v3450_v6 = vunpack.i.h.bf16 %v4262_v43  ;;  %v3449_v3 = vunpack.i.l.bf16 %v4262_v43  ;;  %v3455_v50 = vunpack.i.h.bf16 %v4259_v48  ;;  %v3454_v32 = vunpack.i.l.bf16 %v4259_v48 }
 0x589   : > { %v4390_v48 = vsel %vm6344_vm15, %v3445_v60, %v3444_v52 }
 0x58b   : > { %v4264_v15 = vpop.permute.xlu0 %3462  ;;  %v3458_v54 = vpop.permute.xlu1 %3457 }
 0x58c   : > { %v3460_v63 = vunpack.i.h.bf16 %v3458_v54  ;;  %v3459_v1 = vunpack.i.l.bf16 %v3458_v54  ;;  %v3464_v43 = vunpack.i.l.bf16 %v4264_v15 }
 0x58f   : > { %v4301_v56 = vpop.permute.xlu0 %3472 }
 0x590   : > { %v3475_v54 = vunpack.i.h.bf16 %v4301_v56 }
 0x593   : > { %v3483_v21 = vpop.permute.xlu0 %3482 }
 0x59c   : > { %v883_v23 = vpop.permute.xlu1 %882 }
 0x59d   : > { %v890_v42 = vmul.f32 %v883_v23, %v3996_v39  ;;  %v891_v61 = vmul.f32 %v883_v23, %v3998_v40  ;;  %v4368_v39 = vsel %vm1213_vm9, %v3439_v22, %v3440_v53 }
 0x59e   : > { %6341 = vst [vmem:[#allocation39_spill] sm:$0xff] %v4368_v39 }
 0x59f   : > { %v906_v40 = vmul.f32 %v4247_v36, %v890_v42  ;;  %v907_v23 = vmul.f32 %v4247_v36, %v891_v61  ;;  %v4380_v42 = vsel %vm1213_vm9, %v3440_v53, %v3439_v22  ;;  %v4384_v61 = vsel %vm6343_vm13, %v3444_v52, %v3445_v60 }
 0x5a0   : > { %v3468_v0 = vpop.permute.xlu1 %3467  ;;  %6342 = vst [vmem:[#allocation40_spill] sm:$0xff] %v4380_v42  ;;  %v3465_v36 = vunpack.i.h.bf16 %v4264_v15  ;;  %v4396_v22 = vsel %vm6345_vm14, %v3449_v3, %v3450_v6  ;;  %v3485_v53 = vunpack.i.h.bf16 %v3483_v21  ;;  %v4400_v15 = vsel %vm6347_vm8, %v3450_v6, %v3449_v3 }
 0x5a1   : > { %v922_v2 = vadd.f32 %v4249_v57, %v906_v40  ;;  %v923_v35 = vadd.f32 %v4249_v57, %v907_v23  ;;  %v3474_v57 = vunpack.i.l.bf16 %v4301_v56  ;;  %6346 = vst [vmem:[#allocation41_spill] sm:$0xff] %v4396_v22  ;;  %v3484_v40 = vunpack.i.l.bf16 %v3483_v21  ;;  %v3493_v23 = vpop.permute.xlu0 %3492  ;;  %6348 = vst [vmem:[#allocation42_spill] sm:$0xff] %v4400_v15 }
 0x5a2   : > { %v4404_v60 = vsel %vm1151_vm4, %v3454_v32, %v3455_v50  ;;  %v4408_v56 = vsel %vm1151_vm4, %v3455_v50, %v3454_v32  ;;  %v4412_v52 = vsel %vm1182_vm6, %v3459_v1, %v3460_v63  ;;  %v4420_v21 = vsel %vm1182_vm6, %v3464_v43, %v3465_v36 }
 0x5a3   : > { %3652 = vtanh.f32 %v922_v2  ;;  %6349 = vst [vmem:[#allocation43_spill] sm:$0xff] %v4404_v60  ;;  %6350 = vst [vmem:[#allocation44_spill] sm:$0xff] %v4408_v56  ;;  %v4424_v6 = vsel %vm1182_vm6, %v3465_v36, %v3464_v43  ;;  %v4427_v3 = vadd.f32 5.0, %v3792_v18  ;;  %v4431_v50 = vsel %vm1213_vm9, %v3474_v57, %v3475_v54 }
 0x5a4   : > { %3654 = vtanh.f32 %v923_v35  ;;  %v3478_v28 = vpop.permute.xlu1 %3477  ;;  %6351 = vst [vmem:[#allocation45_spill] sm:$0xff] %v4412_v52  ;;  %v4416_v35 = vsel %vm1182_vm6, %v3460_v63, %v3459_v1  ;;  %6354 = vst [vmem:[#allocation48_spill] sm:$0xff] %v4431_v50  ;;  %v3495_v32 = vunpack.i.h.bf16 %v3493_v23  ;;  %v3494_v2 = vunpack.i.l.bf16 %v3493_v23 }
 0x5a5   : > { %6352 = vst [vmem:[#allocation46_spill] sm:$0xff] %v4416_v35  ;;  %6353 = vst [vmem:[#allocation47_spill] sm:$0xff] %v4427_v3  ;;  %v4434_v63 = vadd.f32 5.0, %v3790_v17  ;;  %v4438_v1 = vsel %vm1213_vm9, %v3475_v54, %v3474_v57  ;;  %v4442_v36 = vsel %vm1151_vm4, %v3484_v40, %v3485_v53  ;;  %v3470_v43 = vunpack.i.h.bf16 %v3468_v0 }
 0x5a6   : > { %6356 = vst [vmem:[#allocation50_spill] sm:$0xff] %v4438_v1  ;;  %6357 = vst [vmem:[#allocation51_spill] sm:$0xff] %v4442_v36  ;;  %v3469_v59 = vunpack.i.l.bf16 %v3468_v0  ;;  %v3480_v15 = vunpack.i.h.bf16 %v3478_v28  ;;  %v3479_v39 = vunpack.i.l.bf16 %v3478_v28  ;;  %v4448_v41 = vsel %vm1151_vm4, %v3485_v53, %v3484_v40 }
 0x5a7   : > { %6355 = vst [vmem:[#allocation49_spill] sm:$0xff] %v4434_v63  ;;  %6358 = vst [vmem:[#allocation52_spill] sm:$0xff] %v4448_v41  ;;  %v4455_v0 = vsel %vm504_vm11, %v3494_v2, %v3495_v32  ;;  %v4473_v53 = vadd.f32 4.0, %v3792_v18 }
 0x5a8   : > { %v3488_v58 = vpop.permute.xlu1 %3487  ;;  %v888_v22 = vpop.permute.xlu0 %887  ;;  %6360 = vst [vmem:[#allocation54_spill] sm:$0xff] %v4455_v0 }
 0x5a9   : > { %v892_v42 = vmul.f32 %v888_v22, %v4004_v45  ;;  %v893_v23 = vmul.f32 %v888_v22, %v4006_v46  ;;  %v3490_v54 = vunpack.i.h.bf16 %v3488_v58  ;;  %v3489_v57 = vunpack.i.l.bf16 %v3488_v58  ;;  %6365 = vst [vmem:[#allocation59_spill] sm:$0xff] %v4473_v53 }
 0x5aa   : > { %v4460_v45 = vadd.f32 2.0, %v3790_v17  ;;  %v4464_v46 = vsel %vm504_vm11, %v3495_v32, %v3494_v2  ;;  %v4467_v58 = vadd.f32 3.0, %v3792_v18  ;;  %v4470_v22 = vadd.f32 3.0, %v3790_v17 }
 0x5ab   : > { %v908_v37 = vmul.f32 %v4253_v62, %v892_v42  ;;  %v909_v28 = vmul.f32 %v4253_v62, %v893_v23  ;;  %6362 = vst [vmem:[#allocation56_spill] sm:$0xff] %v4464_v46  ;;  %v4479_v62 = vsel %vm1213_vm9, %v3469_v59, %v3470_v43  ;;  %v4483_v42 = vsel %vm1213_vm9, %v3470_v43, %v3469_v59 }
 0x5ac   : > { %6361 = vst [vmem:[#allocation55_spill] sm:$0xff] %v4460_v45  ;;  %6363 = vst [vmem:[#allocation57_spill] sm:$0xff] %v4467_v58  ;;  %v4487_v32 = vsel %vm1120_vm2, %v3479_v39, %v3480_v15  ;;  %v4491_v2 = vsel %vm1120_vm2, %v3480_v15, %v3479_v39  ;;  %v4493_v23 = vpop.permute.xlu1 %3497  ;;  %v4500_v13 = vsel %vm504_vm11, %v3489_v57, %v3490_v54 }
 0x5ad   : > { %6364 = vst [vmem:[#allocation58_spill] sm:$0xff] %v4470_v22  ;;  %v4475_v40 = vpop.eup %3652  ;;  %6367 = vst [vmem:[#allocation61_spill] sm:$0xff] %v4487_v32  ;;  %v4504_v59 = vsel %vm504_vm11, %v3490_v54, %v3489_v57  ;;  %v924_v15 = vadd.f32 %v4251_v55, %v908_v37  ;;  %v4511_v22 = vadd.f32 %v4251_v55, %v909_v28 }
 0x5ae   : > { %6366 = vst [vmem:[#allocation60_spill] sm:$0xff] %v4475_v40  ;;  %6368 = vst [vmem:[#allocation62_spill] sm:$0xff] %v4491_v2  ;;  %v4495_v46 = vpop.eup %3654  ;;  %v940_v0 = vrot.slane %v4475_v40, 7  ;;  %v934_v43 = vrot.slane %v4475_v40, 1  ;;  %v952_v45 = vrot.slane %v4475_v40, 6  ;;  %v966_v55 = vrot.slane %v4475_v40, 5 }
 0x5af   : > { %6369 = vst [vmem:[#allocation63_spill] sm:$0xff] %v4493_v23  ;;  %6370 = vst [vmem:[#allocation64_spill] sm:$0xff] %v4495_v46  ;;  %v941_v53 = vrot.slane %v4495_v46, 7  ;;  %v935_v39 = vrot.slane %v4495_v46, 1  ;;  %v953_v63 = vrot.slane %v4495_v46, 6  ;;  %v947_v1 = vrot.slane %v4495_v46, 2 }
 0x5b0   : > { %v944_v58 = vadd.f32 %v4475_v40, %v940_v0  ;;  %v938_v49 = vadd.f32 %v4475_v40, %v934_v43  ;;  %v967_v43 = vrot.slane %v4495_v46, 5  ;;  %3656 = vtanh.f32 %v924_v15 }
 0x5b1   : > { %v945_v57 = vadd.f32 %v4495_v46, %v941_v53  ;;  %v4520_v3 = vadd.f32 %v4495_v46, %v935_v39  ;;  %3658 = vtanh.f32 %v4511_v22 }
 0x5b2   : > { %v956_v36 = vadd.f32 %v952_v45, %v944_v58  ;;  %v1671_v0 = vadd.f32 %v944_v58, %v3792_v18  ;;  %v2111_v28 = vadd.f32 %v938_v49, %v3792_v18  ;;  %v946_v45 = vrot.slane %v4475_v40, 2 }
 0x5b3   : > { %v957_v41 = vadd.f32 %v953_v63, %v945_v57  ;;  %v1672_v54 = vadd.f32 %v945_v57, %v3790_v17  ;;  %v2112_v53 = vadd.f32 %v4520_v3, %v3790_v17 }
 0x5b4   : > { %v970_v32 = vadd.f32 %v966_v55, %v956_v36  ;;  %v1415_v39 = vadd.f32 %v956_v36, %v3792_v18  ;;  %v1673_v2 = vmax.f32 %v1671_v0, 0.0  ;;  %v2113_v57 = vmax.f32 %v2111_v28, 0.0 }
 0x5b5   : > { %v971_v37 = vadd.f32 %v967_v43, %v957_v41  ;;  %v1416_v50 = vadd.f32 %v957_v41, %v3790_v17  ;;  %v1674_v58 = vmax.f32 %v1672_v54, 0.0  ;;  %v2114_v55 = vmax.f32 %v2112_v53, 0.0 }
 0x5b6   : > { %v1088_v63 = vadd.f32 %v970_v32, %v3792_v18  ;;  %v1417_v52 = vmax.f32 %v1415_v39, 0.0  ;;  %v1675_v35 = vmin.f32 %v1673_v2, 15.0  ;;  %v4540_v54 = vadd.f32 %v946_v45, %v938_v49 }
 0x5b7   : > { %v1089_v60 = vadd.f32 %v971_v37, %v3790_v17  ;;  %v1676_v56 = vmin.f32 %v1674_v58, 15.0  ;;  %v1418_v0 = vmax.f32 %v1416_v50, 0.0  ;;  %v6373_v32 = vunpack.i.h.bf16 %v4493_v23 }
 0x5b8   : > { %v1090_v36 = vmax.f32 %v1088_v63, 0.0  ;;  %v1419_v4 = vmin.f32 %v1417_v52, 15.0  ;;  %v4536_v40 = vfloor.f32 %v1675_v35  ;;  %v6374_v2 = vunpack.i.l.bf16 %v4493_v23 }
 0x5b9   : > { %v1091_v43 = vmax.f32 %v1089_v60, 0.0  ;;  %v4538_v41 = vfloor.f32 %v1676_v56  ;;  %v4554_v50 = vmin.f32 %v2113_v57, 15.0  ;;  %v4560_v39 = vmin.f32 %v2114_v55, 15.0 }
 0x5ba   : > { %6371 = vst [vmem:[#allocation65_spill] sm:$0xff] %v4536_v40  ;;  %v4548_v37 = vsel %vm6375_vm3, %v6374_v2, %v6373_v32  ;;  %v1092_v28 = vmin.f32 %v1090_v36, 15.0  ;;  %v4551_v15 = vsub.f32 %v1675_v35, %v4536_v40  ;;  %v1681_v52 = vadd.f32 1.0, %v4536_v40 }
 0x5bb   : > { %6372 = vst [vmem:[#allocation66_spill] sm:$0xff] %v4538_v41  ;;  %6376 = vst [vmem:[#allocation67_spill] sm:$0xff] %v4548_v37  ;;  %v1093_v60 = vmin.f32 %v1091_v43, 15.0  ;;  %v4557_v49 = vsub.f32 %v1676_v56, %v4538_v41  ;;  %v1682_v53 = vadd.f32 1.0, %v4538_v41  ;;  %v4564_v58 = vmin.f32 %v1418_v0, 15.0 }
 0x5bc   : > { %6377 = vst [vmem:[#allocation68_spill] sm:$0xff] %v4551_v15  ;;  %6379 = vst [vmem:[#allocation70_spill] sm:$0xff] %v4560_v39  ;;  %v4562_v45 = vfloor.f32 %v1092_v28  ;;  %v4566_v63 = vfloor.f32 %v1419_v4  ;;  %v4568_v35 = vmin.f32 %v1681_v52, 15.0  ;;  %vm1685_vm1 = vcmp.eq.f32.partialorder %v4536_v40, %v4278_v8 }
 0x5bd   : > { %6378 = vst [vmem:[#allocation69_spill] sm:$0xff] %v4557_v49  ;;  %v4570_v36 = vfloor.f32 %v1093_v60  ;;  %v4572_v57 = vmin.f32 %v1682_v53, 15.0  ;;  %vm1686_vm5 = vcmp.eq.f32.partialorder %v4538_v41, %v4281_v20  ;;  %v4582_v55 = vsub.f32 1.0, %v4551_v15  ;;  %v4602_v53 = vpop.eup %3656 }
 0x5be   : > { %6380 = vst [vmem:[#allocation71_spill] sm:$0xff] %v4562_v45  ;;  %6381 = vst [vmem:[#allocation72_spill] sm:$0xff] %v4566_v63  ;;  %v4579_v56 = vsub.f32 %v1092_v28, %v4562_v45  ;;  %v4585_v0 = vsub.f32 1.0, %v4557_v49  ;;  %vm1691_vm4 = vcmp.eq.f32.partialorder %v4568_v35, %v4278_v8  ;;  %vm1715_vm15 = vcmp.eq.f32.partialorder %v4536_v40, %v4275_v19 }
 0x5bf   : > { %6382 = vst [vmem:[#allocation73_spill] sm:$0xff] %v4568_v35  ;;  %6383 = vst [vmem:[#allocation74_spill] sm:$0xff] %v4570_v36  ;;  %v4590_v43 = vsub.f32 %v1093_v60, %v4570_v36  ;;  %vm1692_vm13 = vcmp.eq.f32.partialorder %v4572_v57, %v4281_v20  ;;  %v1693_v32 = vsel %vm1691_vm4, %v4551_v15, 0.0  ;;  %v1689_v2 = vsel %vm1685_vm1, %v4582_v55, 0.0 }
 0x5c0   : > { %6384 = vst [vmem:[#allocation75_spill] sm:$0xff] %v4572_v57  ;;  %6385 = vst [vmem:[#allocation76_spill] sm:$0xff] %v4579_v56  ;;  %v1690_v28 = vsel %vm1686_vm5, %v4585_v0, 0.0  ;;  %v1694_v52 = vsel %vm1692_vm13, %v4557_v49, 0.0  ;;  %vm1716_vm14 = vcmp.eq.f32.partialorder %v4538_v41, %v4284_v26  ;;  %v1695_v60 = vadd.f32 %v1693_v32, %v1689_v2 }
 0x5c1   : > { %6386 = vst [vmem:[#allocation77_spill] sm:$0xff] %v4582_v55  ;;  %6387 = vst [vmem:[#allocation78_spill] sm:$0xff] %v4585_v0  ;;  %v4604_v37 = vadd.f32 %v1694_v52, %v1690_v28  ;;  %v1717_v9 = vsel %vm1715_vm15, %v4582_v55, 0.0  ;;  %v1718_v23 = vsel %vm1716_vm14, %v4585_v0, 0.0  ;;  %vm1719_vm8 = vcmp.eq.f32.partialorder %v4568_v35, %v4275_v19 }
 0x5c2   : > { %6388 = vst [vmem:[#allocation79_spill] sm:$0xff] %v4590_v43  ;;  %vm1720_vm3 = vcmp.eq.f32.partialorder %v4572_v57, %v4284_v26  ;;  %v1098_v46 = vadd.f32 1.0, %v4562_v45  ;;  %v1099_v40 = vadd.f32 1.0, %v4570_v36  ;;  %v1706_v41 = vrot.slane %v1695_v60, %v4266_v16  ;;  %v6401_v22 = vld [vmem:[#allocation66_spill] sm:$0xff] }
 0x5c3   : > { %v1721_v32 = vsel %vm1719_vm8, %v4551_v15, 0.0  ;;  %v1722_v2 = vsel %vm1720_vm3, %v4557_v49, 0.0  ;;  %v4618_v28 = vadd.f32 %v947_v1, %v4520_v3  ;;  %v4629_v55 = vfloor.f32 %v4564_v58 }
 0x5c4   : > { %v4620_v52 = vadd.f32 %v1721_v32, %v1717_v9  ;;  %v4622_v0 = vadd.f32 %v1722_v2, %v1718_v23  ;;  %v4624_v35 = vmin.f32 %v1098_v46, 15.0  ;;  %v4626_v57 = vmin.f32 %v1099_v40, 15.0 }
 0x5c5   : > { %6391 = vst [vmem:[#allocation82_spill] sm:$0xff] %v4629_v55  ;;  %v4632_v60 = vsub.f32 %v1419_v4, %v4566_v63  ;;  %v4635_v15 = vfloor.f32 %v4554_v50  ;;  %v4638_v3 = vfloor.f32 %v4560_v39  ;;  %v4643_v1 = vmul.f32 %v1706_v41, %v4424_v6 }
 0x5c6   : > { %6389 = vst [vmem:[#allocation80_spill] sm:$0xff] %v4624_v35  ;;  %6390 = vst [vmem:[#allocation81_spill] sm:$0xff] %v4626_v57  ;;  %v4646_v46 = vsub.f32 1.0, %v4579_v56  ;;  %v4649_v40 = vsub.f32 1.0, %v4590_v43  ;;  %vm1104_vm1 = vcmp.eq.f32.partialorder %v4562_v45, %v4290_v30  ;;  %vm1105_vm5 = vcmp.eq.f32.partialorder %v4570_v36, %v4296_v44 }
 0x5c7   : > { %6392 = vst [vmem:[#allocation83_spill] sm:$0xff] %v4632_v60  ;;  %6393 = vst [vmem:[#allocation84_spill] sm:$0xff] %v4635_v15  ;;  %vm1110_vm4 = vcmp.eq.f32.partialorder %v4624_v35, %v4290_v30  ;;  %vm1111_vm13 = vcmp.eq.f32.partialorder %v4626_v57, %v4296_v44  ;;  %vm1137_vm15 = vcmp.eq.f32.partialorder %v4562_v45, %v4287_v27 }
 0x5c8   : > { %6394 = vst [vmem:[#allocation85_spill] sm:$0xff] %v4638_v3  ;;  %6395 = vst [vmem:[#allocation86_spill] sm:$0xff] %v4646_v46  ;;  %v1108_v23 = vsel %vm1104_vm1, %v4646_v46, 0.0  ;;  %v1109_v41 = vsel %vm1105_vm5, %v4649_v40, 0.0  ;;  %v1112_v32 = vsel %vm1110_vm4, %v4579_v56, 0.0  ;;  %v1113_v2 = vsel %vm1111_vm13, %v4590_v43, 0.0 }
 0x5c9   : > { %6396 = vst [vmem:[#allocation87_spill] sm:$0xff] %v4649_v40  ;;  %vm1138_vm14 = vcmp.eq.f32.partialorder %v4570_v36, %v4293_v38  ;;  %v1114_v9 = vadd.f32 %v1112_v32, %v1108_v23  ;;  %v1115_v60 = vadd.f32 %v1113_v2, %v1109_v41  ;;  %v1139_v4 = vsel %vm1137_vm15, %v4646_v46, 0.0 }
 0x5ca   : > { %v1140_v6 = vsel %vm1138_vm14, %v4649_v40, 0.0  ;;  %vm1141_vm8 = vcmp.eq.f32.partialorder %v4624_v35, %v4287_v27  ;;  %vm1142_vm3 = vcmp.eq.f32.partialorder %v4626_v57, %v4293_v38  ;;  %vm1168_vm1 = vcmp.eq.f32.partialorder %v4562_v45, %v4278_v8 }
 0x5cb   : > { %vm1169_vm5 = vcmp.eq.f32.partialorder %v4570_v36, %v4281_v20  ;;  %v1126_v63 = vrot.slane %v1114_v9, %v4266_v16  ;;  %v1130_v23 = vrot.slane %v1115_v60, %v4266_v16  ;;  %v1143_v41 = vsel %vm1141_vm8, %v4579_v56, 0.0 }
 0x5cc   : > { %v1144_v32 = vsel %vm1142_vm3, %v4590_v43, 0.0  ;;  %v1145_v2 = vadd.f32 %v1143_v41, %v1139_v4  ;;  %v1170_v30 = vsel %vm1168_vm1, %v4646_v46, 0.0  ;;  %v1171_v38 = vsel %vm1169_vm5, %v4649_v40, 0.0 }
 0x5cd   : > { %v1146_v44 = vadd.f32 %v1144_v32, %v1140_v6  ;;  %v1131_v27 = vmul.f32 %v1126_v63, %v4318_v7  ;;  %v1132_v39 = vmul.f32 %v1130_v23, %v4311_v24  ;;  %vm1172_vm4 = vcmp.eq.f32.partialorder %v4624_v35, %v4278_v8 }
 0x5ce   : > { %vm1173_vm13 = vcmp.eq.f32.partialorder %v4626_v57, %v4281_v20  ;;  %v1157_v60 = vrot.slane %v1145_v2, %v4266_v16  ;;  %v1174_v4 = vsel %vm1172_vm4, %v4579_v56, 0.0  ;;  %vm1199_vm15 = vcmp.eq.f32.partialorder %v4562_v45, %v4275_v19 }
 0x5cf   : > { %v1161_v9 = vrot.slane %v1146_v44, %v4266_v16  ;;  %v1175_v6 = vsel %vm1173_vm13, %v4590_v43, 0.0  ;;  %v1176_v41 = vadd.f32 %v1174_v4, %v1170_v30  ;;  %vm1200_vm14 = vcmp.eq.f32.partialorder %v4570_v36, %v4284_v26 }
 0x5d0   : > { %v1177_v32 = vadd.f32 %v1175_v6, %v1171_v38  ;;  %v1162_v63 = vmul.f32 %v1157_v60, %v4328_v25  ;;  %v1201_v2 = vsel %vm1199_vm15, %v4646_v46, 0.0  ;;  %v1202_v44 = vsel %vm1200_vm14, %v4649_v40, 0.0 }
 0x5d1   : > { %v1163_v23 = vmul.f32 %v1161_v9, %v4322_v12  ;;  %v1188_v7 = vrot.slane %v1176_v41, %v4266_v16  ;;  %vm1203_vm8 = vcmp.eq.f32.partialorder %v4624_v35, %v4275_v19  ;;  %vm1204_vm3 = vcmp.eq.f32.partialorder %v4626_v57, %v4284_v26 }
 0x5d2   : > { %v1192_v24 = vrot.slane %v1177_v32, %v4266_v16  ;;  %v1164_v30 = vadd.f32 %v1162_v63, %v1131_v27  ;;  %v1205_v60 = vsel %vm1203_vm8, %v4579_v56, 0.0  ;;  %v1206_v9 = vsel %vm1204_vm3, %v4590_v43, 0.0 }
 0x5d3   : > { %v1165_v38 = vadd.f32 %v1163_v23, %v1132_v39  ;;  %v1193_v4 = vmul.f32 %v1188_v7, %v4336_v29  ;;  %v1207_v25 = vadd.f32 %v1205_v60, %v1201_v2  ;;  %v1208_v41 = vadd.f32 %v1206_v9, %v1202_v44 }
 0x5d4   : > { %v1194_v6 = vmul.f32 %v1192_v24, %v4332_v11  ;;  %vm1230_vm1 = vcmp.eq.f32.partialorder %v4562_v45, %v4299_v47  ;;  %vm1231_vm5 = vcmp.eq.f32.partialorder %v4570_v36, %v4304_v14  ;;  %vm1234_vm4 = vcmp.eq.f32.partialorder %v4624_v35, %v4299_v47 }
 0x5d5   : > { %vm1235_vm13 = vcmp.eq.f32.partialorder %v4626_v57, %v4304_v14  ;;  %v1195_v27 = vadd.f32 %v1193_v4, %v1164_v30  ;;  %v1219_v7 = vrot.slane %v1207_v25, %v4266_v16  ;;  %v1223_v24 = vrot.slane %v1208_v41, %v4266_v16 }
 0x5d6   : > { %v1196_v39 = vadd.f32 %v1194_v6, %v1165_v38  ;;  %v1232_v32 = vsel %vm1230_vm1, %v4646_v46, 0.0  ;;  %v1233_v63 = vsel %vm1231_vm5, %v4649_v40, 0.0  ;;  %v1236_v23 = vsel %vm1234_vm4, %v4579_v56, 0.0 }
 0x5d7   : > { %v1237_v2 = vsel %vm1235_vm13, %v4590_v43, 0.0  ;;  %v1224_v44 = vmul.f32 %v1219_v7, %v4364_v51  ;;  %v1225_v60 = vmul.f32 %v1223_v24, %v4358_v31  ;;  %v1238_v9 = vadd.f32 %v1236_v23, %v1232_v32 }
 0x5d8   : > { %v1239_v11 = vadd.f32 %v1237_v2, %v1233_v63  ;;  %vm1260_vm15 = vcmp.eq.f32.partialorder %v4562_v45, %v3792_v18  ;;  %vm1261_vm14 = vcmp.eq.f32.partialorder %v4570_v36, %v3790_v17  ;;  %vm1264_vm8 = vcmp.eq.f32.partialorder %v4624_v35, %v3792_v18 }
 0x5d9   : > { %vm1265_vm3 = vcmp.eq.f32.partialorder %v4626_v57, %v3790_v17  ;;  %v1226_v25 = vadd.f32 %v1224_v44, %v1195_v27  ;;  %v1227_v30 = vadd.f32 %v1225_v60, %v1196_v39  ;;  %v1249_v51 = vrot.slane %v1238_v9, %v4266_v16 }
 0x5da   : > { %v1253_v31 = vrot.slane %v1239_v11, %v4266_v16  ;;  %v1262_v38 = vsel %vm1260_vm15, %v4646_v46, 0.0  ;;  %v1263_v4 = vsel %vm1261_vm14, %v4649_v40, 0.0  ;;  %v1266_v6 = vsel %vm1264_vm8, %v4579_v56, 0.0 }
 0x5db   : > { %v1267_v41 = vsel %vm1265_vm3, %v4590_v43, 0.0  ;;  %v1254_v7 = vmul.f32 %v1249_v51, %v4390_v48  ;;  %v1268_v32 = vadd.f32 %v1266_v6, %v1262_v38  ;;  %vm1284_vm1 = vcmp.eq.f32.partialorder %v4562_v45, %v4307_v5 }
 0x5dc   : > { %v1255_v24 = vmul.f32 %v1253_v31, %v4384_v61  ;;  %v1269_v63 = vadd.f32 %v1267_v41, %v1263_v4  ;;  %vm1285_vm5 = vcmp.eq.f32.partialorder %v4570_v36, %v4314_v10  ;;  %vm1288_vm4 = vcmp.eq.f32.partialorder %v4624_v35, %v4307_v5 }
 0x5dd   : > { %vm1289_vm13 = vcmp.eq.f32.partialorder %v4626_v57, %v4314_v10  ;;  %v1256_v11 = vadd.f32 %v1254_v7, %v1226_v25  ;;  %v1273_v48 = vrot.slane %v1268_v32, %v4266_v16  ;;  %v1286_v39 = vsel %vm1284_vm1, %v4646_v46, 0.0  ;;  %v6447_v10 = vld [vmem:[#allocation45_spill] sm:$0xff] }
 0x5de   : > { %v1257_v27 = vadd.f32 %v1255_v24, %v1227_v30  ;;  %v1277_v61 = vrot.slane %v1269_v63, %v4266_v16  ;;  %v1287_v23 = vsel %vm1285_vm5, %v4649_v40, 0.0  ;;  %v1290_v2 = vsel %vm1288_vm4, %v4579_v56, 0.0 }
 0x5df   : > { %v1291_v44 = vsel %vm1289_vm13, %v4590_v43, 0.0  ;;  %v1278_v60 = vmul.f32 %v1273_v48, %v4149_v33  ;;  %v1292_v51 = vadd.f32 %v1290_v2, %v1286_v39  ;;  %v6397_v25 = vrot.slane %v4604_v37, %v4266_v16 }
 0x5e0   : > { %v1279_v9 = vmul.f32 %v1277_v61, %v4152_v34  ;;  %v1293_v31 = vadd.f32 %v1291_v44, %v1287_v23  ;;  %v6398_v38 = vrot.slane %v4620_v52, %v4266_v16  ;;  %v2317_v6 = vadd.f32 %v4540_v54, %v3792_v18  ;;  %v6405_v44 = vld [vmem:[#allocation78_spill] sm:$0xff] }
 0x5e1   : > { %v1712_v30 = vmul.f32 %v6397_v25, %v4420_v21  ;;  %v2318_v33 = vadd.f32 %v4618_v28, %v3790_v17  ;;  %v1280_v41 = vadd.f32 %v1278_v60, %v1256_v11  ;;  %v1303_v7 = vrot.slane %v1292_v51, %v4266_v16  ;;  %v6406_v60 = vld [vmem:[#allocation75_spill] sm:$0xff]  ;;  %v6407_v51 = vld [vmem:[#allocation68_spill] sm:$0xff] }
 0x5e2   : > { %v1739_v4 = vmul.f32 %v6398_v38, %v4483_v42  ;;  %v1281_v34 = vadd.f32 %v1279_v9, %v1257_v27  ;;  %v1307_v24 = vrot.slane %v1293_v31, %v4266_v16  ;;  %v2319_v32 = vmax.f32 %v2317_v6, 0.0  ;;  %v6400_v27 = vld [vmem:[#allocation65_spill] sm:$0xff]  ;;  %v6408_v38 = vld [vmem:[#allocation60_spill] sm:$0xff] }
 0x5e3   : > { %v2320_v37 = vmax.f32 %v2318_v33, 0.0  ;;  %v960_v21 = vrot.slane %v4602_v53, 3  ;;  %v6399_v42 = vrot.slane %v4622_v0, %v4266_v16  ;;  %v1308_v63 = vmul.f32 %v1303_v7, %v4500_v13  ;;  %v6402_v0 = vld [vmem:[#allocation77_spill] sm:$0xff]  ;;  %v3503_v33 = vpop.permute.xlu0 %3502 }
 0x5e4   : > { %v1309_v11 = vmul.f32 %v1307_v24, %v4504_v59  ;;  %vm1743_vm15 = vcmp.eq.f32.partialorder %v6400_v27, %v4299_v47  ;;  %v2321_v48 = vmin.f32 %v2319_v32, 15.0  ;;  %vm1744_vm14 = vcmp.eq.f32.partialorder %v6401_v22, %v4304_v14  ;;  %v6403_v13 = vld [vmem:[#allocation73_spill] sm:$0xff]  ;;  %v6445_v27 = vld [vmem:[#allocation43_spill] sm:$0xff] }
 0x5e5   : > { %v1740_v52 = vmul.f32 %v6399_v42, %v4479_v62  ;;  %v2322_v61 = vmin.f32 %v2320_v37, 15.0  ;;  %v964_v39 = vadd.f32 %v960_v21, %v4540_v54  ;;  %v4790_v53 = vadd.f32 %v1308_v63, %v1280_v41  ;;  %v4822_v21 = vpop.permute.xlu1 %3507 }
 0x5e6   : > { %v4792_v23 = vadd.f32 %v1309_v11, %v1281_v34  ;;  %v1745_v62 = vsel %vm1743_vm15, %v6402_v0, 0.0  ;;  %vm1747_vm8 = vcmp.eq.f32.partialorder %v6403_v13, %v4299_v47  ;;  %v4799_v59 = vsub.f32 %v4564_v58, %v4629_v55 }
 0x5e7   : > { %v2573_v2 = vadd.f32 %v964_v39, %v3792_v18  ;;  %v1746_v54 = vsel %vm1744_vm14, %v6405_v44, 0.0  ;;  %vm1748_vm3 = vcmp.eq.f32.partialorder %v6406_v60, %v4304_v14  ;;  %v4806_v9 = vadd.f32 %v1739_v4, %v4643_v1  ;;  %v6411_v1 = vld [vmem:[#allocation64_spill] sm:$0xff] }
 0x5e8   : > { %6404 = vst [vmem:[#allocation88_spill] sm:$0xff] %v4799_v59  ;;  %v1749_v31 = vsel %vm1747_vm8, %v6407_v51, 0.0  ;;  %v1750_v25 = vsel %vm1748_vm3, %v4557_v49, 0.0  ;;  %v1877_v6 = vadd.f32 %v6408_v38, %v3792_v18  ;;  %v4812_v58 = vfloor.f32 %v2321_v48 }
 0x5e9   : > { %v4814_v41 = vfloor.f32 %v2322_v61  ;;  %v2575_v34 = vmax.f32 %v2573_v2, 0.0  ;;  %v1751_v7 = vadd.f32 %v1749_v31, %v1745_v62  ;;  %v4816_v24 = vadd.f32 %v1740_v52, %v1712_v30  ;;  %v6413_v30 = vld [vmem:[#allocation70_spill] sm:$0xff] }
 0x5ea   : > { %6409 = vst [vmem:[#allocation60_spill] sm:$0xff] %v4812_v58  ;;  %v4818_v32 = vadd.f32 %v1750_v25, %v1746_v54  ;;  %v1878_v4 = vadd.f32 %v6411_v1, %v3790_v17  ;;  %v1879_v37 = vmax.f32 %v1877_v6, 0.0  ;;  %v3505_v11 = vunpack.i.h.bf16 %v3503_v33  ;;  %v3659_v54 = vpop.eup %3658  ;;  %v6417_v6 = vld [vmem:[#allocation63_spill] sm:$0xff] }
 0x5eb   : > { %6410 = vst [vmem:[#allocation89_spill] sm:$0xff] %v4814_v41  ;;  %v2577_v42 = vmin.f32 %v2575_v34, 15.0  ;;  %v1762_v63 = vrot.slane %v1751_v7, %v4266_v16  ;;  %v3504_v39 = vunpack.i.l.bf16 %v3503_v33  ;;  %v4827_v38 = vsub.f32 %v4554_v50, %v4635_v15  ;;  %v6420_v7 = vld [vmem:[#allocation4_spill] sm:$0xff] }
 0x5ec   : > { %v4831_v52 = vsub.f32 %v6413_v30, %v4638_v3  ;;  %v1880_v62 = vmax.f32 %v1878_v4, 0.0  ;;  %v1881_v2 = vmin.f32 %v1879_v37, 15.0  ;;  %v4834_v31 = vsub.f32 %v2321_v48, %v4812_v58 }
 0x5ed   : > { %6412 = vst [vmem:[#allocation64_spill] sm:$0xff] %v4827_v38  ;;  %v4837_v25 = vsub.f32 %v2322_v61, %v4814_v41  ;;  %v6418_v34 = vunpack.i.l.bf16 %v6417_v6  ;;  %v6419_v33 = vunpack.i.h.bf16 %v6417_v6  ;;  %vm6421_vm1 = vcmp.lt.s32.totalorder %v6420_v7, 16 }
 0x5ee   : > { %6414 = vst [vmem:[#allocation70_spill] sm:$0xff] %v4831_v52  ;;  %6415 = vst [vmem:[#allocation90_spill] sm:$0xff] %v4834_v31  ;;  %v3510_v1 = vunpack.i.h.bf16 %v4822_v21  ;;  %v961_v30 = vrot.slane %v3659_v54, 3  ;;  %v1766_v4 = vrot.slane %v4818_v32, %v4266_v16  ;;  %v1882_v37 = vmin.f32 %v1880_v62, 15.0 }
 0x5ef   : > { %6416 = vst [vmem:[#allocation91_spill] sm:$0xff] %v4837_v25  ;;  %v1758_v50 = vsel %vm6421_vm1, %v6419_v33, %v6418_v34  ;;  %v4848_v29 = vfloor.f32 %v1881_v2  ;;  %v4850_v48 = vfloor.f32 %v2577_v42  ;;  %v4854_v49 = vsel %vm1213_vm9, %v3504_v39, %v3505_v11 }
 0x5f0   : > { %v1767_v61 = vmul.f32 %v1762_v63, %v1758_v50  ;;  %v3509_v6 = vunpack.i.l.bf16 %v4822_v21  ;;  %v965_v34 = vadd.f32 %v961_v30, %v4618_v28  ;;  %v4858_v33 = vfloor.f32 %v1882_v37 }
 0x5f1   : > { %6422 = vst [vmem:[#allocation63_spill] sm:$0xff] %v4848_v29  ;;  %v4861_v54 = vsub.f32 %v1881_v2, %v4848_v29  ;;  %v1908_v32 = vsel %vm1213_vm9, %v3505_v11, %v3504_v39  ;;  %v1887_v62 = vadd.f32 1.0, %v4848_v29  ;;  %vm1891_vm5 = vcmp.eq.f32.partialorder %v4848_v29, %v4275_v19 }
 0x5f2   : > { %6423 = vst [vmem:[#allocation4_spill] sm:$0xff] %v4858_v33  ;;  %vm1921_vm4 = vcmp.eq.f32.partialorder %v4848_v29, %v4299_v47  ;;  %v2327_v21 = vadd.f32 1.0, %v4812_v58  ;;  %v2574_v28 = vadd.f32 %v965_v34, %v3790_v17  ;;  %v4873_v63 = vsub.f32 %v1882_v37, %v4858_v33 }
 0x5f3   : > { %6424 = vst [vmem:[#allocation92_spill] sm:$0xff] %v4861_v54  ;;  %v1888_v2 = vadd.f32 1.0, %v4858_v33  ;;  %vm1892_vm13 = vcmp.eq.f32.partialorder %v4858_v33, %v4284_v26  ;;  %v4878_v11 = vmin.f32 %v1887_v62, 15.0  ;;  %v4881_v39 = vsub.f32 1.0, %v4861_v54 }
 0x5f4   : > { %6425 = vst [vmem:[#allocation93_spill] sm:$0xff] %v4873_v63  ;;  %vm1922_vm15 = vcmp.eq.f32.partialorder %v4858_v33, %v4304_v14  ;;  %v2328_v50 = vadd.f32 1.0, %v4814_v41  ;;  %v2576_v30 = vmax.f32 %v2574_v28, 0.0  ;;  %v4889_v37 = vsub.f32 1.0, %v4873_v63 }
 0x5f5   : > { %6426 = vst [vmem:[#allocation94_spill] sm:$0xff] %v4878_v11  ;;  %6427 = vst [vmem:[#allocation95_spill] sm:$0xff] %v4881_v39  ;;  %v4886_v34 = vmin.f32 %v1888_v2, 15.0  ;;  %v4891_v51 = vmin.f32 %v2327_v21, 15.0  ;;  %v1895_v60 = vsel %vm1891_vm5, %v4881_v39, 0.0  ;;  %vm1897_vm14 = vcmp.eq.f32.partialorder %v4878_v11, %v4275_v19 }
 0x5f6   : > { %6429 = vst [vmem:[#allocation97_spill] sm:$0xff] %v4889_v37  ;;  %v1923_v62 = vsel %vm1921_vm4, %v4881_v39, 0.0  ;;  %vm1925_vm8 = vcmp.eq.f32.partialorder %v4878_v11, %v4299_v47  ;;  %v2578_v28 = vmin.f32 %v2576_v30, 15.0  ;;  %v1896_v2 = vsel %vm1892_vm13, %v4889_v37, 0.0 }
 0x5f7   : > { %6428 = vst [vmem:[#allocation96_spill] sm:$0xff] %v4886_v34  ;;  %6430 = vst [vmem:[#allocation98_spill] sm:$0xff] %v4891_v51  ;;  %vm1898_vm3 = vcmp.eq.f32.partialorder %v4886_v34, %v4284_v26  ;;  %v1899_v21 = vsel %vm1897_vm14, %v4861_v54, 0.0  ;;  %v1924_v39 = vsel %vm1922_vm15, %v4889_v37, 0.0  ;;  %vm1926_vm1 = vcmp.eq.f32.partialorder %v4886_v34, %v4304_v14 }
 0x5f8   : > { %v1900_v44 = vsel %vm1898_vm3, %v4873_v63, 0.0  ;;  %v4907_v13 = vadd.f32 %v1899_v21, %v1895_v60  ;;  %v4915_v30 = vfloor.f32 %v2578_v28  ;;  %v1927_v29 = vsel %vm1925_vm8, %v4861_v54, 0.0  ;;  %v6432_v60 = vld [vmem:[#allocation67_spill] sm:$0xff] }
 0x5f9   : > { %v4917_v11 = vadd.f32 %v1900_v44, %v1896_v2  ;;  %v1928_v0 = vsel %vm1926_vm1, %v4873_v63, 0.0  ;;  %v4922_v22 = vsub.f32 %v2577_v42, %v4850_v48  ;;  %v4925_v21 = vmul.f32 %v1766_v4, %v6432_v60 }
 0x5fa   : > { %6431 = vst [vmem:[#allocation99_spill] sm:$0xff] %v4907_v13  ;;  %v1912_v37 = vrot.slane %v4907_v13, %v4266_v16  ;;  %v4929_v33 = vmin.f32 %v2328_v50, 15.0  ;;  %v4932_v34 = vadd.f32 %v1767_v61, %v4806_v9  ;;  %v4934_v44 = vadd.f32 %v1927_v29, %v1923_v62  ;;  %v6440_v29 = vld [vmem:[#allocation22_spill] sm:$0xff] }
 0x5fb   : > { %vm6436_vm5 = vcmp.lt.s32.totalorder %v6420_v7, 16  ;;  %v4945_v4 = vsub.f32 %v2578_v28, %v4915_v30  ;;  %v4949_v60 = vadd.f32 %v1928_v0, %v1924_v39  ;;  %v4952_v9 = vsub.f32 1.0, %v4834_v31 }
 0x5fc   : > { %6433 = vst [vmem:[#allocation67_spill] sm:$0xff] %v4929_v33  ;;  %6434 = vst [vmem:[#allocation100_spill] sm:$0xff] %v4932_v34  ;;  %v4938_v2 = vsel %vm6436_vm5, %v3509_v6, %v3510_v1  ;;  %vm2331_vm13 = vcmp.eq.f32.partialorder %v4812_v58, %v6440_v29  ;;  %v4957_v61 = vsub.f32 1.0, %v4837_v25  ;;  %vm2337_vm15 = vcmp.eq.f32.partialorder %v4891_v51, %v6440_v29 }
 0x5fd   : > { %6435 = vst [vmem:[#allocation101_spill] sm:$0xff] %v4934_v44  ;;  %vm6437_vm4 = vmmov %vm6436_vm5  ;;  %v2335_v0 = vsel %vm2331_vm13, %v4952_v9, 0.0  ;;  %v2339_v39 = vsel %vm2337_vm15, %v4834_v31, 0.0  ;;  %v1940_v62 = vrot.slane %v4934_v44, %v4266_v16  ;;  %vm2361_vm3 = vcmp.eq.f32.partialorder %v4812_v58, %v4278_v8 }
 0x5fe   : > { %v4942_v42 = vsel %vm6437_vm4, %v3510_v1, %v3509_v6  ;;  %6438 = vst [vmem:[#allocation102_spill] sm:$0xff] %v4949_v60  ;;  %6439 = vst [vmem:[#allocation103_spill] sm:$0xff] %v4952_v9  ;;  %v6442_v1 = vld [vmem:[#allocation24_spill] sm:$0xff]  ;;  %v4963_v6 = vmul.f32 %v1912_v37, %v1908_v32  ;;  %v2341_v13 = vadd.f32 %v2339_v39, %v2335_v0  ;;  %v6443_v37 = vld [vmem:[#allocation21_spill] sm:$0xff]  ;;  %v2363_v34 = vsel %vm2361_vm3, %v4952_v9, 0.0 }
 0x5ff   : > { %6441 = vst [vmem:[#allocation22_spill] sm:$0xff] %v4957_v61  ;;  %vm2338_vm14 = vcmp.eq.f32.partialorder %v4929_v33, %v6442_v1  ;;  %vm2332_vm8 = vcmp.eq.f32.partialorder %v4814_v41, %v6442_v1  ;;  %vm2362_vm1 = vcmp.eq.f32.partialorder %v4814_v41, %v4281_v20  ;;  %vm2365_vm5 = vcmp.eq.f32.partialorder %v4891_v51, %v4278_v8  ;;  %v6444_v39 = vld [vmem:[#allocation44_spill] sm:$0xff] }
 0x600   : > { %v2336_v28 = vsel %vm2332_vm8, %v4957_v61, 0.0  ;;  %v2340_v50 = vsel %vm2338_vm14, %v4837_v25, 0.0  ;;  %v2352_v54 = vrot.slane %v2341_v13, %v6443_v37  ;;  %v2364_v44 = vsel %vm2362_vm1, %v4957_v61, 0.0 }
 0x601   : > { %v2342_v32 = vadd.f32 %v2340_v50, %v2336_v28  ;;  %vm2366_vm4 = vcmp.eq.f32.partialorder %v4929_v33, %v4281_v20  ;;  %v2367_v50 = vsel %vm2365_vm5, %v4834_v31, 0.0  ;;  %vm2389_vm13 = vcmp.eq.f32.partialorder %v4812_v58, %v4275_v19 }
 0x602   : > { %v2357_v28 = vmul.f32 %v2352_v54, %v6444_v39  ;;  %v2368_v13 = vsel %vm2366_vm4, %v4837_v25, 0.0  ;;  %v2369_v63 = vadd.f32 %v2367_v50, %v2363_v34  ;;  %vm2390_vm15 = vcmp.eq.f32.partialorder %v4814_v41, %v4284_v26 }
 0x603   : > { %v2356_v0 = vrot.slane %v2342_v32, %v6443_v37  ;;  %v2370_v38 = vadd.f32 %v2368_v13, %v2364_v44  ;;  %v2391_v32 = vsel %vm2389_vm13, %v4952_v9, 0.0  ;;  %v2392_v3 = vsel %vm2390_vm15, %v4957_v61, 0.0 }
 0x604   : > { %v2380_v15 = vrot.slane %v2369_v63, %v6443_v37  ;;  %vm2393_vm14 = vcmp.eq.f32.partialorder %v4891_v51, %v4275_v19  ;;  %vm2394_vm8 = vcmp.eq.f32.partialorder %v4929_v33, %v4284_v26  ;;  %vm2417_vm3 = vcmp.eq.f32.partialorder %v4812_v58, %v4299_v47 }
 0x605   : > { %v2358_v52 = vmul.f32 %v2356_v0, %v6445_v27  ;;  %v2384_v54 = vrot.slane %v2370_v38, %v6443_v37  ;;  %v2395_v34 = vsel %vm2393_vm14, %v4834_v31, 0.0  ;;  %v2396_v44 = vsel %vm2394_vm8, %v4837_v25, 0.0  ;;  %v6446_v0 = vld [vmem:[#allocation46_spill] sm:$0xff]  ;;  %v3513_v27 = vpop.permute.xlu0 %3512 }
 0x606   : > { %vm2418_vm1 = vcmp.eq.f32.partialorder %v4814_v41, %v4304_v14  ;;  %v2385_v63 = vmul.f32 %v2380_v15, %v6446_v0  ;;  %v2397_v50 = vadd.f32 %v2395_v34, %v2391_v32  ;;  %v2398_v13 = vadd.f32 %v2396_v44, %v2392_v3 }
 0x607   : > { %v2419_v39 = vsel %vm2417_vm3, %v4952_v9, 0.0  ;;  %v2386_v5 = vmul.f32 %v2384_v54, %v6447_v10  ;;  %v2420_v58 = vsel %vm2418_vm1, %v4957_v61, 0.0  ;;  %vm2421_vm5 = vcmp.eq.f32.partialorder %v4891_v51, %v4299_v47  ;;  %v6448_v54 = vld [vmem:[#allocation50_spill] sm:$0xff]  ;;  %v6449_v61 = vld [vmem:[#allocation48_spill] sm:$0xff] }
 0x608   : > { %vm2422_vm4 = vcmp.eq.f32.partialorder %v4929_v33, %v4304_v14  ;;  %v2387_v38 = vadd.f32 %v2385_v63, %v2357_v28  ;;  %v2408_v41 = vrot.slane %v2397_v50, %v6443_v37  ;;  %v2412_v15 = vrot.slane %v2398_v13, %v6443_v37  ;;  %v6464_v33 = vld [vmem:[#allocation47_spill] sm:$0xff] }
 0x609   : > { %v2423_v3 = vsel %vm2421_vm5, %v4834_v31, 0.0  ;;  %v2388_v32 = vadd.f32 %v2386_v5, %v2358_v52  ;;  %v2424_v34 = vsel %vm2422_vm4, %v4837_v25, 0.0  ;;  %v3515_v10 = vunpack.i.h.bf16 %v3513_v27 }
 0x60a   : > { %v2425_v44 = vadd.f32 %v2423_v3, %v2419_v39  ;;  %v2413_v0 = vmul.f32 %v2408_v41, %v6448_v54  ;;  %v2414_v9 = vmul.f32 %v2412_v15, %v6449_v61  ;;  %v2426_v51 = vadd.f32 %v2424_v34, %v2420_v58  ;;  %v6455_v15 = vld [vmem:[#allocation25_spill] sm:$0xff] }
 0x60b   : > { %v3514_v17 = vunpack.i.l.bf16 %v3513_v27  ;;  %v6450_v28 = vrot.slane %v4917_v11, %v4266_v16  ;;  %v1945_v50 = vmul.f32 %v1940_v62, %v4942_v42  ;;  %v2583_v5 = vadd.f32 1.0, %v4850_v48 }
 0x60c   : > { %v2436_v13 = vrot.slane %v2425_v44, %v6443_v37  ;;  %v2415_v52 = vadd.f32 %v2413_v0, %v2387_v38  ;;  %v2416_v39 = vadd.f32 %v2414_v9, %v2388_v32  ;;  %v2440_v3 = vrot.slane %v2426_v51, %v6443_v37 }
 0x60d   : > { %v1918_v63 = vmul.f32 %v6450_v28, %v4854_v49  ;;  %vm6451_vm13 = vcmp.lt.s32.totalorder %v6420_v7, 16  ;;  %v2584_v58 = vadd.f32 1.0, %v4915_v30  ;;  %v5036_v61 = vmin.f32 %v2583_v5, 15.0  ;;  %v6454_v49 = vld [vmem:[#allocation23_spill] sm:$0xff] }
 0x60e   : > { %v2431_v41 = vsel %vm6451_vm13, %v3514_v17, %v3515_v10  ;;  %vm6452_vm15 = vmmov %vm6451_vm13  ;;  %vm2587_vm14 = vcmp.eq.f32.partialorder %v4850_v48, %v6454_v49  ;;  %vm2588_vm8 = vcmp.eq.f32.partialorder %v4915_v30, %v6455_v15  ;;  %v5043_v51 = vsub.f32 1.0, %v4922_v22 }
 0x60f   : > { %v2432_v27 = vsel %vm6452_vm15, %v3515_v10, %v3514_v17  ;;  %6453 = vst [vmem:[#allocation24_spill] sm:$0xff] %v5036_v61  ;;  %v2442_v62 = vmul.f32 %v2440_v3, %v2431_v41  ;;  %v5045_v9 = vmin.f32 %v2584_v58, 15.0  ;;  %v5048_v38 = vsub.f32 1.0, %v4945_v4 }
 0x610   : > { %v2441_v42 = vmul.f32 %v2436_v13, %v2432_v27  ;;  %vm2593_vm3 = vcmp.eq.f32.partialorder %v5036_v61, %v6454_v49  ;;  %vm2617_vm1 = vcmp.eq.f32.partialorder %v4850_v48, %v6440_v29  ;;  %v2591_v34 = vsel %vm2587_vm14, %v5043_v51, 0.0  ;;  %v3518_v49 = vpop.permute.xlu1 %3517 }
 0x611   : > { %v5056_v32 = vadd.f32 %v2442_v62, %v2416_v39  ;;  %v2595_v44 = vsel %vm2593_vm3, %v4922_v22, 0.0  ;;  %v2592_v10 = vsel %vm2588_vm8, %v5048_v38, 0.0  ;;  %vm2594_vm5 = vcmp.eq.f32.partialorder %v5045_v9, %v6455_v15 }
 0x612   : > { %v5054_v17 = vadd.f32 %v2441_v42, %v2415_v52  ;;  %v2597_v54 = vadd.f32 %v2595_v44, %v2591_v34  ;;  %vm2618_vm4 = vcmp.eq.f32.partialorder %v4915_v30, %v6442_v1  ;;  %v2596_v0 = vsel %vm2594_vm5, %v4945_v4, 0.0 }
 0x613   : > { %6457 = vst [vmem:[#allocation46_spill] sm:$0xff] %v5056_v32  ;;  %v2619_v28 = vsel %vm2617_vm1, %v5043_v51, 0.0  ;;  %v2620_v13 = vsel %vm2618_vm4, %v5048_v38, 0.0  ;;  %vm2621_vm13 = vcmp.eq.f32.partialorder %v5036_v61, %v6440_v29  ;;  %v6458_v5 = vrot.slane %v4949_v60, %v4266_v16  ;;  %v6465_v60 = vld [vmem:[#allocation49_spill] sm:$0xff] }
 0x614   : > { %6456 = vst [vmem:[#allocation21_spill] sm:$0xff] %v5054_v17  ;;  %v2598_v39 = vadd.f32 %v2596_v0, %v2592_v10  ;;  %vm2622_vm15 = vcmp.eq.f32.partialorder %v5045_v9, %v6442_v1  ;;  %v2623_v3 = vsel %vm2621_vm13, %v4922_v22, 0.0  ;;  %v2608_v41 = vrot.slane %v2597_v54, %v6443_v37  ;;  %v6461_v17 = vld [vmem:[#allocation61_spill] sm:$0xff] }
 0x615   : > { %v1946_v52 = vmul.f32 %v6458_v5, %v4938_v2  ;;  %v2624_v27 = vsel %vm2622_vm15, %v4945_v4, 0.0  ;;  %v2625_v58 = vadd.f32 %v2623_v3, %v2619_v28  ;;  %vm2645_vm14 = vcmp.eq.f32.partialorder %v4850_v48, %v4278_v8 }
 0x616   : > { %v2612_v42 = vrot.slane %v2598_v39, %v6443_v37  ;;  %v2626_v62 = vadd.f32 %v2624_v27, %v2620_v13  ;;  %vm2646_vm8 = vcmp.eq.f32.partialorder %v4915_v30, %v4281_v20  ;;  %v2647_v2 = vsel %vm2645_vm14, %v5043_v51, 0.0 }
 0x617   : > { %v2636_v15 = vrot.slane %v2625_v58, %v6443_v37  ;;  %v2648_v34 = vsel %vm2646_vm8, %v5048_v38, 0.0  ;;  %vm2649_vm3 = vcmp.eq.f32.partialorder %v5036_v61, %v4278_v8  ;;  %vm2650_vm1 = vcmp.eq.f32.partialorder %v5045_v9, %v4281_v20  ;;  %v6460_v58 = vld [vmem:[#allocation62_spill] sm:$0xff] }
 0x618   : > { %v5093_v44 = vadd.f32 %v4925_v21, %v4816_v24  ;;  %v2640_v10 = vrot.slane %v2626_v62, %v6443_v37  ;;  %v2651_v54 = vsel %vm2649_vm3, %v4922_v22, 0.0  ;;  %v2652_v0 = vsel %vm2650_vm1, %v4945_v4, 0.0  ;;  %v6462_v21 = vld [vmem:[#allocation52_spill] sm:$0xff]  ;;  %v6463_v62 = vld [vmem:[#allocation51_spill] sm:$0xff] }
 0x619   : > { %v3520_v28 = vunpack.i.h.bf16 %v3518_v49  ;;  %v3519_v13 = vunpack.i.l.bf16 %v3518_v49  ;;  %v2653_v5 = vadd.f32 %v2651_v54, %v2647_v2  ;;  %v2654_v39 = vadd.f32 %v2652_v0, %v2648_v34  ;;  %v6469_v34 = vld [vmem:[#allocation55_spill] sm:$0xff] }
 0x61a   : > { %v5099_v3 = vadd.f32 %v1945_v50, %v4963_v6  ;;  %v5101_v27 = vadd.f32 %v1946_v52, %v1918_v63  ;;  %v2613_v32 = vmul.f32 %v2608_v41, %v6460_v58  ;;  %v2614_v24 = vmul.f32 %v2612_v42, %v6461_v17 }
 0x61b   : > { %v2641_v25 = vmul.f32 %v2636_v15, %v6462_v21  ;;  %v2642_v31 = vmul.f32 %v2640_v10, %v6463_v62  ;;  %vm2851_vm5 = vcmp.eq.f32.partialorder %v4850_v48, %v6464_v33  ;;  %vm2852_vm4 = vcmp.eq.f32.partialorder %v4915_v30, %v6465_v60  ;;  %v6468_v15 = vld [vmem:[#allocation53_spill] sm:$0xff] }
 0x61c   : > { %6459 = vst [vmem:[#allocation45_spill] sm:$0xff] %v5101_v27  ;;  %v2664_v49 = vrot.slane %v2653_v5, %v6443_v37  ;;  %v2668_v6 = vrot.slane %v2654_v39, %v6443_v37  ;;  %vm2855_vm13 = vcmp.eq.f32.partialorder %v5036_v61, %v6464_v33  ;;  %vm2856_vm15 = vcmp.eq.f32.partialorder %v5045_v9, %v6465_v60  ;;  %v6472_v62 = vld [vmem:[#allocation57_spill] sm:$0xff]  ;;  %v6498_v60 = vld [vmem:[#allocation54_spill] sm:$0xff] }
 0x61d   : > { %v5119_v63 = vsel %vm1182_vm6, %v3519_v13, %v3520_v28  ;;  %v5123_v50 = vsel %vm1182_vm6, %v3520_v28, %v3519_v13  ;;  %v2853_v52 = vsel %vm2851_vm5, %v5043_v51, 0.0  ;;  %v2854_v41 = vsel %vm2852_vm4, %v5048_v38, 0.0 }
 0x61e   : > { %6466 = vst [vmem:[#allocation50_spill] sm:$0xff] %v5119_v63  ;;  %6467 = vst [vmem:[#allocation48_spill] sm:$0xff] %v5123_v50  ;;  %vm1328_vm14 = vcmp.lt.s32.totalorder %v6420_v7, 96  ;;  %v2857_v42 = vsel %vm2855_vm13, %v4922_v22, 0.0  ;;  %v2858_v2 = vsel %vm2856_vm15, %v4945_v4, 0.0  ;;  %vm1314_vm8 = vcmp.eq.f32.partialorder %v4562_v45, %v6468_v15 }
 0x61f   : > { %vm1315_vm3 = vcmp.eq.f32.partialorder %v4570_v36, %v6469_v34  ;;  %v5134_v10 = vadd.f32 %v2641_v25, %v2613_v32  ;;  %v5136_v54 = vadd.f32 %v2642_v31, %v2614_v24  ;;  %v1316_v0 = vsel %vm1314_vm8, %v4646_v46, 0.0 }
 0x620   : > { %v1317_v28 = vsel %vm1315_vm3, %v4649_v40, 0.0  ;;  %v5141_v13 = vmul.f32 %v2664_v49, %v5123_v50  ;;  %v5144_v5 = vmul.f32 %v2668_v6, %v5119_v63  ;;  %vm1318_vm1 = vcmp.eq.f32.partialorder %v4624_v35, %v6468_v15  ;;  %v6473_v6 = vld [vmem:[#allocation58_spill] sm:$0xff] }
 0x621   : > { %vm1319_vm5 = vcmp.eq.f32.partialorder %v4626_v57, %v6469_v34  ;;  %v5150_v25 = vadd.f32 %v2857_v42, %v2853_v52  ;;  %v5152_v31 = vadd.f32 %v2858_v2, %v2854_v41  ;;  %v1320_v32 = vsel %vm1318_vm1, %v4579_v56, 0.0  ;;  %v3523_v52 = vpop.permute.xlu0 %3522 }
 0x622   : > { %v1321_v39 = vsel %vm1319_vm5, %v4590_v43, 0.0  ;;  %v1322_v24 = vadd.f32 %v1320_v32, %v1316_v0  ;;  %vm1345_vm4 = vcmp.eq.f32.partialorder %v4562_v45, %v6472_v62  ;;  %vm1346_vm13 = vcmp.eq.f32.partialorder %v4570_v36, %v6473_v6 }
 0x623   : > { %6470 = vst [vmem:[#allocation23_spill] sm:$0xff] %v5150_v25  ;;  %6471 = vst [vmem:[#allocation25_spill] sm:$0xff] %v5152_v31  ;;  %v1323_v49 = vadd.f32 %v1321_v39, %v1317_v28  ;;  %v1347_v63 = vsel %vm1345_vm4, %v4646_v46, 0.0  ;;  %v1348_v50 = vsel %vm1346_vm13, %v4649_v40, 0.0  ;;  %vm1349_vm15 = vcmp.eq.f32.partialorder %v4624_v35, %v6472_v62  ;;  %v6474_v39 = vld [vmem:[#allocation59_spill] sm:$0xff] }
 0x624   : > { %vm1350_vm8 = vcmp.eq.f32.partialorder %v4626_v57, %v6473_v6  ;;  %v1334_v41 = vrot.slane %v1322_v24, %v4266_v16  ;;  %v1351_v2 = vsel %vm1349_vm15, %v4579_v56, 0.0  ;;  %vm1369_vm3 = vcmp.eq.f32.partialorder %v4562_v45, %v6474_v39  ;;  %v6479_v40 = vld [vmem:[#allocation83_spill] sm:$0xff] }
 0x625   : > { %v1338_v42 = vrot.slane %v1323_v49, %v4266_v16  ;;  %v1352_v0 = vsel %vm1350_vm8, %v4590_v43, 0.0  ;;  %v1353_v28 = vadd.f32 %v1351_v2, %v1347_v63  ;;  %vm1373_vm1 = vcmp.eq.f32.partialorder %v4624_v35, %v6474_v39  ;;  %v6475_v43 = vld [vmem:[#allocation72_spill] sm:$0xff] }
 0x626   : > { %v1354_v32 = vadd.f32 %v1352_v0, %v1348_v50  ;;  %v1371_v25 = vsel %vm1369_vm3, %v4646_v46, 0.0  ;;  %v1375_v17 = vsel %vm1373_vm1, %v4579_v56, 0.0  ;;  %v3525_v21 = vunpack.i.h.bf16 %v3523_v52  ;;  %v6476_v56 = vld [vmem:[#allocation29_spill] sm:$0xff]  ;;  %v6477_v46 = vld [vmem:[#allocation31_spill] sm:$0xff] }
 0x627   : > { %v3524_v24 = vunpack.i.l.bf16 %v3523_v52  ;;  %v1358_v49 = vrot.slane %v1353_v28, %v4266_v16  ;;  %v1377_v33 = vadd.f32 %v1375_v17, %v1371_v25  ;;  %v1425_v63 = vadd.f32 1.0, %v6475_v43 }
 0x628   : > { %v1362_v58 = vrot.slane %v1354_v32, %v4266_v16  ;;  %v1426_v0 = vadd.f32 1.0, %v4629_v55  ;;  %vm1429_vm5 = vcmp.eq.f32.partialorder %v6475_v43, %v6440_v29  ;;  %vm1430_vm4 = vcmp.eq.f32.partialorder %v4629_v55, %v6442_v1 }
 0x629   : > { %v1329_v50 = vsel %vm1328_vm14, %v3524_v24, %v3525_v21  ;;  %v1330_v2 = vsel %vm1328_vm14, %v3525_v21, %v3524_v24  ;;  %v1363_v52 = vmul.f32 %v1358_v49, %v6476_v56  ;;  %v1382_v32 = vrot.slane %v1377_v33, %v4266_v16 }
 0x62a   : > { %v1364_v28 = vmul.f32 %v1362_v58, %v6477_v46  ;;  %v1339_v17 = vmul.f32 %v1334_v41, %v1329_v50  ;;  %v1340_v25 = vmul.f32 %v1338_v42, %v1330_v2  ;;  %v5189_v35 = vmin.f32 %v1425_v63, 15.0 }
 0x62b   : > { %v5191_v45 = vmin.f32 %v1426_v0, 15.0  ;;  %v1387_v21 = vmul.f32 %v1382_v32, %v4322_v12  ;;  %v5198_v36 = vsub.f32 1.0, %v6479_v40  ;;  %v5201_v56 = vsub.f32 1.0, %v4799_v59 }
 0x62c   : > { %v1341_v24 = vadd.f32 %v1339_v17, %v4790_v53  ;;  %v1342_v46 = vadd.f32 %v1340_v25, %v4792_v23  ;;  %vm1435_vm13 = vcmp.eq.f32.partialorder %v5189_v35, %v6440_v29  ;;  %vm1459_vm8 = vcmp.eq.f32.partialorder %v6475_v43, %v4278_v8 }
 0x62d   : > { %6478 = vst [vmem:[#allocation72_spill] sm:$0xff] %v5191_v45  ;;  %6480 = vst [vmem:[#allocation29_spill] sm:$0xff] %v5201_v56  ;;  %vm1436_vm15 = vcmp.eq.f32.partialorder %v5191_v45, %v6442_v1  ;;  %v1433_v53 = vsel %vm1429_vm5, %v5198_v36, 0.0  ;;  %v1434_v33 = vsel %vm1430_vm4, %v5201_v56, 0.0  ;;  %v1437_v58 = vsel %vm1435_vm13, %v6479_v40, 0.0 }
 0x62e   : > { %v1365_v12 = vadd.f32 %v1363_v52, %v1341_v24  ;;  %v5216_v23 = vadd.f32 %v1364_v28, %v1342_v46  ;;  %v1438_v41 = vsel %vm1436_vm15, %v4799_v59, 0.0  ;;  %v1439_v42 = vadd.f32 %v1437_v58, %v1433_v53  ;;  %v6483_v28 = vld [vmem:[#allocation36_spill] sm:$0xff]  ;;  %v6484_v24 = vld [vmem:[#allocation35_spill] sm:$0xff] }
 0x62f   : > { %vm1460_vm3 = vcmp.eq.f32.partialorder %v4629_v55, %v4281_v20  ;;  %v1440_v49 = vadd.f32 %v1438_v41, %v1434_v33  ;;  %v1461_v63 = vsel %vm1459_vm8, %v5198_v36, 0.0  ;;  %vm1463_vm1 = vcmp.eq.f32.partialorder %v5189_v35, %v4278_v8 }
 0x630   : > { %6481 = vst [vmem:[#allocation31_spill] sm:$0xff] %v5216_v23  ;;  %v5221_v1 = vadd.f32 %v1387_v21, %v1365_v12  ;;  %v1462_v29 = vsel %vm1460_vm3, %v5201_v56, 0.0  ;;  %v1450_v50 = vrot.slane %v1439_v42, %v4266_v16  ;;  %vm1464_vm5 = vcmp.eq.f32.partialorder %v5191_v45, %v4281_v20 }
 0x631   : > { %vm1487_vm4 = vcmp.eq.f32.partialorder %v6475_v43, %v4275_v19  ;;  %v1454_v2 = vrot.slane %v1440_v49, %v4266_v16  ;;  %v1465_v0 = vsel %vm1463_vm1, %v6479_v40, 0.0  ;;  %v1466_v52 = vsel %vm1464_vm5, %v4799_v59, 0.0 }
 0x632   : > { %6482 = vst [vmem:[#allocation83_spill] sm:$0xff] %v5221_v1  ;;  %vm1488_vm13 = vcmp.eq.f32.partialorder %v4629_v55, %v4284_v26  ;;  %v1455_v32 = vmul.f32 %v1450_v50, %v6483_v28  ;;  %v1467_v17 = vadd.f32 %v1465_v0, %v1461_v63  ;;  %v1468_v25 = vadd.f32 %v1466_v52, %v1462_v29  ;;  %v6485_v63 = vld [vmem:[#allocation38_spill] sm:$0xff]  ;;  %v6486_v50 = vld [vmem:[#allocation37_spill] sm:$0xff]  ;;  %v6488_v1 = vld [vmem:[#allocation39_spill] sm:$0xff] }
 0x633   : > { %v1489_v21 = vsel %vm1487_vm4, %v5198_v36, 0.0  ;;  %v1456_v46 = vmul.f32 %v1454_v2, %v6484_v24  ;;  %v1490_v12 = vsel %vm1488_vm13, %v5201_v56, 0.0  ;;  %vm1491_vm15 = vcmp.eq.f32.partialorder %v5189_v35, %v4275_v19 }
 0x634   : > { %vm1492_vm8 = vcmp.eq.f32.partialorder %v5191_v45, %v4284_v26  ;;  %v1478_v53 = vrot.slane %v1467_v17, %v4266_v16  ;;  %v1482_v33 = vrot.slane %v1468_v25, %v4266_v16  ;;  %v1493_v58 = vsel %vm1491_vm15, %v6479_v40, 0.0 }
 0x635   : > { %v1494_v41 = vsel %vm1492_vm8, %v4799_v59, 0.0  ;;  %v1495_v42 = vadd.f32 %v1493_v58, %v1489_v21  ;;  %vm1515_vm3 = vcmp.eq.f32.partialorder %v6475_v43, %v4299_v47  ;;  %vm1516_vm1 = vcmp.eq.f32.partialorder %v4629_v55, %v4304_v14 }
 0x636   : > { %v1496_v49 = vadd.f32 %v1494_v41, %v1490_v12  ;;  %v1483_v29 = vmul.f32 %v1478_v53, %v6485_v63  ;;  %v1484_v2 = vmul.f32 %v1482_v33, %v6486_v50  ;;  %v1517_v0 = vsel %vm1515_vm3, %v5198_v36, 0.0  ;;  %v6487_v63 = vld [vmem:[#allocation40_spill] sm:$0xff] }
 0x637   : > { %v1518_v52 = vsel %vm1516_vm1, %v5201_v56, 0.0  ;;  %v1506_v17 = vrot.slane %v1495_v42, %v4266_v16  ;;  %vm1519_vm5 = vcmp.eq.f32.partialorder %v5189_v35, %v4299_v47  ;;  %vm1520_vm4 = vcmp.eq.f32.partialorder %v5191_v45, %v4304_v14 }
 0x638   : > { %v1510_v25 = vrot.slane %v1496_v49, %v4266_v16  ;;  %v5265_v21 = vadd.f32 %v5141_v13, %v5134_v10  ;;  %v5269_v12 = vadd.f32 %v5144_v5, %v5136_v54  ;;  %v1521_v53 = vsel %vm1519_vm5, %v6479_v40, 0.0  ;;  %v6489_v10 = vld [vmem:[#allocation5_spill] sm:$0xff] }
 0x639   : > { %v1522_v33 = vsel %vm1520_vm4, %v4799_v59, 0.0  ;;  %v1485_v58 = vadd.f32 %v1483_v29, %v1455_v32  ;;  %v1486_v41 = vadd.f32 %v1484_v2, %v1456_v46  ;;  %v1523_v42 = vadd.f32 %v1521_v53, %v1517_v0  ;;  %v6491_v53 = vld [vmem:[#allocation41_spill] sm:$0xff] }
 0x63a   : > { %v1524_v49 = vadd.f32 %v1522_v33, %v1518_v52  ;;  %v1511_v50 = vmul.f32 %v1506_v17, %v6487_v63  ;;  %v1512_v28 = vmul.f32 %v1510_v25, %v6488_v1  ;;  %vm1547_vm13 = vcmp.eq.f32.partialorder %v5189_v35, %v3792_v18  ;;  %v6490_v17 = vld [vmem:[#allocation42_spill] sm:$0xff] }
 0x63b   : > { %vm1548_vm15 = vcmp.eq.f32.partialorder %v5191_v45, %v6489_v10  ;;  %v1534_v54 = vrot.slane %v1523_v42, %v4266_v16  ;;  %vm1543_vm8 = vcmp.eq.f32.partialorder %v6475_v43, %v3792_v18  ;;  %vm1544_vm3 = vcmp.eq.f32.partialorder %v4629_v55, %v6489_v10  ;;  %v6492_v42 = vld [vmem:[#allocation28_spill] sm:$0xff] }
 0x63c   : > { %v1538_v13 = vrot.slane %v1524_v49, %v4266_v16  ;;  %v1545_v5 = vsel %vm1543_vm8, %v5198_v36, 0.0  ;;  %v1546_v1 = vsel %vm1544_vm3, %v5201_v56, 0.0  ;;  %v1549_v32 = vsel %vm1547_vm13, %v6479_v40, 0.0  ;;  %v6493_v49 = vld [vmem:[#allocation30_spill] sm:$0xff] }
 0x63d   : > { %v1550_v46 = vsel %vm1548_vm15, %v4799_v59, 0.0  ;;  %v1513_v29 = vadd.f32 %v1511_v50, %v1485_v58  ;;  %v1514_v2 = vadd.f32 %v1512_v28, %v1486_v41  ;;  %v1551_v0 = vadd.f32 %v1549_v32, %v1545_v5  ;;  %v6494_v32 = vld [vmem:[#allocation16_spill] sm:$0xff] }
 0x63e   : > { %v1552_v52 = vadd.f32 %v1550_v46, %v1546_v1  ;;  %v1539_v25 = vmul.f32 %v1534_v54, %v6490_v17  ;;  %v1540_v33 = vmul.f32 %v1538_v13, %v6491_v53  ;;  %vm1569_vm1 = vcmp.eq.f32.partialorder %v5189_v35, %v6492_v42 }
 0x63f   : > { %vm1570_vm5 = vcmp.eq.f32.partialorder %v5191_v45, %v6493_v49  ;;  %v1556_v63 = vrot.slane %v1551_v0, %v4266_v16  ;;  %vm1565_vm4 = vcmp.eq.f32.partialorder %v6475_v43, %v6492_v42  ;;  %vm1566_vm13 = vcmp.eq.f32.partialorder %v4629_v55, %v6493_v49  ;;  %v6495_v0 = vld [vmem:[#allocation17_spill] sm:$0xff] }
 0x640   : > { %v1560_v23 = vrot.slane %v1552_v52, %v4266_v16  ;;  %v1567_v28 = vsel %vm1565_vm4, %v5198_v36, 0.0  ;;  %v1568_v58 = vsel %vm1566_vm13, %v5201_v56, 0.0  ;;  %v1571_v41 = vsel %vm1569_vm1, %v6479_v40, 0.0 }
 0x641   : > { %v1572_v50 = vsel %vm1570_vm5, %v4799_v59, 0.0  ;;  %v1541_v54 = vadd.f32 %v1539_v25, %v1513_v29  ;;  %v1542_v13 = vadd.f32 %v1540_v33, %v1514_v2  ;;  %v1573_v5 = vadd.f32 %v1571_v41, %v1567_v28  ;;  %v3528_v29 = vpop.permute.xlu1 %3527 }
 0x642   : > { %v1574_v1 = vadd.f32 %v1572_v50, %v1568_v58  ;;  %v1561_v46 = vmul.f32 %v1556_v63, %v6494_v32  ;;  %v1562_v52 = vmul.f32 %v1560_v23, %v6495_v0  ;;  %vm1597_vm15 = vcmp.eq.f32.partialorder %v5189_v35, %v6468_v15  ;;  %v6497_v0 = vld [vmem:[#allocation85_spill] sm:$0xff] }
 0x643   : > { %vm1598_vm8 = vcmp.eq.f32.partialorder %v5191_v45, %v6469_v34  ;;  %v1584_v17 = vrot.slane %v1573_v5, %v4266_v16  ;;  %vm1593_vm3 = vcmp.eq.f32.partialorder %v6475_v43, %v6468_v15  ;;  %vm1594_vm1 = vcmp.eq.f32.partialorder %v4629_v55, %v6469_v34  ;;  %v6499_v15 = vld [vmem:[#allocation56_spill] sm:$0xff] }
 0x644   : > { %v1588_v53 = vrot.slane %v1574_v1, %v4266_v16  ;;  %v1595_v2 = vsel %vm1593_vm3, %v5198_v36, 0.0  ;;  %v1596_v23 = vsel %vm1594_vm1, %v5201_v56, 0.0  ;;  %v1599_v25 = vsel %vm1597_vm15, %v6479_v40, 0.0  ;;  %v6496_v1 = vld [vmem:[#allocation84_spill] sm:$0xff] }
 0x645   : > { %v1600_v33 = vsel %vm1598_vm8, %v4799_v59, 0.0  ;;  %v1563_v63 = vadd.f32 %v1561_v46, %v1541_v54  ;;  %v1564_v28 = vadd.f32 %v1562_v52, %v1542_v13  ;;  %v1601_v58 = vadd.f32 %v1599_v25, %v1595_v2  ;;  %v6504_v25 = vld [vmem:[#allocation70_spill] sm:$0xff] }
 0x646   : > { %v1602_v41 = vadd.f32 %v1600_v33, %v1596_v23  ;;  %v3530_v50 = vunpack.i.h.bf16 %v3528_v29  ;;  %v3529_v5 = vunpack.i.l.bf16 %v3528_v29  ;;  %v2121_v32 = vadd.f32 1.0, %v6496_v1 }
 0x647   : > { %v2122_v57 = vadd.f32 1.0, %v6497_v0  ;;  %v1589_v34 = vmul.f32 %v1584_v17, %v6498_v60  ;;  %v1590_v14 = vmul.f32 %v1588_v53, %v6499_v15  ;;  %v1612_v47 = vrot.slane %v1601_v58, %v4266_v16  ;;  %v3533_v17 = vpop.permute.xlu0 %3532  ;;  %v6502_v15 = vld [vmem:[#allocation64_spill] sm:$0xff] }
 0x648   : > { %v1616_v27 = vrot.slane %v1602_v41, %v4266_v16  ;;  %v1607_v54 = vsel %vm1328_vm14, %v3529_v5, %v3530_v50  ;;  %v1608_v13 = vsel %vm1328_vm14, %v3530_v50, %v3529_v5  ;;  %v5331_v46 = vmin.f32 %v2121_v32, 15.0  ;;  %v3538_v5 = vpop.permute.xlu1 %3537 }
 0x649   : > { %v5333_v52 = vmin.f32 %v2122_v57, 15.0  ;;  %v1591_v29 = vadd.f32 %v1589_v34, %v1563_v63  ;;  %v1592_v2 = vadd.f32 %v1590_v14, %v1564_v28  ;;  %v1617_v23 = vmul.f32 %v1612_v47, %v1607_v54 }
 0x64a   : > { %6500 = vst [vmem:[#allocation35_spill] sm:$0xff] %v5331_v46  ;;  %v1618_v60 = vmul.f32 %v1616_v27, %v1608_v13  ;;  %v5336_v53 = vsub.f32 1.0, %v6502_v15  ;;  %v5339_v33 = vsub.f32 1.0, %v6504_v25  ;;  %vm2131_vm5 = vcmp.eq.f32.partialorder %v5331_v46, %v4278_v8 }
 0x64b   : > { %6501 = vst [vmem:[#allocation38_spill] sm:$0xff] %v5333_v52  ;;  %vm2132_vm4 = vcmp.eq.f32.partialorder %v5333_v52, %v4281_v20  ;;  %vm2125_vm13 = vcmp.eq.f32.partialorder %v6496_v1, %v4278_v8  ;;  %vm2126_vm15 = vcmp.eq.f32.partialorder %v6497_v0, %v4281_v20  ;;  %v2133_v47 = vsel %vm2131_vm5, %v6502_v15, 0.0 }
 0x64c   : > { %6503 = vst [vmem:[#allocation37_spill] sm:$0xff] %v5336_v53  ;;  %6505 = vst [vmem:[#allocation40_spill] sm:$0xff] %v5339_v33  ;;  %v2134_v14 = vsel %vm2132_vm4, %v6504_v25, 0.0  ;;  %v2129_v57 = vsel %vm2125_vm13, %v5336_v53, 0.0  ;;  %v2130_v27 = vsel %vm2126_vm15, %v5339_v33, 0.0  ;;  %v3535_v34 = vunpack.i.h.bf16 %v3533_v17 }
 0x64d   : > { %v3534_v63 = vunpack.i.l.bf16 %v3533_v17  ;;  %v2135_v28 = vadd.f32 %v2133_v47, %v2129_v57  ;;  %v2136_v58 = vadd.f32 %v2134_v14, %v2130_v27  ;;  %vm2155_vm8 = vcmp.eq.f32.partialorder %v6496_v1, %v4275_v19  ;;  %v3543_v57 = vpop.permute.xlu0 %3542 }
 0x64e   : > { %vm2156_vm3 = vcmp.eq.f32.partialorder %v6497_v0, %v4284_v26  ;;  %v5359_v20 = vadd.f32 %v1617_v23, %v1591_v29  ;;  %v2157_v41 = vsel %vm2155_vm8, %v5336_v53, 0.0  ;;  %v5363_v32 = vadd.f32 %v1618_v60, %v1592_v2 }
 0x64f   : > { %v2158_v50 = vsel %vm2156_vm3, %v5339_v33, 0.0  ;;  %v2146_v54 = vrot.slane %v2135_v28, %v6443_v37  ;;  %vm2159_vm1 = vcmp.eq.f32.partialorder %v5331_v46, %v4275_v19  ;;  %vm2160_vm5 = vcmp.eq.f32.partialorder %v5333_v52, %v4284_v26 }
 0x650   : > { %v2150_v13 = vrot.slane %v2136_v58, %v6443_v37  ;;  %v2142_v29 = vsel %vm1182_vm6, %v3535_v34, %v3534_v63  ;;  %v2161_v23 = vsel %vm2159_vm1, %v6502_v15, 0.0  ;;  %v2162_v17 = vsel %vm2160_vm5, %v6504_v25, 0.0 }
 0x651   : > { %v2163_v47 = vadd.f32 %v2161_v23, %v2157_v41  ;;  %v2164_v2 = vadd.f32 %v2162_v17, %v2158_v50  ;;  %v3540_v60 = vunpack.i.h.bf16 %v3538_v5  ;;  %v3539_v14 = vunpack.i.l.bf16 %v3538_v5 }
 0x652   : > { %v2141_v27 = vsel %vm1182_vm6, %v3534_v63, %v3535_v34  ;;  %v2151_v28 = vmul.f32 %v2146_v54, %v2142_v29  ;;  %vm2673_vm4 = vcmp.eq.f32.partialorder %v4850_v48, %v4275_v19  ;;  %vm2674_vm13 = vcmp.eq.f32.partialorder %v4915_v30, %v4284_v26 }
 0x653   : > { %v2174_v58 = vrot.slane %v2163_v47, %v6443_v37  ;;  %v2178_v8 = vrot.slane %v2164_v2, %v6443_v37  ;;  %v2675_v41 = vsel %vm2673_vm4, %v5043_v51, 0.0  ;;  %v2676_v50 = vsel %vm2674_vm13, %v5048_v38, 0.0 }
 0x654   : > { %vm2677_vm15 = vcmp.eq.f32.partialorder %v5036_v61, %v4275_v19  ;;  %vm2678_vm6 = vcmp.eq.f32.partialorder %v5045_v9, %v4284_v26  ;;  %v3545_v34 = vunpack.i.h.bf16 %v3543_v57  ;;  %v3544_v63 = vunpack.i.l.bf16 %v3543_v57 }
 0x655   : > { %v2152_v5 = vmul.f32 %v2150_v13, %v2141_v27  ;;  %v2170_v54 = vsel %vm1213_vm9, %v3540_v60, %v3539_v14  ;;  %v2679_v29 = vsel %vm2677_vm15, %v4922_v22, 0.0  ;;  %v2680_v23 = vsel %vm2678_vm6, %v4945_v4, 0.0 }
 0x656   : > { %v2169_v17 = vsel %vm1213_vm9, %v3539_v14, %v3540_v60  ;;  %v2179_v47 = vmul.f32 %v2174_v58, %v2170_v54  ;;  %v2681_v2 = vadd.f32 %v2679_v29, %v2675_v41  ;;  %v2682_v31 = vadd.f32 %v2680_v23, %v2676_v50  ;;  %v3548_v14 = vpop.permute.xlu1 %3547 }
 0x657   : > { %v2180_v19 = vmul.f32 %v2178_v8, %v2169_v17  ;;  %v2687_v26 = vsel %vm1213_vm9, %v3544_v63, %v3545_v34  ;;  %v2688_v13 = vsel %vm1213_vm9, %v3545_v34, %v3544_v63  ;;  %vm1621_vm8 = vcmp.eq.f32.partialorder %v6475_v43, %v6472_v62 }
 0x658   : > { %v2692_v57 = vrot.slane %v2681_v2, %v6443_v37  ;;  %v2696_v27 = vrot.slane %v2682_v31, %v6443_v37  ;;  %vm1622_vm3 = vcmp.eq.f32.partialorder %v4629_v55, %v6473_v6  ;;  %v1623_v60 = vsel %vm1621_vm8, %v5198_v36, 0.0 }
 0x659   : > { %v1624_v8 = vsel %vm1622_vm3, %v5201_v56, 0.0  ;;  %vm1625_vm1 = vcmp.eq.f32.partialorder %v5189_v35, %v6472_v62  ;;  %vm1626_vm5 = vcmp.eq.f32.partialorder %v5191_v45, %v6473_v6  ;;  %vm1653_vm4 = vcmp.eq.f32.partialorder %v5189_v35, %v6474_v39  ;;  %v6516_v45 = vld [vmem:[#allocation12_spill] sm:$0xff] }
 0x65a   : > { %v5413_v58 = vadd.f32 %v2179_v47, %v2151_v28  ;;  %v1627_v31 = vsel %vm1625_vm1, %v6479_v40, 0.0  ;;  %v1628_v41 = vsel %vm1626_vm5, %v4799_v59, 0.0  ;;  %vm1649_vm13 = vcmp.eq.f32.partialorder %v6475_v43, %v6474_v39  ;;  %v6506_v59 = vld [vmem:[#allocation65_spill] sm:$0xff] }
 0x65b   : > { %v5419_v50 = vadd.f32 %v2180_v19, %v2152_v5  ;;  %v1629_v34 = vadd.f32 %v1627_v31, %v1623_v60  ;;  %v1651_v63 = vsel %vm1649_vm13, %v5198_v36, 0.0  ;;  %v1655_v54 = vsel %vm1653_vm4, %v6479_v40, 0.0  ;;  %v6507_v5 = vld [vmem:[#allocation66_spill] sm:$0xff]  ;;  %v6508_v19 = vld [vmem:[#allocation77_spill] sm:$0xff]  ;;  %v6511_v60 = vld [vmem:[#allocation75_spill] sm:$0xff] }
 0x65c   : > { %v2697_v29 = vmul.f32 %v2692_v57, %v2688_v13  ;;  %v1630_v23 = vadd.f32 %v1628_v41, %v1624_v8  ;;  %v1657_v35 = vadd.f32 %v1655_v54, %v1651_v63  ;;  %v3550_v17 = vunpack.i.h.bf16 %v3548_v14  ;;  %v6509_v40 = vld [vmem:[#allocation73_spill] sm:$0xff]  ;;  %v6510_v57 = vld [vmem:[#allocation78_spill] sm:$0xff]  ;;  %v6512_v41 = vld [vmem:[#allocation68_spill] sm:$0xff] }
 0x65d   : > { %v2698_v28 = vmul.f32 %v2696_v27, %v2687_v26  ;;  %v1640_v47 = vrot.slane %v1629_v34, %v4266_v16  ;;  %v3549_v2 = vunpack.i.l.bf16 %v3548_v14  ;;  %vm1771_vm15 = vcmp.eq.f32.partialorder %v6506_v59, %v3792_v18 }
 0x65e   : > { %v1662_v43 = vrot.slane %v1657_v35, %v4266_v16  ;;  %vm1772_vm6 = vcmp.eq.f32.partialorder %v6507_v5, %v6489_v10  ;;  %v1773_v36 = vsel %vm1771_vm15, %v6508_v19, 0.0  ;;  %vm1775_vm8 = vcmp.eq.f32.partialorder %v6509_v40, %v3792_v18 }
 0x65f   : > { %v5433_v13 = vadd.f32 %v2697_v29, %v5265_v21  ;;  %v1635_v26 = vsel %vm1120_vm2, %v3549_v2, %v3550_v17  ;;  %v1774_v27 = vsel %vm1772_vm6, %v6510_v57, 0.0  ;;  %vm1776_vm3 = vcmp.eq.f32.partialorder %v6511_v60, %v6489_v10  ;;  %v6513_v21 = vld [vmem:[#allocation69_spill] sm:$0xff] }
 0x660   : > { %v1644_v8 = vrot.slane %v1630_v23, %v4266_v16  ;;  %v1636_v14 = vsel %vm1120_vm2, %v3550_v17, %v3549_v2  ;;  %v1645_v31 = vmul.f32 %v1640_v47, %v1635_v26  ;;  %v1777_v34 = vsel %vm1775_vm8, %v6512_v41, 0.0  ;;  %v3553_v17 = vpop.permute.xlu0 %3552 }
 0x661   : > { %v1667_v63 = vmul.f32 %v1662_v43, %v6484_v24  ;;  %v1778_v54 = vsel %vm1776_vm3, %v6513_v21, 0.0  ;;  %v1779_v29 = vadd.f32 %v1777_v34, %v1773_v36  ;;  %vm1793_vm1 = vcmp.eq.f32.partialorder %v6506_v59, %v6492_v42 }
 0x662   : > { %v1647_v35 = vadd.f32 %v1645_v31, %v5359_v20  ;;  %v1780_v56 = vadd.f32 %v1778_v54, %v1774_v27  ;;  %vm1794_vm5 = vcmp.eq.f32.partialorder %v6507_v5, %v6493_v49  ;;  %v1795_v23 = vsel %vm1793_vm1, %v6508_v19, 0.0 }
 0x663   : > { %v1784_v47 = vrot.slane %v1779_v29, %v4266_v16  ;;  %v1796_v2 = vsel %vm1794_vm5, %v6510_v57, 0.0  ;;  %vm1797_vm4 = vcmp.eq.f32.partialorder %v6509_v40, %v6492_v42  ;;  %vm1798_vm13 = vcmp.eq.f32.partialorder %v6511_v60, %v6493_v49 }
 0x664   : > { %v1646_v24 = vmul.f32 %v1644_v8, %v1636_v14  ;;  %v1788_v20 = vrot.slane %v1780_v56, %v4266_v16  ;;  %v1799_v43 = vsel %vm1797_vm4, %v6512_v41, 0.0  ;;  %v1800_v36 = vsel %vm1798_vm13, %v6513_v21, 0.0  ;;  %v6517_v14 = vld [vmem:[#allocation13_spill] sm:$0xff] }
 0x665   : > { %v5462_v26 = vadd.f32 %v2698_v28, %v5269_v12  ;;  %v1801_v27 = vadd.f32 %v1799_v43, %v1795_v23  ;;  %v1802_v31 = vadd.f32 %v1800_v36, %v1796_v2  ;;  %v3555_v34 = vunpack.i.h.bf16 %v3553_v17  ;;  %v6518_v12 = vld [vmem:[#allocation63_spill] sm:$0xff]  ;;  %v6521_v23 = vld [vmem:[#allocation100_spill] sm:$0xff]  ;;  %v6522_v2 = vld [vmem:[#allocation97_spill] sm:$0xff] }
 0x666   : > { %v5465_v54 = vadd.f32 %v1646_v24, %v5363_v32  ;;  %v5467_v29 = vadd.f32 %v1667_v63, %v1647_v35  ;;  %v1789_v55 = vmul.f32 %v1784_v47, %v6516_v45  ;;  %v3554_v8 = vunpack.i.l.bf16 %v3553_v17  ;;  %v6519_v63 = vld [vmem:[#allocation4_spill] sm:$0xff]  ;;  %v6520_v45 = vld [vmem:[#allocation95_spill] sm:$0xff] }
 0x667   : > { %v1790_v56 = vmul.f32 %v1788_v20, %v6517_v14  ;;  %v1812_v39 = vrot.slane %v1801_v27, %v4266_v16  ;;  %v1816_v6 = vrot.slane %v1802_v31, %v4266_v16  ;;  %vm1949_vm15 = vcmp.eq.f32.partialorder %v6518_v12, %v3792_v18  ;;  %v6523_v20 = vld [vmem:[#allocation94_spill] sm:$0xff]  ;;  %v6524_v27 = vld [vmem:[#allocation96_spill] sm:$0xff]  ;;  %v6526_v14 = vld [vmem:[#allocation93_spill] sm:$0xff] }
 0x668   : > { %6514 = vst [vmem:[#allocation39_spill] sm:$0xff] %v5465_v54  ;;  %6515 = vst [vmem:[#allocation42_spill] sm:$0xff] %v5467_v29  ;;  %v1807_v28 = vsel %vm504_vm11, %v3554_v8, %v3555_v34  ;;  %v1808_v32 = vsel %vm504_vm11, %v3555_v34, %v3554_v8  ;;  %vm1950_vm6 = vcmp.eq.f32.partialorder %v6519_v63, %v6489_v10  ;;  %v1951_v35 = vsel %vm1949_vm15, %v6520_v45, 0.0  ;;  %v6525_v31 = vld [vmem:[#allocation92_spill] sm:$0xff]  ;;  %v3558_v8 = vpop.permute.xlu1 %3557 }
 0x669   : > { %v1791_v17 = vadd.f32 %v1789_v55, %v6521_v23  ;;  %v1792_v47 = vadd.f32 %v1790_v56, %v5093_v44  ;;  %v1952_v24 = vsel %vm1950_vm6, %v6522_v2, 0.0  ;;  %vm1953_vm8 = vcmp.eq.f32.partialorder %v6523_v20, %v3792_v18 }
 0x66a   : > { %v1817_v43 = vmul.f32 %v1812_v39, %v1807_v28  ;;  %v1818_v36 = vmul.f32 %v1816_v6, %v1808_v32  ;;  %vm1954_vm3 = vcmp.eq.f32.partialorder %v6524_v27, %v6489_v10  ;;  %v1955_v34 = vsel %vm1953_vm8, %v6525_v31, 0.0 }
 0x66b   : > { %v1956_v54 = vsel %vm1954_vm3, %v6526_v14, 0.0  ;;  %v5491_v62 = vadd.f32 %v1955_v34, %v1951_v35  ;;  %vm1971_vm1 = vcmp.eq.f32.partialorder %v6518_v12, %v6492_v42  ;;  %vm1972_vm5 = vcmp.eq.f32.partialorder %v6519_v63, %v6493_v49 }
 0x66c   : > { %v5497_v55 = vadd.f32 %v1956_v54, %v1952_v24  ;;  %v1973_v44 = vsel %vm1971_vm1, %v6520_v45, 0.0  ;;  %v1974_v6 = vsel %vm1972_vm5, %v6522_v2, 0.0  ;;  %vm1975_vm4 = vcmp.eq.f32.partialorder %v6523_v20, %v6492_v42  ;;  %v3563_v24 = vpop.permute.xlu0 %3562 }
 0x66d   : > { %6527 = vst [vmem:[#allocation41_spill] sm:$0xff] %v5491_v62  ;;  %v1962_v39 = vrot.slane %v5491_v62, %v4266_v16  ;;  %vm1976_vm13 = vcmp.eq.f32.partialorder %v6524_v27, %v6493_v49  ;;  %v1977_v56 = vsel %vm1975_vm4, %v6525_v31, 0.0  ;;  %v3560_v28 = vunpack.i.h.bf16 %v3558_v8  ;;  %v6530_v27 = vld [vmem:[#allocation8_spill] sm:$0xff] }
 0x66e   : > { %6528 = vst [vmem:[#allocation16_spill] sm:$0xff] %v5497_v55  ;;  %v1966_v54 = vrot.slane %v5497_v55, %v4266_v16  ;;  %v1978_v32 = vsel %vm1976_vm13, %v6526_v14, 0.0  ;;  %v5511_v35 = vadd.f32 %v1977_v56, %v1973_v44  ;;  %v3559_v23 = vunpack.i.l.bf16 %v3558_v8  ;;  %v6531_v44 = vld [vmem:[#allocation99_spill] sm:$0xff]  ;;  %v3568_v56 = vpop.permute.xlu1 %3567  ;;  %v6532_v14 = vld [vmem:[#allocation9_spill] sm:$0xff] }
 0x66f   : > { %v5514_v20 = vadd.f32 %v1817_v43, %v1791_v17  ;;  %v5516_v62 = vadd.f32 %v1818_v36, %v1792_v47  ;;  %v5518_v2 = vadd.f32 %v1978_v32, %v1974_v6  ;;  %v1967_v31 = vmul.f32 %v1962_v39, %v6530_v27  ;;  %v6533_v32 = vld [vmem:[#allocation45_spill] sm:$0xff] }
 0x670   : > { %6529 = vst [vmem:[#allocation17_spill] sm:$0xff] %v5511_v35  ;;  %v1990_v45 = vrot.slane %v5511_v35, %v4266_v16  ;;  %v1985_v55 = vsel %vm504_vm11, %v3559_v23, %v3560_v28  ;;  %v2036_v8 = vrot.slane %v6531_v44, %v6443_v37  ;;  %v1968_v34 = vmul.f32 %v1966_v54, %v6532_v14  ;;  %v6534_v44 = vld [vmem:[#allocation101_spill] sm:$0xff]  ;;  %v6535_v14 = vld [vmem:[#allocation102_spill] sm:$0xff] }
 0x671   : > { %v1986_v17 = vsel %vm504_vm11, %v3560_v28, %v3559_v23  ;;  %v3565_v47 = vunpack.i.h.bf16 %v3563_v24  ;;  %v3564_v43 = vunpack.i.l.bf16 %v3563_v24  ;;  %v1994_v36 = vrot.slane %v5518_v2, %v4266_v16 }
 0x672   : > { %v1969_v27 = vadd.f32 %v1967_v31, %v5099_v3  ;;  %v1995_v6 = vmul.f32 %v1990_v45, %v1985_v55  ;;  %v2040_v39 = vrot.slane %v4917_v11, %v6443_v37  ;;  %v1970_v29 = vadd.f32 %v1968_v34, %v6533_v32  ;;  %v6536_v11 = vld [vmem:[#allocation26_spill] sm:$0xff]  ;;  %v6537_v55 = vld [vmem:[#allocation27_spill] sm:$0xff]  ;;  %v3573_v34 = vpop.permute.xlu0 %3572 }
 0x673   : > { %v2054_v35 = vrot.slane %v6534_v44, %v6443_v37  ;;  %v2058_v54 = vrot.slane %v6535_v14, %v6443_v37  ;;  %v3570_v28 = vunpack.i.h.bf16 %v3568_v56  ;;  %v1996_v23 = vmul.f32 %v1994_v36, %v1986_v17 }
 0x674   : > { %v2031_v24 = vsel %vm1213_vm9, %v3564_v43, %v3565_v47  ;;  %v2032_v3 = vsel %vm1213_vm9, %v3565_v47, %v3564_v43  ;;  %v3569_v45 = vunpack.i.l.bf16 %v3568_v56  ;;  %v5544_v31 = vadd.f32 %v1995_v6, %v1969_v27 }
 0x675   : > { %vm2183_vm15 = vcmp.eq.f32.partialorder %v6496_v1, %v6536_v11  ;;  %vm2184_vm6 = vcmp.eq.f32.partialorder %v6497_v0, %v6537_v55  ;;  %vm2187_vm8 = vcmp.eq.f32.partialorder %v5331_v46, %v6536_v11  ;;  %vm6538_vm3 = vcmp.lt.s32.totalorder %v6420_v7, 16 }
 0x676   : > { %v2049_v17 = vsel %vm6538_vm3, %v3569_v45, %v3570_v28  ;;  %vm6539_vm1 = vmmov %vm6538_vm3  ;;  %v2185_v56 = vsel %vm2183_vm15, %v5336_v53, 0.0  ;;  %v2186_v47 = vsel %vm2184_vm6, %v5339_v33, 0.0  ;;  %v2041_v43 = vmul.f32 %v2036_v8, %v2032_v3  ;;  %v6540_v8 = vld [vmem:[#allocation60_spill] sm:$0xff]  ;;  %v6541_v3 = vld [vmem:[#allocation89_spill] sm:$0xff] }
 0x677   : > { %v2050_v36 = vsel %vm6539_vm1, %v3570_v28, %v3569_v45  ;;  %vm2188_vm9 = vcmp.eq.f32.partialorder %v5333_v52, %v6537_v55  ;;  %v2189_v6 = vsel %vm2187_vm8, %v6502_v15, 0.0  ;;  %v3575_v14 = vunpack.i.h.bf16 %v3573_v34  ;;  %vm6542_vm13 = vmmov %vm6539_vm1 }
 0x678   : > { %v2059_v27 = vmul.f32 %v2054_v35, %v2050_v36  ;;  %v2190_v32 = vsel %vm2188_vm9, %v6504_v25, 0.0  ;;  %v2191_v44 = vadd.f32 %v2189_v6, %v2185_v56  ;;  %v3574_v46 = vunpack.i.l.bf16 %v3573_v34  ;;  %vm6546_vm6 = vmmov %vm6539_vm1  ;;  %v6547_v56 = vld [vmem:[#allocation67_spill] sm:$0xff] }
 0x679   : > { %v5562_v0 = vadd.f32 %v1996_v23, %v1970_v29  ;;  %v5564_v1 = vmul.f32 %v2040_v39, %v2031_v24  ;;  %v5566_v28 = vmul.f32 %v2058_v54, %v2049_v17  ;;  %v2192_v45 = vadd.f32 %v2190_v32, %v2186_v47  ;;  %v6543_v29 = vld [vmem:[#allocation103_spill] sm:$0xff]  ;;  %v6544_v39 = vld [vmem:[#allocation22_spill] sm:$0xff] }
 0x67a   : > { %v5568_v33 = vadd.f32 %v2059_v27, %v2041_v43  ;;  %v2202_v35 = vrot.slane %v2191_v44, %v6443_v37  ;;  %vm2445_vm5 = vcmp.eq.f32.partialorder %v6540_v8, %v3792_v18  ;;  %vm2446_vm4 = vcmp.eq.f32.partialorder %v6541_v3, %v6489_v10  ;;  %v6545_v54 = vld [vmem:[#allocation98_spill] sm:$0xff]  ;;  %v6549_v27 = vld [vmem:[#allocation91_spill] sm:$0xff]  ;;  %v3578_v44 = vpop.permute.xlu1 %3577 }
 0x67b   : > { %v2198_v34 = vsel %vm6542_vm13, %v3575_v14, %v3574_v46  ;;  %v2447_v23 = vsel %vm2445_vm5, %v6543_v29, 0.0  ;;  %v2448_v24 = vsel %vm2446_vm4, %v6544_v39, 0.0  ;;  %vm2449_vm15 = vcmp.eq.f32.partialorder %v6545_v54, %v3792_v18  ;;  %v6548_v47 = vld [vmem:[#allocation90_spill] sm:$0xff] }
 0x67c   : > { %v2206_v17 = vrot.slane %v2192_v45, %v6443_v37  ;;  %v2197_v36 = vsel %vm6546_vm6, %v3574_v46, %v3575_v14  ;;  %vm2450_vm8 = vcmp.eq.f32.partialorder %v6547_v56, %v6489_v10  ;;  %v2451_v43 = vsel %vm2449_vm15, %v6548_v47, 0.0 }
 0x67d   : > { %v2452_v6 = vsel %vm2450_vm8, %v6549_v27, 0.0  ;;  %v2453_v32 = vadd.f32 %v2451_v43, %v2447_v23  ;;  %vm2467_vm3 = vcmp.eq.f32.partialorder %v6540_v8, %v6492_v42  ;;  %vm2468_vm1 = vcmp.eq.f32.partialorder %v6541_v3, %v6493_v49 }
 0x67e   : > { %v2207_v25 = vmul.f32 %v2202_v35, %v2198_v34  ;;  %v2454_v45 = vadd.f32 %v2452_v6, %v2448_v24  ;;  %v2469_v15 = vsel %vm2467_vm3, %v6543_v29, 0.0  ;;  %v2470_v46 = vsel %vm2468_vm1, %v6544_v39, 0.0  ;;  %v6550_v24 = vld [vmem:[#allocation14_spill] sm:$0xff] }
 0x67f   : > { %v2208_v14 = vmul.f32 %v2206_v17, %v2197_v36  ;;  %v2458_v52 = vrot.slane %v2453_v32, %v6443_v37  ;;  %vm2471_vm9 = vcmp.eq.f32.partialorder %v6545_v54, %v6492_v42  ;;  %vm2472_vm5 = vcmp.eq.f32.partialorder %v6547_v56, %v6493_v49  ;;  %v6551_v36 = vld [vmem:[#allocation15_spill] sm:$0xff]  ;;  %v6552_v42 = vld [vmem:[#allocation21_spill] sm:$0xff] }
 0x680   : > { %v2462_v23 = vrot.slane %v2454_v45, %v6443_v37  ;;  %v2473_v43 = vsel %vm2471_vm9, %v6548_v47, 0.0  ;;  %v2474_v35 = vsel %vm2472_vm5, %v6549_v27, 0.0  ;;  %v3580_v34 = vunpack.i.h.bf16 %v3578_v44 }
 0x681   : > { %v2463_v6 = vmul.f32 %v2458_v52, %v6550_v24  ;;  %v2475_v53 = vadd.f32 %v2473_v43, %v2469_v15  ;;  %v2476_v10 = vadd.f32 %v2474_v35, %v2470_v46  ;;  %v3579_v17 = vunpack.i.l.bf16 %v3578_v44  ;;  %v3583_v44 = vpop.permute.xlu0 %3582  ;;  %v6553_v46 = vld [vmem:[#allocation46_spill] sm:$0xff] }
 0x682   : > { %v2464_v32 = vmul.f32 %v2462_v23, %v6551_v36  ;;  %vm2701_vm4 = vcmp.eq.f32.partialorder %v4850_v48, %v6536_v11  ;;  %vm2702_vm13 = vcmp.eq.f32.partialorder %v4915_v30, %v6537_v55  ;;  %vm2705_vm15 = vcmp.eq.f32.partialorder %v5036_v61, %v6536_v11 }
 0x683   : > { %v2486_v45 = vrot.slane %v2475_v53, %v6443_v37  ;;  %v2490_v49 = vrot.slane %v2476_v10, %v6443_v37  ;;  %v2465_v52 = vadd.f32 %v2463_v6, %v6552_v42  ;;  %v2481_v15 = vsel %vm504_vm11, %v3579_v17, %v3580_v34 }
 0x684   : > { %v2466_v23 = vadd.f32 %v2464_v32, %v6553_v46  ;;  %v2482_v43 = vsel %vm504_vm11, %v3580_v34, %v3579_v17  ;;  %v2703_v35 = vsel %vm2701_vm4, %v5043_v51, 0.0  ;;  %v2704_v24 = vsel %vm2702_vm13, %v5048_v38, 0.0  ;;  %v6554_v17 = vld [vmem:[#allocation53_spill] sm:$0xff] }
 0x685   : > { %v2491_v11 = vmul.f32 %v2486_v45, %v2481_v15  ;;  %v2492_v36 = vmul.f32 %v2490_v49, %v2482_v43  ;;  %vm2706_vm6 = vcmp.eq.f32.partialorder %v5045_v9, %v6537_v55  ;;  %v2707_v10 = vsel %vm2705_vm15, %v4922_v22, 0.0  ;;  %v3588_v45 = vpop.permute.xlu1 %3587  ;;  %v6557_v43 = vld [vmem:[#allocation55_spill] sm:$0xff] }
 0x686   : > { %v2708_v42 = vsel %vm2706_vm6, %v4945_v4, 0.0  ;;  %v2709_v53 = vadd.f32 %v2707_v10, %v2703_v35  ;;  %v3585_v6 = vunpack.i.h.bf16 %v3583_v44  ;;  %v3584_v61 = vunpack.i.l.bf16 %v3583_v44 }
 0x687   : > { %v5624_v32 = vadd.f32 %v2491_v11, %v2465_v52  ;;  %v5626_v46 = vadd.f32 %v2492_v36, %v2466_v23  ;;  %v2710_v34 = vadd.f32 %v2708_v42, %v2704_v24  ;;  %vm1821_vm8 = vcmp.eq.f32.partialorder %v6506_v59, %v6554_v17 }
 0x688   : > { %v2720_v49 = vrot.slane %v2709_v53, %v6443_v37  ;;  %vm6555_vm3 = vcmp.lt.s32.totalorder %v6420_v7, 16  ;;  %vm1822_vm9 = vcmp.eq.f32.partialorder %v6507_v5, %v6557_v43  ;;  %v1823_v44 = vsel %vm1821_vm8, %v6508_v19, 0.0 }
 0x689   : > { %v2715_v55 = vsel %vm6555_vm3, %v3584_v61, %v3585_v6  ;;  %vm6556_vm1 = vmmov %vm6555_vm3  ;;  %v2724_v52 = vrot.slane %v2710_v34, %v6443_v37  ;;  %v1824_v23 = vsel %vm1822_vm9, %v6510_v57, 0.0  ;;  %vm1825_vm5 = vcmp.eq.f32.partialorder %v6509_v40, %v6554_v17 }
 0x68a   : > { %v2716_v15 = vsel %vm6556_vm1, %v3585_v6, %v3584_v61  ;;  %vm1826_vm4 = vcmp.eq.f32.partialorder %v6511_v60, %v6557_v43  ;;  %v1827_v24 = vsel %vm1825_vm5, %v6512_v41, 0.0  ;;  %v3590_v11 = vunpack.i.h.bf16 %v3588_v45 }
 0x68b   : > { %v2725_v35 = vmul.f32 %v2720_v49, %v2716_v15  ;;  %v2726_v61 = vmul.f32 %v2724_v52, %v2715_v55  ;;  %v1828_v36 = vsel %vm1826_vm4, %v6513_v21, 0.0  ;;  %v1829_v10 = vadd.f32 %v1827_v24, %v1823_v44  ;;  %v3593_v15 = vpop.permute.xlu0 %3592 }
 0x68c   : > { %v3589_v42 = vunpack.i.l.bf16 %v3588_v45  ;;  %v5648_v53 = vadd.f32 %v5566_v28, %v5564_v1  ;;  %v5651_v6 = vadd.f32 %v2207_v25, %v5413_v58  ;;  %v5654_v34 = vadd.f32 %v2208_v14, %v5419_v50  ;;  %v6558_v25 = vld [vmem:[#allocation95_spill] sm:$0xff]  ;;  %v6559_v50 = vld [vmem:[#allocation97_spill] sm:$0xff]  ;;  %v6561_v14 = vld [vmem:[#allocation96_spill] sm:$0xff] }
 0x68d   : > { %v5657_v49 = vadd.f32 %v2725_v35, %v5433_v13  ;;  %v5660_v55 = vadd.f32 %v2726_v61, %v5462_v26  ;;  %v1830_v52 = vadd.f32 %v1828_v36, %v1824_v23  ;;  %vm1999_vm13 = vcmp.eq.f32.partialorder %v6518_v12, %v6554_v17  ;;  %v6560_v13 = vld [vmem:[#allocation94_spill] sm:$0xff]  ;;  %v6562_v45 = vld [vmem:[#allocation92_spill] sm:$0xff]  ;;  %v6563_v23 = vld [vmem:[#allocation93_spill] sm:$0xff] }
 0x68e   : > { %vm2000_vm15 = vcmp.eq.f32.partialorder %v6519_v63, %v6557_v43  ;;  %v1835_v1 = vsel %vm1328_vm14, %v3589_v42, %v3590_v11  ;;  %v2001_v58 = vsel %vm1999_vm13, %v6558_v25, 0.0  ;;  %vm2003_vm6 = vcmp.eq.f32.partialorder %v6560_v13, %v6554_v17 }
 0x68f   : > { %v2002_v28 = vsel %vm2000_vm15, %v6559_v50, 0.0  ;;  %v1840_v26 = vrot.slane %v1829_v10, %v4266_v16  ;;  %vm2004_vm8 = vcmp.eq.f32.partialorder %v6561_v14, %v6557_v43  ;;  %v2005_v12 = vsel %vm2003_vm6, %v6562_v45, 0.0  ;;  %v3598_v10 = vpop.permute.xlu1 %3597 }
 0x690   : > { %v3595_v44 = vunpack.i.h.bf16 %v3593_v15  ;;  %v1836_v63 = vsel %vm1328_vm14, %v3590_v11, %v3589_v42  ;;  %v2006_v35 = vsel %vm2004_vm8, %v6563_v23, 0.0  ;;  %v5679_v24 = vadd.f32 %v2005_v12, %v2001_v58 }
 0x691   : > { %v3594_v61 = vunpack.i.l.bf16 %v3593_v15  ;;  %v1844_v36 = vrot.slane %v1830_v52, %v4266_v16  ;;  %v1845_v25 = vmul.f32 %v1840_v26, %v1835_v1  ;;  %v5682_v50 = vadd.f32 %v2006_v35, %v2002_v28 }
 0x692   : > { %vm2495_vm3 = vcmp.eq.f32.partialorder %v6540_v8, %v6554_v17  ;;  %v2018_v13 = vrot.slane %v5679_v24, %v4266_v16  ;;  %vm2496_vm1 = vcmp.eq.f32.partialorder %v6541_v3, %v6557_v43  ;;  %vm2499_vm9 = vcmp.eq.f32.partialorder %v6545_v54, %v6554_v17  ;;  %v3603_v17 = vpop.permute.xlu0 %3602 }
 0x693   : > { %6564 = vst [vmem:[#allocation54_spill] sm:$0xff] %v5682_v50  ;;  %v2013_v11 = vsel %vm1328_vm14, %v3594_v61, %v3595_v44  ;;  %v2014_v42 = vsel %vm1328_vm14, %v3595_v44, %v3594_v61  ;;  %v2022_v15 = vrot.slane %v5682_v50, %v4266_v16  ;;  %v2497_v52 = vsel %vm2495_vm3, %v6543_v29, 0.0  ;;  %v6565_v50 = vld [vmem:[#allocation57_spill] sm:$0xff] }
 0x694   : > { %v2498_v1 = vsel %vm2496_vm1, %v6544_v39, 0.0  ;;  %v2023_v58 = vmul.f32 %v2018_v13, %v2013_v11  ;;  %vm2500_vm5 = vcmp.eq.f32.partialorder %v6547_v56, %v6557_v43  ;;  %v2501_v28 = vsel %vm2499_vm9, %v6548_v47, 0.0 }
 0x695   : > { %v3600_v26 = vunpack.i.h.bf16 %v3598_v10  ;;  %v1846_v14 = vmul.f32 %v1844_v36, %v1836_v63  ;;  %v2502_v45 = vsel %vm2500_vm5, %v6549_v27, 0.0  ;;  %v2503_v12 = vadd.f32 %v2501_v28, %v2497_v52  ;;  %v6566_v36 = vld [vmem:[#allocation58_spill] sm:$0xff] }
 0x696   : > { %v3599_v44 = vunpack.i.l.bf16 %v3598_v10  ;;  %v1847_v23 = vadd.f32 %v1845_v25, %v5514_v20  ;;  %v2024_v35 = vmul.f32 %v2022_v15, %v2014_v42  ;;  %v2504_v61 = vadd.f32 %v2502_v45, %v2498_v1  ;;  %v3608_v45 = vpop.permute.xlu1 %3607 }
 0x697   : > { %vm1849_vm4 = vcmp.eq.f32.partialorder %v6506_v59, %v6565_v50  ;;  %v2514_v13 = vrot.slane %v2503_v12, %v6443_v37  ;;  %vm1850_vm13 = vcmp.eq.f32.partialorder %v6507_v5, %v6566_v36  ;;  %v5715_v10 = vadd.f32 %v2023_v58, %v5544_v31 }
 0x698   : > { %v2509_v11 = vsel %vm1328_vm14, %v3599_v44, %v3600_v26  ;;  %v2510_v63 = vsel %vm1328_vm14, %v3600_v26, %v3599_v44  ;;  %v2518_v20 = vrot.slane %v2504_v61, %v6443_v37  ;;  %v1851_v25 = vsel %vm1849_vm4, %v6508_v19, 0.0 }
 0x699   : > { %6567 = vst [vmem:[#allocation56_spill] sm:$0xff] %v5715_v10  ;;  %v1852_v59 = vsel %vm1850_vm13, %v6510_v57, 0.0  ;;  %v2519_v42 = vmul.f32 %v2514_v13, %v2509_v11  ;;  %vm1853_vm15 = vcmp.eq.f32.partialorder %v6509_v40, %v6565_v50  ;;  %vm1854_vm6 = vcmp.eq.f32.partialorder %v6511_v60, %v6566_v36  ;;  %v6568_v57 = vld [vmem:[#allocation41_spill] sm:$0xff]  ;;  %v6570_v13 = vld [vmem:[#allocation6_spill] sm:$0xff] }
 0x69a   : > { %v3605_v15 = vunpack.i.h.bf16 %v3603_v17  ;;  %v2520_v52 = vmul.f32 %v2518_v20, %v2510_v63  ;;  %v1855_v5 = vsel %vm1853_vm15, %v6512_v41, 0.0  ;;  %v1856_v31 = vsel %vm1854_vm6, %v6513_v21, 0.0  ;;  %v6569_v21 = vld [vmem:[#allocation16_spill] sm:$0xff] }
 0x69b   : > { %v3604_v1 = vunpack.i.l.bf16 %v3603_v17  ;;  %v5727_v58 = vadd.f32 %v2519_v42, %v5624_v32  ;;  %v1857_v19 = vadd.f32 %v1855_v5, %v1851_v25  ;;  %v1858_v28 = vadd.f32 %v1856_v31, %v1852_v59  ;;  %v6571_v42 = vld [vmem:[#allocation7_spill] sm:$0xff]  ;;  %v6573_v5 = vld [vmem:[#allocation84_spill] sm:$0xff] }
 0x69c   : > { %v2066_v26 = vrot.slane %v6568_v57, %v6443_v37  ;;  %v5732_v40 = vadd.f32 %v2520_v52, %v5626_v46  ;;  %v2070_v17 = vrot.slane %v6569_v21, %v6443_v37  ;;  %v1848_v32 = vadd.f32 %v1846_v14, %v5516_v62  ;;  %v6572_v52 = vld [vmem:[#allocation17_spill] sm:$0xff]  ;;  %v6582_v21 = vld [vmem:[#allocation64_spill] sm:$0xff] }
 0x69d   : > { %v1863_v60 = vsel %vm1120_vm2, %v3604_v1, %v3605_v15  ;;  %v1864_v41 = vsel %vm1120_vm2, %v3605_v15, %v3604_v1  ;;  %v5742_v12 = vadd.f32 %v2024_v35, %v5562_v0  ;;  %v1868_v44 = vrot.slane %v1857_v19, %v4266_v16  ;;  %v6576_v57 = vld [vmem:[#allocation85_spill] sm:$0xff] }
 0x69e   : > { %v1872_v61 = vrot.slane %v1858_v28, %v4266_v16  ;;  %v2071_v11 = vmul.f32 %v2066_v26, %v6570_v13  ;;  %v3610_v63 = vunpack.i.h.bf16 %v3608_v45  ;;  %v3609_v20 = vunpack.i.l.bf16 %v3608_v45  ;;  %v6575_v28 = vld [vmem:[#allocation5_spill] sm:$0xff] }
 0x69f   : > { %v1873_v25 = vmul.f32 %v1868_v44, %v1863_v60  ;;  %v2072_v15 = vmul.f32 %v2070_v17, %v6571_v42  ;;  %v2084_v62 = vrot.slane %v6572_v52, %v6443_v37  ;;  %v2088_v0 = vrot.slane %v5518_v2, %v6443_v37  ;;  %v6577_v2 = vld [vmem:[#allocation37_spill] sm:$0xff]  ;;  %v6579_v60 = vld [vmem:[#allocation35_spill] sm:$0xff]  ;;  %v6583_v44 = vld [vmem:[#allocation70_spill] sm:$0xff] }
 0x6a0   : > { %v1874_v59 = vmul.f32 %v1872_v61, %v1864_v41  ;;  %v2073_v14 = vadd.f32 %v2071_v11, %v5568_v33  ;;  %v2079_v35 = vsel %vm504_vm11, %v3609_v20, %v3610_v63  ;;  %vm2211_vm8 = vcmp.eq.f32.partialorder %v6573_v5, %v3792_v18  ;;  %v6578_v33 = vld [vmem:[#allocation40_spill] sm:$0xff]  ;;  %v6580_v41 = vld [vmem:[#allocation38_spill] sm:$0xff] }
 0x6a1   : > { %v5758_v31 = vadd.f32 %v1873_v25, %v1847_v23  ;;  %v5761_v1 = vadd.f32 %v2072_v15, %v5648_v53  ;;  %v2080_v19 = vsel %vm504_vm11, %v3610_v63, %v3609_v20  ;;  %vm2212_vm3 = vcmp.eq.f32.partialorder %v6576_v57, %v6575_v28  ;;  %v6584_v63 = vld [vmem:[#allocation28_spill] sm:$0xff]  ;;  %v6585_v20 = vld [vmem:[#allocation30_spill] sm:$0xff]  ;;  %v3613_v25 = vpop.permute.xlu0 %3612 }
 0x6a2   : > { %v2213_v26 = vsel %vm2211_vm8, %v6577_v2, 0.0  ;;  %v2214_v45 = vsel %vm2212_vm3, %v6578_v33, 0.0  ;;  %vm2215_vm1 = vcmp.eq.f32.partialorder %v6579_v60, %v3792_v18  ;;  %vm2216_vm9 = vcmp.eq.f32.partialorder %v6580_v41, %v6575_v28 }
 0x6a3   : > { %6574 = vst [vmem:[#allocation65_spill] sm:$0xff] %v5758_v31  ;;  %v5773_v23 = vadd.f32 %v1874_v59, %v1848_v32  ;;  %v2089_v53 = vmul.f32 %v2084_v62, %v2079_v35  ;;  %v2217_v17 = vsel %vm2215_vm1, %v6582_v21, 0.0  ;;  %v2218_v61 = vsel %vm2216_vm9, %v6583_v44, 0.0  ;;  %v6586_v31 = vld [vmem:[#allocation10_spill] sm:$0xff] }
 0x6a4   : > { %v2219_v13 = vadd.f32 %v2217_v17, %v2213_v26  ;;  %v2220_v11 = vadd.f32 %v2218_v61, %v2214_v45  ;;  %vm2233_vm5 = vcmp.eq.f32.partialorder %v6573_v5, %v6584_v63  ;;  %vm2234_vm4 = vcmp.eq.f32.partialorder %v6576_v57, %v6585_v20 }
 0x6a5   : > { %6581 = vst [vmem:[#allocation66_spill] sm:$0xff] %v5773_v23  ;;  %v2235_v42 = vsel %vm2233_vm5, %v6577_v2, 0.0  ;;  %v2236_v15 = vsel %vm2234_vm4, %v6578_v33, 0.0  ;;  %vm2237_vm13 = vcmp.eq.f32.partialorder %v6579_v60, %v6584_v63  ;;  %vm2238_vm15 = vcmp.eq.f32.partialorder %v6580_v41, %v6585_v20  ;;  %v6587_v23 = vld [vmem:[#allocation11_spill] sm:$0xff] }
 0x6a6   : > { %v2224_v32 = vrot.slane %v2219_v13, %v6443_v37  ;;  %v2228_v59 = vrot.slane %v2220_v11, %v6443_v37  ;;  %v2239_v52 = vsel %vm2237_vm13, %v6582_v21, 0.0  ;;  %v2240_v62 = vsel %vm2238_vm15, %v6583_v44, 0.0 }
 0x6a7   : > { %v2241_v35 = vadd.f32 %v2239_v52, %v2235_v42  ;;  %v2242_v26 = vadd.f32 %v2240_v62, %v2236_v15  ;;  %v3615_v45 = vunpack.i.h.bf16 %v3613_v25  ;;  %v3614_v17 = vunpack.i.l.bf16 %v3613_v25  ;;  %v3618_v25 = vpop.permute.xlu1 %3617 }
 0x6a8   : > { %v5791_v61 = vmul.f32 %v2088_v0, %v2080_v19  ;;  %v5793_v46 = vadd.f32 %v2089_v53, %v2073_v14  ;;  %v2229_v10 = vmul.f32 %v2224_v32, %v6586_v31  ;;  %v2230_v16 = vmul.f32 %v2228_v59, %v6587_v23  ;;  %v6588_v59 = vld [vmem:[#allocation59_spill] sm:$0xff] }
 0x6a9   : > { %v2252_v13 = vrot.slane %v2241_v35, %v6443_v37  ;;  %v2247_v11 = vsel %vm504_vm11, %v3614_v17, %v3615_v45  ;;  %vm2523_vm6 = vcmp.eq.f32.partialorder %v6540_v8, %v6565_v50  ;;  %vm2524_vm8 = vcmp.eq.f32.partialorder %v6541_v3, %v6566_v36 }
 0x6aa   : > { %v2256_v0 = vrot.slane %v2242_v26, %v6443_v37  ;;  %v2248_v14 = vsel %vm504_vm11, %v3615_v45, %v3614_v17  ;;  %v2525_v31 = vsel %vm2523_vm6, %v6543_v29, 0.0  ;;  %v2526_v19 = vsel %vm2524_vm8, %v6544_v39, 0.0 }
 0x6ab   : > { %v2231_v23 = vadd.f32 %v2229_v10, %v5651_v6  ;;  %v2232_v53 = vadd.f32 %v2230_v16, %v5654_v34  ;;  %vm2527_vm3 = vcmp.eq.f32.partialorder %v6545_v54, %v6565_v50  ;;  %vm2528_vm1 = vcmp.eq.f32.partialorder %v6547_v56, %v6566_v36 }
 0x6ac   : > { %v2257_v42 = vmul.f32 %v2252_v13, %v2247_v11  ;;  %v2529_v15 = vsel %vm2527_vm3, %v6548_v47, 0.0  ;;  %v2530_v32 = vsel %vm2528_vm1, %v6549_v27, 0.0  ;;  %vm2555_vm9 = vcmp.eq.f32.partialorder %v6545_v54, %v6588_v59 }
 0x6ad   : > { %v2258_v52 = vmul.f32 %v2256_v0, %v2248_v14  ;;  %v2531_v62 = vadd.f32 %v2529_v15, %v2525_v31  ;;  %v2532_v6 = vadd.f32 %v2530_v32, %v2526_v19  ;;  %vm2551_vm5 = vcmp.eq.f32.partialorder %v6540_v8, %v6588_v59  ;;  %v6589_v14 = vld [vmem:[#allocation24_spill] sm:$0xff]  ;;  %v6590_v31 = vld [vmem:[#allocation43_spill] sm:$0xff] }
 0x6ae   : > { %v2553_v16 = vsel %vm2551_vm5, %v6543_v29, 0.0  ;;  %v2557_v34 = vsel %vm2555_vm9, %v6548_v47, 0.0  ;;  %v3620_v10 = vunpack.i.h.bf16 %v3618_v25  ;;  %v3619_v35 = vunpack.i.l.bf16 %v3618_v25 }
 0x6af   : > { %v2542_v26 = vrot.slane %v2531_v62, %v6443_v37  ;;  %v2546_v45 = vrot.slane %v2532_v6, %v6443_v37  ;;  %v2559_v17 = vadd.f32 %v2557_v34, %v2553_v16  ;;  %vm2729_vm4 = vcmp.eq.f32.partialorder %v4850_v48, %v3792_v18  ;;  %v3623_v62 = vpop.permute.xlu0 %3622 }
 0x6b0   : > { %v2537_v54 = vsel %vm1120_vm2, %v3619_v35, %v3620_v10  ;;  %v2538_v8 = vsel %vm1120_vm2, %v3620_v10, %v3619_v35  ;;  %vm2730_vm13 = vcmp.eq.f32.partialorder %v4915_v30, %v6575_v28  ;;  %v2731_v29 = vsel %vm2729_vm4, %v5043_v51, 0.0 }
 0x6b1   : > { %v2564_v47 = vrot.slane %v2559_v17, %v6443_v37  ;;  %v2547_v13 = vmul.f32 %v2542_v26, %v2537_v54  ;;  %v2548_v11 = vmul.f32 %v2546_v45, %v2538_v8  ;;  %v2732_v0 = vsel %vm2730_vm13, %v5048_v38, 0.0  ;;  %v3628_v17 = vpop.permute.xlu1 %3627 }
 0x6b2   : > { %vm2733_vm15 = vcmp.eq.f32.partialorder %v6589_v14, %v3792_v18  ;;  %vm2734_vm6 = vcmp.eq.f32.partialorder %v5045_v9, %v6575_v28  ;;  %vm2751_vm8 = vcmp.eq.f32.partialorder %v4850_v48, %v6584_v63  ;;  %vm2752_vm3 = vcmp.eq.f32.partialorder %v4915_v30, %v6585_v20 }
 0x6b3   : > { %v2569_v19 = vmul.f32 %v2564_v47, %v6590_v31  ;;  %v2549_v25 = vadd.f32 %v2547_v13, %v5727_v58  ;;  %v5847_v15 = vadd.f32 %v2548_v11, %v5732_v40  ;;  %v2735_v32 = vsel %vm2733_vm15, %v4922_v22, 0.0  ;;  %v6592_v31 = vld [vmem:[#allocation19_spill] sm:$0xff] }
 0x6b4   : > { %v2736_v18 = vsel %vm2734_vm6, %v4945_v4, 0.0  ;;  %v2737_v6 = vadd.f32 %v2735_v32, %v2731_v29  ;;  %v2753_v16 = vsel %vm2751_vm8, %v5043_v51, 0.0  ;;  %v2754_v34 = vsel %vm2752_vm3, %v5048_v38, 0.0 }
 0x6b5   : > { %v5853_v10 = vadd.f32 %v2569_v19, %v2549_v25  ;;  %v2738_v35 = vadd.f32 %v2736_v18, %v2732_v0  ;;  %vm2755_vm1 = vcmp.eq.f32.partialorder %v6589_v14, %v6584_v63  ;;  %vm2756_vm9 = vcmp.eq.f32.partialorder %v5045_v9, %v6585_v20  ;;  %v6591_v20 = vld [vmem:[#allocation18_spill] sm:$0xff] }
 0x6b6   : > { %v2742_v58 = vrot.slane %v2737_v6, %v6443_v37  ;;  %v2757_v40 = vsel %vm2755_vm1, %v4922_v22, 0.0  ;;  %v2758_v26 = vsel %vm2756_vm9, %v4945_v4, 0.0  ;;  %v3625_v45 = vunpack.i.h.bf16 %v3623_v62  ;;  %v6593_v6 = vld [vmem:[#allocation54_spill] sm:$0xff] }
 0x6b7   : > { %v2092_v54 = vadd.f32 %v5791_v61, %v5761_v1  ;;  %v2746_v8 = vrot.slane %v2738_v35, %v6443_v37  ;;  %v2759_v29 = vadd.f32 %v2757_v40, %v2753_v16  ;;  %v2760_v47 = vadd.f32 %v2758_v26, %v2754_v34  ;;  %v3633_v34 = vpop.permute.xlu0 %3632  ;;  %v6594_v40 = vld [vmem:[#allocation53_spill] sm:$0xff] }
 0x6b8   : > { %v5865_v13 = vadd.f32 %v2257_v42, %v2231_v23  ;;  %v5867_v63 = vadd.f32 %v2258_v52, %v2232_v53  ;;  %v2747_v11 = vmul.f32 %v2742_v58, %v6591_v20  ;;  %v3624_v0 = vunpack.i.l.bf16 %v3623_v62 }
 0x6b9   : > { %v2748_v19 = vmul.f32 %v2746_v8, %v6592_v31  ;;  %v2770_v25 = vrot.slane %v2759_v29, %v6443_v37  ;;  %v2102_v32 = vrot.slane %v5679_v24, %v6443_v37  ;;  %v3630_v18 = vunpack.i.h.bf16 %v3628_v17 }
 0x6ba   : > { %v2774_v1 = vrot.slane %v2760_v47, %v6443_v37  ;;  %v2765_v61 = vsel %vm504_vm11, %v3624_v0, %v3625_v45  ;;  %v2766_v23 = vsel %vm504_vm11, %v3625_v45, %v3624_v0  ;;  %v3629_v53 = vunpack.i.l.bf16 %v3628_v17 }
 0x6bb   : > { %v2749_v42 = vadd.f32 %v2747_v11, %v5657_v49  ;;  %v2750_v52 = vadd.f32 %v2748_v19, %v5660_v55  ;;  %v2775_v62 = vmul.f32 %v2770_v25, %v2765_v61  ;;  %v2106_v16 = vrot.slane %v6593_v6, %v6443_v37  ;;  %v6596_v61 = vld [vmem:[#allocation81_spill] sm:$0xff] }
 0x6bc   : > { %v2776_v24 = vmul.f32 %v2774_v1, %v2766_v23  ;;  %v2097_v35 = vsel %vm1328_vm14, %v3629_v53, %v3630_v18  ;;  %v2098_v58 = vsel %vm1328_vm14, %v3630_v18, %v3629_v53  ;;  %vm2261_vm11 = vcmp.eq.f32.partialorder %v6573_v5, %v6594_v40  ;;  %v6595_v1 = vld [vmem:[#allocation49_spill] sm:$0xff] }
 0x6bd   : > { %v2107_v26 = vmul.f32 %v2102_v32, %v2097_v35  ;;  %v2108_v45 = vmul.f32 %v2106_v16, %v2098_v58  ;;  %vm2262_vm5 = vcmp.eq.f32.partialorder %v6576_v57, %v6557_v43  ;;  %v2263_v49 = vsel %vm2261_vm11, %v6577_v2, 0.0  ;;  %v6600_v58 = vld [vmem:[#allocation82_spill] sm:$0xff] }
 0x6be   : > { %v2264_v55 = vsel %vm2262_vm5, %v6578_v33, 0.0  ;;  %vm2265_vm4 = vcmp.eq.f32.partialorder %v6579_v60, %v6594_v40  ;;  %vm2266_vm13 = vcmp.eq.f32.partialorder %v6580_v41, %v6557_v43  ;;  %v3635_v17 = vunpack.i.h.bf16 %v3633_v34 }
 0x6bf   : > { %v2893_v8 = vrot.slane %v5853_v10, 4  ;;  %v5898_v29 = vadd.f32 %v2775_v62, %v2749_v42  ;;  %v2267_v47 = vsel %vm2265_vm4, %v6582_v21, 0.0  ;;  %v2268_v20 = vsel %vm2266_vm13, %v6583_v44, 0.0  ;;  %v6597_v42 = vld [vmem:[#allocation74_spill] sm:$0xff]  ;;  %v6626_v10 = vld [vmem:[#allocation52_spill] sm:$0xff] }
 0x6c0   : > { %v5902_v11 = vadd.f32 %v2776_v24, %v2750_v52  ;;  %v2269_v0 = vadd.f32 %v2267_v47, %v2263_v49  ;;  %v2270_v31 = vadd.f32 %v2268_v20, %v2264_v55  ;;  %v3634_v19 = vunpack.i.l.bf16 %v3633_v34  ;;  %v6599_v52 = vld [vmem:[#allocation79_spill] sm:$0xff]  ;;  %v6603_v20 = vld [vmem:[#allocation88_spill] sm:$0xff] }
 0x6c1   : > { %v5905_v25 = vadd.f32 %v2107_v26, %v5793_v46  ;;  %v5907_v32 = vadd.f32 %v2108_v45, %v2092_v54  ;;  %v5910_v18 = vadd.f32 4.0, %v6575_v28  ;;  %vm1398_vm15 = vcmp.eq.f32.partialorder %v6596_v61, %v6595_v1  ;;  %v6598_v28 = vld [vmem:[#allocation87_spill] sm:$0xff]  ;;  %v6601_v26 = vld [vmem:[#allocation72_spill] sm:$0xff]  ;;  %v3638_v45 = vpop.permute.xlu1 %3637 }
 0x6c2   : > { %v2275_v23 = vsel %vm1328_vm14, %v3634_v19, %v3635_v17  ;;  %v2276_v53 = vsel %vm1328_vm14, %v3635_v17, %v3634_v19  ;;  %vm1394_vm6 = vcmp.eq.f32.partialorder %v6597_v42, %v6595_v1  ;;  %v2882_v46 = vrot.slane %v5742_v12, 4  ;;  %v6602_v17 = vld [vmem:[#allocation29_spill] sm:$0xff] }
 0x6c3   : > { %vm1370_vm8 = vcmp.eq.f32.partialorder %v6597_v42, %v5910_v18  ;;  %vm1374_vm3 = vcmp.eq.f32.partialorder %v6596_v61, %v5910_v18  ;;  %v1396_v54 = vsel %vm1394_vm6, %v6598_v28, 0.0  ;;  %v1400_v62 = vsel %vm1398_vm15, %v6599_v52, 0.0  ;;  %v6605_v42 = vld [vmem:[#allocation66_spill] sm:$0xff] }
 0x6c4   : > { %v2280_v6 = vrot.slane %v2269_v0, %v6443_v37  ;;  %v2284_v16 = vrot.slane %v2270_v31, %v6443_v37  ;;  %v1372_v34 = vsel %vm1370_vm8, %v6598_v28, 0.0  ;;  %v1376_v24 = vsel %vm1374_vm3, %v6599_v52, 0.0  ;;  %v6604_v31 = vld [vmem:[#allocation20_spill] sm:$0xff]  ;;  %v6607_v52 = vld [vmem:[#allocation71_spill] sm:$0xff] }
 0x6c5   : > { %v1378_v35 = vadd.f32 %v1376_v24, %v1372_v34  ;;  %v1402_v12 = vadd.f32 %v1400_v62, %v1396_v54  ;;  %vm1650_vm1 = vcmp.eq.f32.partialorder %v6600_v58, %v5910_v18  ;;  %vm1654_vm9 = vcmp.eq.f32.partialorder %v6601_v26, %v5910_v18  ;;  %v6606_v54 = vld [vmem:[#allocation47_spill] sm:$0xff]  ;;  %v6608_v62 = vld [vmem:[#allocation80_spill] sm:$0xff]  ;;  %v6613_v58 = vld [vmem:[#allocation34_spill] sm:$0xff] }
 0x6c6   : > { %v2285_v49 = vmul.f32 %v2280_v6, %v2275_v23  ;;  %v5935_v55 = vmul.f32 %v2284_v16, %v2276_v53  ;;  %v1652_v47 = vsel %vm1650_vm1, %v6602_v17, 0.0  ;;  %v1656_v0 = vsel %vm1654_vm9, %v6603_v20, 0.0  ;;  %v6609_v23 = vld [vmem:[#allocation56_spill] sm:$0xff]  ;;  %v6611_v6 = vld [vmem:[#allocation65_spill] sm:$0xff]  ;;  %v6614_v17 = vld [vmem:[#allocation86_spill] sm:$0xff] }
 0x6c7   : > { %v1386_v19 = vrot.slane %v1378_v35, %v6604_v31  ;;  %v1410_v1 = vrot.slane %v1402_v12, %v6604_v31  ;;  %v1658_v61 = vadd.f32 %v1656_v0, %v1652_v47  ;;  %v2900_v28 = vsel %vm552_vm7, %v6605_v42, %v2882_v46  ;;  %v6612_v24 = vld [vmem:[#allocation32_spill] sm:$0xff]  ;;  %v6616_v42 = vld [vmem:[#allocation31_spill] sm:$0xff] }
 0x6c8   : > { %vm1393_vm11 = vcmp.eq.f32.partialorder %v6607_v52, %v6606_v54  ;;  %vm1397_vm5 = vcmp.eq.f32.partialorder %v6608_v62, %v6606_v54  ;;  %v6610_v53 = vrot.slane %v6609_v23, 4  ;;  %v3640_v34 = vunpack.i.h.bf16 %v3638_v45  ;;  %v6615_v47 = vld [vmem:[#allocation76_spill] sm:$0xff] }
 0x6c9   : > { %v1388_v35 = vmul.f32 %v1386_v19, %v6612_v24  ;;  %v1412_v12 = vmul.f32 %v1410_v1, %v6613_v58  ;;  %v1666_v26 = vrot.slane %v1658_v61, %v6604_v31  ;;  %v1395_v46 = vsel %vm1393_vm11, %v6614_v17, 0.0  ;;  %v6617_v52 = vld [vmem:[#allocation36_spill] sm:$0xff] }
 0x6ca   : > { %v2899_v16 = vsel %vm552_vm7, %v6611_v6, %v6610_v53  ;;  %v1399_v20 = vsel %vm1397_vm5, %v6615_v47, 0.0  ;;  %v3639_v0 = vunpack.i.l.bf16 %v3638_v45  ;;  %vm2779_vm4 = vcmp.eq.f32.partialorder %v4850_v48, %v6594_v40  ;;  %v6618_v53 = vld [vmem:[#allocation39_spill] sm:$0xff] }
 0x6cb   : > { %vm2780_vm13 = vcmp.eq.f32.partialorder %v4915_v30, %v6557_v43  ;;  %v1390_v54 = vadd.f32 %v1388_v35, %v6616_v42  ;;  %v1668_v62 = vmul.f32 %v1666_v26, %v6617_v52  ;;  %v1401_v19 = vadd.f32 %v1399_v20, %v1395_v46 }
 0x6cc   : > { %v2781_v1 = vsel %vm2779_vm4, %v5043_v51, 0.0  ;;  %v2782_v61 = vsel %vm2780_vm13, %v5048_v38, 0.0  ;;  %vm2783_vm15 = vcmp.eq.f32.partialorder %v6589_v14, %v6594_v40  ;;  %vm2784_vm6 = vcmp.eq.f32.partialorder %v5045_v9, %v6557_v43  ;;  %v6619_v40 = vld [vmem:[#allocation33_spill] sm:$0xff] }
 0x6cd   : > { %v2793_v45 = vsel %vm1328_vm14, %v3639_v0, %v3640_v34  ;;  %v1414_v23 = vadd.f32 %v1412_v12, %v1390_v54  ;;  %v1670_v6 = vadd.f32 %v1668_v62, %v6618_v53  ;;  %v1406_v24 = vrot.slane %v1401_v19, %v6604_v31  ;;  %v6621_v53 = vld [vmem:[#allocation42_spill] sm:$0xff] }
 0x6ce   : > { %v2785_v35 = vsel %vm2783_vm15, %v4922_v22, 0.0  ;;  %v2786_v58 = vsel %vm2784_vm6, %v4945_v4, 0.0  ;;  %v2794_v17 = vsel %vm1328_vm14, %v3640_v34, %v3639_v0  ;;  %vm2808_vm8 = vcmp.eq.f32.partialorder %v4915_v30, %v6566_v36  ;;  %v6620_v34 = vld [vmem:[#allocation83_spill] sm:$0xff] }
 0x6cf   : > { %v2787_v26 = vadd.f32 %v2785_v35, %v2781_v1  ;;  %v2876_v43 = vrot.slane %v1670_v6, 4  ;;  %v1411_v46 = vmul.f32 %v1406_v24, %v6619_v40  ;;  %v2788_v47 = vadd.f32 %v2786_v58, %v2782_v61  ;;  %v3643_v61 = vpop.permute.xlu0 %3642  ;;  %v6623_v40 = vld [vmem:[#allocation62_spill] sm:$0xff] }
 0x6d0   : > { %v2810_v12 = vsel %vm2808_vm8, %v5048_v38, 0.0  ;;  %vm2812_vm3 = vcmp.eq.f32.partialorder %v5045_v9, %v6566_v36  ;;  %vm2289_vm1 = vcmp.eq.f32.partialorder %v6573_v5, %v6565_v50  ;;  %vm2290_vm14 = vcmp.eq.f32.partialorder %v6576_v57, %v6566_v36 }
 0x6d1   : > { %v2798_v20 = vrot.slane %v2787_v26, %v6443_v37  ;;  %v2898_v31 = vsel %vm552_vm7, %v1414_v23, %v2876_v43  ;;  %v1413_v0 = vadd.f32 %v1411_v46, %v6620_v34  ;;  %v2802_v42 = vrot.slane %v2788_v47, %v6443_v37 }
 0x6d2   : > { %v2814_v54 = vsel %vm2812_vm3, %v4945_v4, 0.0  ;;  %v2906_v52 = vpack.c.bf16 %v2900_v28, %v2898_v31  ;;  %v2291_v1 = vsel %vm2289_vm1, %v6577_v2, 0.0  ;;  %v6622_v6 = vrot.slane %v6621_v53, 4  ;;  %v6629_v53 = vld [vmem:[#allocation48_spill] sm:$0xff] }
 0x6d3   : > { %v2803_v62 = vmul.f32 %v2798_v20, %v2793_v45  ;;  %v2816_v19 = vadd.f32 %v2814_v54, %v2810_v12  ;;  %v2804_v24 = vmul.f32 %v2802_v42, %v2794_v17  ;;  %v2292_v57 = vsel %vm2290_vm14, %v6578_v33, 0.0 }
 0x6d4   : > { %v2897_v5 = vsel %vm552_vm7, %v1413_v0, %v6622_v6  ;;  %vm2293_vm9 = vcmp.eq.f32.partialorder %v6579_v60, %v6565_v50  ;;  %v2887_v23 = vrot.slane %v5905_v25, 4  ;;  %2927 = vmatprep.subr.bf16.mxu0 %v2906_v52  ;;  %vm2294_vm11 = vcmp.eq.f32.partialorder %v6580_v41, %v6566_v36  ;;  %v6630_v6 = vld [vmem:[#allocation25_spill] sm:$0xff] }
 0x6d5   : > { %v2905_v35 = vpack.c.bf16 %v2899_v16, %v2897_v5  ;;  %v2824_v28 = vrot.slane %v2816_v19, %v6443_v37  ;;  %v2287_v2 = vadd.f32 %v2285_v49, %v5865_v13  ;;  %v2295_v45 = vsel %vm2293_vm9, %v6582_v21, 0.0  ;;  %v6627_v19 = vld [vmem:[#allocation61_spill] sm:$0xff] }
 0x6d6   : > { %v2296_v58 = vsel %vm2294_vm11, %v6583_v44, 0.0  ;;  %v3645_v26 = vunpack.i.h.bf16 %v3643_v61  ;;  %v2288_v33 = vadd.f32 %v5935_v55, %v5867_v63  ;;  %v2297_v60 = vadd.f32 %v2295_v45, %v2291_v1  ;;  %v6624_v55 = vld [vmem:[#allocation2_spill] sm:$0xff]  ;;  %v6628_v1 = vld [vmem:[#allocation23_spill] sm:$0xff] }
 0x6d7   : > { %2928 = vmatpush1.bf16.msra.mxu0 %v2905_v35  ;;  %v2298_v25 = vadd.f32 %v2296_v58, %v2292_v57  ;;  %v3644_v17 = vunpack.i.l.bf16 %v3643_v61  ;;  %v2805_v16 = vadd.f32 %v2803_v62, %v5898_v29  ;;  %v2806_v43 = vadd.f32 %v2804_v24, %v5902_v11  ;;  %v6632_v24 = vld [vmem:[#allocation3_spill] sm:$0xff]  ;;  %v6634_v58 = vld [vmem:[#allocation50_spill] sm:$0xff] }
 0x6d8   : > { %v2826_v36 = vmul.f32 %v2824_v28, %v6623_v40  ;;  %vm2556_vm5 = vcmp.eq.f32.partialorder %v6547_v56, %v5910_v18  ;;  %v2308_v41 = vrot.slane %v2297_v60, %v6443_v37  ;;  %vm2552_vm4 = vcmp.eq.f32.partialorder %v6541_v3, %v5910_v18 }
 0x6d9   : > { %v2303_v21 = vsel %vm1120_vm2, %v3644_v17, %v3645_v26  ;;  %v2888_v44 = vrot.slane %v5907_v32, 4  ;;  %v2312_v13 = vrot.slane %v2298_v25, %v6443_v37  ;;  %v2304_v63 = vsel %vm1120_vm2, %v3645_v26, %v3644_v17 }
 0x6da   : > { %v2554_v29 = vsel %vm2552_vm4, %v6544_v39, 0.0  ;;  %v2558_v11 = vsel %vm2556_vm5, %v6549_v27, 0.0  ;;  %v2313_v56 = vmul.f32 %v2308_v41, %v2303_v21  ;;  %v2901_v46 = vsel %vm552_vm7, %v6624_v55, %v2887_v23 }
 0x6db   : > { %v2560_v49 = vadd.f32 %v2558_v11, %v2554_v29  ;;  %vm2830_vm13 = vcmp.eq.f32.partialorder %v4915_v30, %v5910_v18  ;;  %v2314_v3 = vmul.f32 %v2312_v13, %v2304_v63  ;;  %vm2834_vm15 = vcmp.eq.f32.partialorder %v5045_v9, %v5910_v18  ;;  %v6625_v9 = vld [vmem:[#allocation44_spill] sm:$0xff]  ;;  %v2971_v29 = vld [vmem:[%s6102_s10] sm:$0xff] }
 0x6dc   : > { %v2832_v32 = vsel %vm2830_vm13, %v5048_v38, 0.0  ;;  %vm2811_vm2 = vcmp.eq.f32.partialorder %v6589_v14, %v6565_v50  ;;  %v2315_v7 = vadd.f32 %v2313_v56, %v2287_v2  ;;  %v2836_v27 = vsel %vm2834_vm15, %v4945_v4, 0.0  ;;  %v6633_v2 = vld [vmem:[#allocation51_spill] sm:$0xff] }
 0x6dd   : > { %v2568_v39 = vrot.slane %v2560_v49, %v6443_v37  ;;  %vm2807_vm6 = vcmp.eq.f32.partialorder %v4850_v48, %v6565_v50  ;;  %v2838_v47 = vadd.f32 %v2836_v27, %v2832_v32  ;;  %v2813_v12 = vsel %vm2811_vm2, %v4922_v22, 0.0 }
 0x6de   : > { %v2809_v30 = vsel %vm2807_vm6, %v5043_v51, 0.0  ;;  %vm2829_vm8 = vcmp.eq.f32.partialorder %v4850_v48, %v6588_v59  ;;  %v2903_v18 = vsel %vm552_vm7, %v2315_v7, %v2893_v8  ;;  %v2828_v31 = vadd.f32 %v2826_v36, %v2806_v43  ;;  %v2916_v43 = vpop.permute.xlu1 %2915 }
 0x6df   : > { %v2570_v38 = vmul.f32 %v2568_v39, %v6625_v9  ;;  %v2815_v20 = vadd.f32 %v2813_v12, %v2809_v30  ;;  %v2831_v4 = vsel %vm2829_vm8, %v5043_v51, 0.0  ;;  %v2907_v34 = vpack.c.bf16 %v2903_v18, %v2901_v46 }
 0x6e0   : > { %v2846_v50 = vrot.slane %v2838_v47, %v6443_v37  ;;  %vm2833_vm3 = vcmp.eq.f32.partialorder %v6589_v14, %v6588_v59  ;;  %v2316_v0 = vadd.f32 %v2314_v3, %v2288_v33  ;;  %v2864_v61 = vrot.slane %v6628_v1, %v6443_v37  ;;  %v3136_v47 = vld [vmem:[%s6100_s8] sm:$0xff] }
 0x6e1   : > { %v2572_v42 = vadd.f32 %v2570_v38, %v5847_v15  ;;  %v2820_v48 = vrot.slane %v2815_v20, %v6443_v37  ;;  %v2835_v54 = vsel %vm2833_vm3, %v4922_v22, 0.0  ;;  %v6631_v59 = vrot.slane %v6630_v6, %v6443_v37  ;;  %v3144_v20 = vld [vmem:[%s6101_s9] sm:$0xff] }
 0x6e2   : > { %v2848_v52 = vmul.f32 %v2846_v50, %v6626_v10  ;;  %v2837_v8 = vadd.f32 %v2835_v54, %v2831_v4  ;;  %v2902_v22 = vsel %vm552_vm7, %v6632_v24, %v2888_v44  ;;  %v2869_v26 = vmul.f32 %v2864_v61, %v6634_v58 }
 0x6e3   : > { %v2894_v62 = vrot.slane %v2572_v42, 4  ;;  %v2825_v51 = vmul.f32 %v2820_v48, %v6627_v19  ;;  %v2870_v14 = vmul.f32 %v6631_v59, %v6629_v53  ;;  %v6635_v56 = vmov 0.0  }
 0x6e4   : > { %v2850_v5 = vadd.f32 %v2848_v52, %v2828_v31  ;;  %v2842_v15 = vrot.slane %v2837_v8, %v6443_v37 }
 0x6e5   : > { %v2904_v57 = vsel %vm552_vm7, %v2316_v0, %v2894_v62  ;;  %v2827_v23 = vadd.f32 %v2825_v51, %v2805_v16  ;;  %v2911_v16 = vld [vmem:[%s6098_s6] sm:$0xf]  ;;  %vm2972_vm7 = vcmask 64512  }
 0x6e6   : > { %v2908_v35 = vpack.c.bf16 %v2904_v57, %v2902_v22  ;;  %v2872_v28 = vadd.f32 %v2870_v14, %v2850_v5  ;;  %v2847_v45 = vmul.f32 %v2842_v15, %v6633_v2 }
 0x6e8   : > { %2929 = vmatprep.subr.bf16.mxu0 %v2908_v35  ;;  %v2910_v33 = vpack.c.bf16 %v2872_v28, %v2872_v28  ;;  %v2849_v60 = vadd.f32 %v2847_v45, %v2827_v23 }
 0x6e9   : > { %2930 = vmatpush1.bf16.msra.mxu0 %v2907_v34 }
 0x6ea   : > { %3239 = vmatprep.subr.msk.bf16.mxu0 %vm603_vm0, %v2910_v33  ;;  %v2871_v25 = vadd.f32 %v2869_v26, %v2849_v60 }
 0x6ec   : > { %v2909_v37 = vpack.c.bf16 %v2871_v25, %v2871_v25 }
 0x6ee   : > { %v2922_v17 = vsel %vm603_vm0, %v2909_v37, 0 }
 0x6ef   : > { %2932 = vmatpush1.bf16.msra.mxu0 %v2922_v17 }
 0x6f2   : > { %3240 = vmatmul.mubr.msk.bf16.vlgmr.msra.gmra.mrb[8].mxu0 %vm596_vm12, %v2911_v16 }
 0x7c5   : > { %v2961_v40 = vpop.f32.mrb[8].mxu0 }
 0x7c6   : > { %v2962_v36 = vadd.f32 %v2961_v40, %v2916_v43  ;;  %v2963_v41 = vpop.f32.mrb[9].mxu0 }
 0x7c7   : > { %v2964_v21 = vadd.f32 %v2963_v41, %v2916_v43  ;;  %v2965_v44 = vpop.f32.mrb[10].mxu0 }
 0x7c8   : > { %v2966_v13 = vpop.f32.mrb[11].mxu0 }
 0x7c9   : > { %v2968_v63 = vadd.f32 %v2964_v21, %v2962_v36 }
 0x7cb   : > { %2969 = vadd.xlane.f32.xlu0 %v2968_v63 }
 0x858   : > { %v2970_v11 = vpop.xlane.xlu0 %2969 }
 0x859   : > { %3294 = vmatpush3.msra.mxu1 %v2970_v11 }
 0x85a   : > { %3296 = vmatmul.mubr.msk.f32.vlgmr.msra.gmra.mrb[12].mxu1 %vm2972_vm7, %v2971_v29  ;;  %3298 = vmatprep.subr.mxu1 %v6635_v56 }
 0x85b   : > { %3300 = vmatprep.mubr.msk.f32.mxu1 %vm3680_vm10, %v6635_v56 }
 0x92d   : > { %v3042_v49 = vpop.f32.mrb[12].mxu1 }
 0x92e   : > { %3048 = vperm.xlu1 %3375, %v3042_v49   ;;  %v3297_v55 = vpop.f32.mrb[13].mxu1 }
 0x9ad   : > { %v3049_v46 = vpop.permute.xlu1 %3048 }
 0x9ae   : > { %v3051_v3 = vsub.f32 %v2962_v36, %v3049_v46  ;;  %v3052_v32 = vsub.f32 %v2964_v21, %v3049_v46 }
 0x9b0   : > { %v3053_v7 = vmul.f32 %v3051_v3, %v3051_v3  ;;  %v3054_v39 = vmul.f32 %v3052_v32, %v3052_v32 }
 0x9b2   : > { %v3055_v27 = vadd.f32 %v3054_v39, %v3053_v7 }
 0x9b4   : > { %3056 = vadd.xlane.f32.xlu1 %v3055_v27 }
 0x9c5   : > { %3139 = vperm.xlu1 %3375, %v3136_v47  }
 0xa41   : > { %v3057_v30 = vpop.xlane.xlu1 %3056 }
 0xa42   : > { %3299 = vmatpush3.msra.mxu1 %v3057_v30 }
 0xa43   : > { %3301 = vmatmul.mubr.msk.f32.vlgmr.msra.gmra.mrb[14].mxu1 %vm2972_vm7, %v2971_v29 }
 0xa45   : > { %v3140_v50 = vpop.permute.xlu1 %3139 }
 0xb16   : > { %v3124_v12 = vpop.f32.mrb[14].mxu1 }
 0xb17   : > { %v3125_v9 = vadd.f32 1e-05, %v3124_v12  ;;  %v3302_v38 = vpop.f32.mrb[15].mxu1 }
 0xb19   : > { %3660 = vrsqrt.f32 %v3125_v9 }
 0xb23   : > { %v3661_v18 = vpop.eup %3660 }
 0xb24   : > { %3131 = vperm.xlu0 %3374, %v3661_v18  }
 0xb28   : > { %3147 = vperm.xlu0 %3374, %v3144_v20  }
 0xba3   : > { %v3132_v4 = vpop.permute.xlu0 %3131 }
 0xba4   : > { %v3134_v31 = vmul.f32 %v3132_v4, %v3051_v3  ;;  %v3135_v34 = vmul.f32 %v3132_v4, %v3052_v32 }
 0xba6   : > { %v3142_v0 = vmul.f32 %v3140_v50, %v3134_v31  ;;  %v3143_v42 = vmul.f32 %v3140_v50, %v3135_v34 }
 0xba7   : > { %v3148_v48 = vpop.permute.xlu0 %3147 }
 0xba8   : > { %v3150_v54 = vadd.f32 %v3148_v48, %v3142_v0  ;;  %v3151_v10 = vadd.f32 %v3148_v48, %v3143_v42 }
 0xbaa   : > { %v3152_v52 = vmax.f32 %v3150_v54, 0.0  ;;  %v3153_v8 = vmax.f32 %v3151_v10, 0.0 }
 0xbac   : > { %3154 = vst [vmem:[%s386_s26] sm:$0xff] %v3152_v52  ;;  %3155 = vst [vmem:[%s386_s26 + $0x8] sm:$0xff] %v3153_v8 }
 0xbad PF: > { %s21_s17 = sadd.s32 1, %s3668_s17  }
 0xbae   : > { %p18_p4 = scmp.ge.s32.totalorder %s21_s17, 4  }
 0xbb0   :  { %20 = sbr.rel (!%p18_p4) target bundleno = 1 (0x1), region = 94 }

</bundles_post_ra>
